<compile_context>
chip_gen: v5e
topology: v5e:2x2
jax: 0.10.0
libtpu: 0.0.40
codegen_flags: <defaults>
</compile_context>

<pallas_src>
import functools
from collections import namedtuple

import numpy as np
import jax
import jax.numpy as jnp
from jax.experimental import pallas as pl
from jax.experimental.pallas import tpu as pltpu

EPS = 1e-5

# MXU operand dtype (per perf review): bf16 operands, f32 accumulation.  Set to
# jnp.float32 for a bit-tight (1e-4) match with the f32 reference.
MXU_DTYPE = jnp.bfloat16
_C_ALIGN = 16 if MXU_DTYPE == jnp.bfloat16 else 8   # channel padding (sublanes)

_Geo = namedtuple("_Geo", "h w wp cell n_cells pt halo n_tiles lt n_valid")


def _round_up(x, m):
    return (x + m - 1) // m * m


def _vmem_limit_bytes():
    """Generation-aware scoped-VMEM limit (96 MiB on v5e/v6e, 48 MiB on v7x)."""
    try:
        cap = int(pltpu.get_tpu_info().vmem_capacity_bytes)
    except Exception:   # no TPU info available -> assume the smallest (v7x)
        cap = 64 * 1024 * 1024
    return min((cap * 3) // 4, 96 * 1024 * 1024)


def _pick_lane_tile(n_cells, wp, c_in_p, c_out_p, vmem_budget):
    """Lane tile PT (multiple of HALO, HALO = roundup(wp+1,128)) from a VMEM
    byte budget: 2x double-buffered inputs + halo scratch + r blocks + acc."""
    halo = _round_up(wp + 1, 128)
    mxu_b = jnp.dtype(MXU_DTYPE).itemsize

    def need(pt):
        win = pt + 2 * halo
        return (2 * c_in_p * win * 4            # double-buffered input blocks (f32 worst case)
                + c_in_p * win * mxu_b          # halo scratch
                + 3 * c_out_p * pt * 4          # double-buffered r blocks + f32 accumulator
                + 2 * 9 * c_in_p * c_out_p * 4  # weights
                + (1 << 20))                    # stats / scale / headroom

    pt = max(halo, 256)
    while pt < 2048 and n_cells > 16 * pt and need(2 * pt) <= vmem_budget:
        pt *= 2                                 # fewer, fatter tiles when it fits
    while pt > halo and need(pt) > vmem_budget:
        pt = max(halo, pt // 2)                 # v7x-style shrink for big channels
    return pt, halo


def _divmod_const(q, d):
    """Exact (quotient, remainder) of non-negative int32 vectors by a positive
    compile-time constant via an f32 estimate + one integer fix-up (avoids any
    dependence on a vector integer div/rem lowering)."""
    est = jnp.floor(q.astype(jnp.float32) * (1.0 / d)).astype(jnp.int32)
    r = q - est * d
    est = jnp.where(r < 0, est - 1, jnp.where(r >= d, est + 1, est))
    r = jnp.where(r < 0, r + d, jnp.where(r >= d, r - d, r))
    return est, r


# --------------------------- Pallas kernels ---------------------------------
def _conv_kernel(*refs, fuse_bn, wp, h, w, cell, n_cells, pt, halo):
    """One lane tile of the 3x3 conv (9 accumulating MXU matmuls) plus masked
    per-tile BatchNorm partial sums.  If fuse_bn, the *previous* stage's
    BN+ReLU (scale/shift) is applied on the fly to the fetched input blocks."""
    if fuse_bn:
        (xl_ref, xc_ref, xr_ref, sc_ref, sh_ref, w_ref,
         r_ref, s1_ref, s2_ref, hbuf_ref) = refs
    else:
        (xl_ref, xc_ref, xr_ref, w_ref,
         r_ref, s1_ref, s2_ref, hbuf_ref) = refs
        sc_ref = sh_ref = None

    base = pl.program_id(0) * pt                       # flat index of tile start

    def valid_mask(start, width):
        # True at flat positions start + [0, width) that are real (non-padding)
        # pixels of some image in the batch; wp/cell/n_cells are static.
        q = start + jax.lax.broadcasted_iota(jnp.int32, (1, width), 1)
        inb = jnp.logical_and(q >= 0, q < n_cells)
        qc = jnp.where(inb, q, 0)
        _, qm = _divmod_const(qc, cell)                # position in padded image
        i, j = _divmod_const(qm, wp)                   # padded row / col
        return inb & (i >= 1) & (i <= h) & (j >= 1) & (j <= w)

    def prep(ref, start):
        v = ref[...]
        if fuse_bn:   # previous stage's BN + ReLU, zeroed outside valid pixels
            y = jnp.maximum(v * sc_ref[...] + sh_ref[...], 0.0)
            v = jnp.where(valid_mask(start, v.shape[1]), y, 0.0)
        return v.astype(hbuf_ref.dtype)

    # Haloed window [left sliver | cur | right sliver] : (C_in, HALO+PT+HALO).
    hbuf_ref[:, 0:halo] = prep(xl_ref, base - halo)
    hbuf_ref[:, halo:halo + pt] = prep(xc_ref, base)
    hbuf_ref[:, halo + pt:halo + 2 * pt if False else halo + pt + halo] = prep(
        xr_ref, base + pt)

    # 9 statically lane-shifted taps -> 9 accumulating MXU matmuls (f32 acc).
    acc = None
    for kh in range(3):
        for kw in range(3):
            k = kh * 3 + kw
            off = (kh - 1) * wp + (kw - 1)
            tap = hbuf_ref[:, halo + off: halo + pt + off]
            part = jnp.dot(w_ref[k], tap, preferred_element_type=jnp.float32)
            acc = part if acc is None else acc + part
    r_ref[...] = acc

    # Masked partial sums for the whole-batch BatchNorm statistics, written as
    # a lane-dense (8, C_out) block (sums in row 0, zeros elsewhere).
    m = valid_mask(base, pt).astype(jnp.float32)       # (1, PT)
    row1 = jnp.sum(acc * m, axis=1)                    # (C_out,)
    row2 = jnp.sum(acc * acc * m, axis=1)
    rows = jax.lax.broadcasted_iota(jnp.int32, (8, row1.shape[0]), 0)
    s1_ref[0] = jnp.where(rows == 0, row1[None, :], 0.0)
    s2_ref[0] = jnp.where(rows == 0, row2[None, :], 0.0)


def _bn_relu_kernel(r_ref, sc_ref, sh_ref, o_ref):
    """Final stage only: y = max(conv*scale + shift, 0) (pure streaming)."""
    o_ref[...] = jnp.maximum(r_ref[...] * sc_ref[...] + sh_ref[...], 0.0)


# --------------------------- stage wrapper -----------------------------------
def _conv_stage(a_in, w_oihw, scale_in, shift_in, geo, cparams):
    """One Conv2d(3x3,pad=1) stage (+ BN partial stats).  If scale_in/shift_in
    are given, the previous stage's BN+ReLU is fused into this conv."""
    fuse_bn = scale_in is not None
    c_out, c_in = w_oihw.shape[0], w_oihw.shape[1]
    c_in_p = a_in.shape[0]
    c_out_p = _round_up(c_out, _C_ALIGN)
    pt, halo, n_tiles, lt = geo.pt, geo.halo, geo.n_tiles, geo.lt

    # (C_out, C_in, 3, 3) -> (9, C_out_p, C_in_p); w9[kh*3+kw, o, c] = w[o,c,kh,kw]
    w_t = jnp.transpose(w_oihw, (2, 3, 0, 1))
    w9 = (jnp.zeros((3, 3, c_out_p, c_in_p), jnp.float32)
          .at[:, :, :c_out, :c_in].set(w_t)
          .reshape(9, c_out_p, c_in_p).astype(MXU_DTYPE))

    spb = pt // halo                    # halo-sized blocks per lane tile
    last = n_tiles * spb - 1            # last halo-block index (for clamping)

    sliver_l = pl.BlockSpec((c_in_p, halo),
                            lambda t: (0, jnp.maximum(t * spb - 1, 0)))
    cur = pl.BlockSpec((c_in_p, pt), lambda t: (0, t))
    sliver_r = pl.BlockSpec((c_in_p, halo),
                            lambda t: (0, jnp.minimum((t + 1) * spb, last)))
    w_spec = pl.BlockSpec((9, c_out_p, c_in_p), lambda t: (0, 0, 0))

    in_specs = [sliver_l, cur, sliver_r]
    args = [a_in, a_in, a_in]
    if fuse_bn:
        cs_spec = pl.BlockSpec((c_in_p, 1), lambda t: (0, 0))
        in_specs += [cs_spec, cs_spec]
        args += [scale_in, shift_in]
    in_specs.append(w_spec)
    args.append(w9)

    kern = functools.partial(_conv_kernel, fuse_bn=fuse_bn, wp=geo.wp, h=geo.h,
                             w=geo.w, cell=geo.cell, n_cells=geo.n_cells,
                             pt=pt, halo=halo)

    r, s1, s2 = pl.pallas_call(
        kern,
        out_shape=(
            jax.ShapeDtypeStruct((c_out_p, lt), jnp.float32),          # raw conv
            jax.ShapeDtypeStruct((n_tiles, 8, c_out_p), jnp.float32),  # sum
            jax.ShapeDtypeStruct((n_tiles, 8, c_out_p), jnp.float32),  # sum sq
        ),
        grid=(n_tiles,),
        in_specs=in_specs,
        out_specs=(
            pl.BlockSpec((c_out_p, pt), lambda t: (0, t)),
            pl.BlockSpec((1, 8, c_out_p), lambda t: (t, 0, 0)),
            pl.BlockSpec((1, 8, c_out_p), lambda t: (t, 0, 0)),
        ),
        scratch_shapes=[pltpu.VMEM((c_in_p, pt + 2 * halo), MXU_DTYPE)],
        compiler_params=cparams,
    )(*args)
    return r, s1, s2, c_out_p


def _bn_fold(sums, sqs, gamma, beta, n_valid, c_p):
    """Tiny per-channel finalize in XLA: batch mean/var -> folded scale/shift."""
    g = jnp.zeros((c_p,), jnp.float32).at[:gamma.shape[0]].set(gamma)
    b = jnp.zeros((c_p,), jnp.float32).at[:beta.shape[0]].set(beta)
    s = jnp.sum(sums, axis=(0, 1))
    sq = jnp.sum(sqs, axis=(0, 1))
    mean = s / n_valid
    var = jnp.maximum(sq / n_valid - mean * mean, 0.0)   # one-pass (biased) var
    inv = jax.lax.rsqrt(var + EPS)
    scale = g * inv
    shift = b - mean * scale
    return scale.reshape(c_p, 1), shift.reshape(c_p, 1)


@jax.jit
def double_conv(x, params):
    """Pallas DoubleConv forward: (Conv2d 3x3 pad=1 -> BatchNorm2d -> ReLU) x 2."""
    w1, b1, g1, be1, w2, b2, g2, be2 = params
    del b1, b2   # conv biases are exactly cancelled by the BN mean subtraction

    n, c_in, h, w = x.shape
    hp, wp = h + 2, w + 2
    cell = hp * wp
    n_cells = n * cell
    c_in_p = _round_up(c_in, _C_ALIGN)
    c1_p = _round_up(w1.shape[0], _C_ALIGN)
    c2_p = _round_up(w2.shape[0], _C_ALIGN)

    vmem_limit = _vmem_limit_bytes()
    pt, halo = _pick_lane_tile(n_cells, wp, max(c_in_p, c1_p), max(c1_p, c2_p),
                               (vmem_limit * 7) // 10)
    n_tiles = int(pl.cdiv(n_cells, pt))
    lt = n_tiles * pt
    geo = _Geo(h, w, wp, cell, n_cells, pt, halo, n_tiles, lt, n * h * w)

    cparams = pltpu.CompilerParams(dimension_semantics=("parallel",),
                                   vmem_limit_bytes=vmem_limit)

    # Canonical layout: zero-padded images, channel-major, flattened; zeros at
    # every non-pixel position and in the tail.  Stored in the MXU dtype.
    xp = jnp.pad(x.astype(jnp.float32), ((0, 0), (0, 0), (1, 1), (1, 1)))
    xc = jnp.transpose(xp, (1, 0, 2, 3)).reshape(c_in, n_cells)
    a0 = (jnp.zeros((c_in_p, lt), MXU_DTYPE)
          .at[:c_in, :n_cells].set(xc.astype(MXU_DTYPE)))

    # Stage 1: conv1 + batch stats (BN1+ReLU1 is fused into stage 2's conv).
    r1, s1, q1, _ = _conv_stage(a0, w1, None, None, geo, cparams)
    sc1, sh1 = _bn_fold(s1, q1, g1, be1, geo.n_valid, c1_p)

    # Stage 2: BN1+ReLU1 applied on the fly, then conv2 + batch stats.
    r2, s2, q2, _ = _conv_stage(r1, w2, sc1, sh1, geo, cparams)
    sc2, sh2 = _bn_fold(s2, q2, g2, be2, geo.n_valid, c2_p)

    # Final BN2 + ReLU2 (needs the global batch stats -> one streaming pass over
    # exactly n_tiles interior tiles; output masking is unnecessary because the
    # epilogue only extracts valid pixel lanes).
    a2 = pl.pallas_call(
        _bn_relu_kernel,
        out_shape=jax.ShapeDtypeStruct((c2_p, lt), jnp.float32),
        grid=(n_tiles,),
        in_specs=[pl.BlockSpec((c2_p, pt), lambda t: (0, t)),
                  pl.BlockSpec((c2_p, 1), lambda t: (0, 0)),
                  pl.BlockSpec((c2_p, 1), lambda t: (0, 0))],
        out_specs=pl.BlockSpec((c2_p, pt), lambda t: (0, t)),
        compiler_params=cparams,
    )(r2, sc2, sh2)

    # Back to NCHW, dropping channel padding and the spatial zero-padding ring.
    c_out = w2.shape[0]
    body = a2[:c_out, :n_cells].reshape(c_out, n, hp, wp)
    return jnp.transpose(body[:, :, 1:h + 1, 1:w + 1], (1, 0, 2, 3))


# ---------------- pure-JAX reference (for correctness check) ----------------
def _ref_stage(x, w, b, g, be):
    y = jax.lax.conv_general_dilated(
        x, w, window_strides=(1, 1), padding="SAME",
        dimension_numbers=("NCHW", "OIHW", "NCHW"))
    y = y + b[None, :, None, None]
    mean = jnp.mean(y, axis=(0, 2, 3), keepdims=True)
    var = jnp.mean((y - mean) ** 2, axis=(0, 2, 3), keepdims=True)
    y = (y - mean) * jax.lax.rsqrt(var + EPS)
    y = y * g[None, :, None, None] + be[None, :, None, None]
    return jnp.maximum(y, 0.0)


def double_conv_ref(x, params):
    w1, b1, g1, be1, w2, b2, g2, be2 = params
    return _ref_stage(_ref_stage(x, w1, b1, g1, be1), w2, b2, g2, be2)


if __name__ == "__main__":
    in_ch, out_ch = 4, 8
    N, H, W = 2, 16, 16

    key = jax.random.PRNGKey(0)
    keys = jax.random.split(key, 9)
    x = jax.random.normal(keys[0], (N, in_ch, H, W), jnp.float32)

    params = (
        0.1 * jax.random.normal(keys[1], (out_ch, in_ch, 3, 3), jnp.float32),   # w1
        0.1 * jax.random.normal(keys[2], (out_ch,), jnp.float32),               # b1
        1.0 + 0.1 * jax.random.normal(keys[3], (out_ch,), jnp.float32),         # gamma1
        0.1 * jax.random.normal(keys[4], (out_ch,), jnp.float32),               # beta1
        0.1 * jax.random.normal(keys[5], (out_ch, out_ch, 3, 3), jnp.float32),  # w2
        0.1 * jax.random.normal(keys[6], (out_ch,), jnp.float32),               # b2
        1.0 + 0.1 * jax.random.normal(keys[7], (out_ch,), jnp.float32),         # gamma2
        0.1 * jax.random.normal(keys[8], (out_ch,), jnp.float32),               # beta2
    )

    out = jax.block_until_ready(double_conv(x, params))
    ref = jax.block_until_ready(double_conv_ref(x, params))

    assert out.shape == (N, out_ch, H, W), out.shape
    # bf16 MXU operands (f32 accumulation) -> loose tolerance; f32 MXU_DTYPE
    # matches the f32 reference to ~1e-4.
    tol = 1e-4 if MXU_DTYPE == jnp.float32 else 5e-2
    np.testing.assert_allclose(np.asarray(out), np.asarray(ref),
                               rtol=tol, atol=tol)
    print("KERNEL_OK")
</pallas_src>

<mosaic_0001>
module attributes {stable_mosaic.version = 11 : i64} {
  func.func @_bn_relu_kernel(%arg0: i32, %arg1: memref<16x256xf32, #tpu.memory_space<vmem>>, %arg2: memref<16x1xf32, #tpu.memory_space<vmem>>, %arg3: memref<16x1xf32, #tpu.memory_space<vmem>>, %arg4: memref<16x256xf32, #tpu.memory_space<vmem>>) attributes {dimension_semantics = [#tpu.dimension_semantics<parallel>], iteration_bounds = array<i64: 3>, scalar_prefetch = 0 : i64, scratch_operands = 0 : i64, tpu.core_type = #tpu.core_type<tc>, window_params = [{transform_indices = @transform_0, window_bounds = array<i64: 16, 256>}, {pipeline_mode = #tpu.pipeline_mode<synchronous>, transform_indices = @transform_1, window_bounds = array<i64: 16, 1>}, {pipeline_mode = #tpu.pipeline_mode<synchronous>, transform_indices = @transform_2, window_bounds = array<i64: 16, 1>}, {transform_indices = @transform_3, window_bounds = array<i64: 16, 256>}]} {
    %c0 = arith.constant 0 : index
    %c0_0 = arith.constant 0 : index
    %0 = vector.load %arg1[%c0, %c0_0] : memref<16x256xf32, #tpu.memory_space<vmem>>, vector<16x256xf32>
    %c0_1 = arith.constant 0 : index
    %c0_2 = arith.constant 0 : index
    %1 = vector.load %arg2[%c0_1, %c0_2] : memref<16x1xf32, #tpu.memory_space<vmem>>, vector<16x1xf32>
    %2 = vector.broadcast %1 : vector<16x1xf32> to vector<16x256xf32>
    %3 = arith.mulf %0, %2 : vector<16x256xf32>
    %c0_3 = arith.constant 0 : index
    %c0_4 = arith.constant 0 : index
    %4 = vector.load %arg3[%c0_3, %c0_4] : memref<16x1xf32, #tpu.memory_space<vmem>>, vector<16x1xf32>
    %5 = vector.broadcast %4 : vector<16x1xf32> to vector<16x256xf32>
    %6 = arith.addf %3, %5 : vector<16x256xf32>
    %cst = arith.constant 0.000000e+00 : f32
    %7 = vector.broadcast %cst : f32 to vector<16x256xf32>
    %8 = arith.maximumf %6, %7 : vector<16x256xf32>
    %c0_5 = arith.constant 0 : index
    %c0_6 = arith.constant 0 : index
    %9 = vector.load %arg4[%c0_5, %c0_6] : memref<16x256xf32, #tpu.memory_space<vmem>>, vector<16x256xf32>
    tpu.vector_store %arg4[%c0_5, %c0_6], %8 {strides = array<i32>} : memref<16x256xf32, #tpu.memory_space<vmem>>, vector<16x256xf32>,
    return
  }
  func.func @transform_0(%arg0: i32) -> (i32, i32) {
    %c0_i32 = arith.constant 0 : i32
    %c0_i32_0 = arith.constant 0 : i32
    return %c0_i32, %arg0 : i32, i32
  }
  func.func @transform_1(%arg0: i32) -> (i32, i32) {
    %c0_i32 = arith.constant 0 : i32
    %c0_i32_0 = arith.constant 0 : i32
    %c0_i32_1 = arith.constant 0 : i32
    return %c0_i32, %c0_i32_0 : i32, i32
  }
  func.func @transform_2(%arg0: i32) -> (i32, i32) {
    %c0_i32 = arith.constant 0 : i32
    %c0_i32_0 = arith.constant 0 : i32
    %c0_i32_1 = arith.constant 0 : i32
    return %c0_i32, %c0_i32_0 : i32, i32
  }
  func.func @transform_3(%arg0: i32) -> (i32, i32) {
    %c0_i32 = arith.constant 0 : i32
    %c0_i32_0 = arith.constant 0 : i32
    return %c0_i32, %arg0 : i32, i32
  }
}

module attributes {stable_mosaic.version = 11 : i64} {
  func.func @_conv_kernel(%arg0: i32, %arg1: memref<16x128xbf16, #tpu.memory_space<vmem>>, %arg2: memref<16x256xbf16, #tpu.memory_space<vmem>>, %arg3: memref<16x128xbf16, #tpu.memory_space<vmem>>, %arg4: memref<9x16x16xbf16, #tpu.memory_space<vmem>>, %arg5: memref<16x256xf32, #tpu.memory_space<vmem>>, %arg6: memref<1x8x16xf32, #tpu.memory_space<vmem>>, %arg7: memref<1x8x16xf32, #tpu.memory_space<vmem>>, %arg8: memref<16x512xbf16, #tpu.memory_space<vmem>>) attributes {dimension_semantics = [#tpu.dimension_semantics<parallel>], iteration_bounds = array<i64: 3>, scalar_prefetch = 0 : i64, scratch_operands = 1 : i64, tpu.core_type = #tpu.core_type<tc>, window_params = [{transform_indices = @transform_0, window_bounds = array<i64: 16, 128>}, {transform_indices = @transform_1, window_bounds = array<i64: 16, 256>}, {transform_indices = @transform_2, window_bounds = array<i64: 16, 128>}, {pipeline_mode = #tpu.pipeline_mode<synchronous>, transform_indices = @transform_3, window_bounds = array<i64: 9, 16, 16>}, {transform_indices = @transform_4, window_bounds = array<i64: 16, 256>}, {transform_indices = @transform_5, window_bounds = array<i64: 1, 8, 16>}, {transform_indices = @transform_6, window_bounds = array<i64: 1, 8, 16>}]} {
    %c256_i32 = arith.constant 256 : i32
    %0 = arith.muli %arg0, %c256_i32 : i32
    %c0 = arith.constant 0 : index
    %c0_0 = arith.constant 0 : index
    %1 = vector.load %arg1[%c0, %c0_0] : memref<16x128xbf16, #tpu.memory_space<vmem>>, vector<16x128xbf16>
    %c0_1 = arith.constant 0 : index
    %c0_2 = arith.constant 0 : index
    %2 = vector.load %arg8[%c0_1, %c0_2] : memref<16x512xbf16, #tpu.memory_space<vmem>>, vector<16x128xbf16>
    tpu.vector_store %arg8[%c0_1, %c0_2], %1 {strides = array<i32>} : memref<16x512xbf16, #tpu.memory_space<vmem>>, vector<16x128xbf16>,
    %c0_3 = arith.constant 0 : index
    %c0_4 = arith.constant 0 : index
    %3 = vector.load %arg2[%c0_3, %c0_4] : memref<16x256xbf16, #tpu.memory_space<vmem>>, vector<16x256xbf16>
    %c0_5 = arith.constant 0 : index
    %c128 = arith.constant 128 : index
    %4 = vector.load %arg8[%c0_5, %c128] : memref<16x512xbf16, #tpu.memory_space<vmem>>, vector<16x256xbf16>
    tpu.vector_store %arg8[%c0_5, %c128], %3 {strides = array<i32>} : memref<16x512xbf16, #tpu.memory_space<vmem>>, vector<16x256xbf16>,
    %c0_6 = arith.constant 0 : index
    %c0_7 = arith.constant 0 : index
    %5 = vector.load %arg3[%c0_6, %c0_7] : memref<16x128xbf16, #tpu.memory_space<vmem>>, vector<16x128xbf16>
    %c0_8 = arith.constant 0 : index
    %c384 = arith.constant 384 : index
    %6 = vector.load %arg8[%c0_8, %c384] : memref<16x512xbf16, #tpu.memory_space<vmem>>, vector<16x128xbf16>
    tpu.vector_store %arg8[%c0_8, %c384], %5 {strides = array<i32>} : memref<16x512xbf16, #tpu.memory_space<vmem>>, vector<16x128xbf16>,
    %c0_9 = arith.constant 0 : index
    %c109 = arith.constant 109 : index
    %7 = vector.load %arg8[%c0_9, %c109] : memref<16x512xbf16, #tpu.memory_space<vmem>>, vector<16x256xbf16>
    %c0_10 = arith.constant 0 : index
    %c0_11 = arith.constant 0 : index
    %c0_12 = arith.constant 0 : index
    %8 = vector.load %arg4[%c0_10, %c0_11, %c0_12] : memref<9x16x16xbf16, #tpu.memory_space<vmem>>, vector<1x16x16xbf16>
    %9 = vector.shape_cast %8 : vector<1x16x16xbf16> to vector<16x16xbf16>
    %cst = arith.constant dense<0.000000e+00> : vector<16x256xf32>
    %10 = tpu.matmul %9, %7, %cst {dimension_numbers = #tpu.dot_dimension_numbers<[1], [0], [0], [1], [0, 0, 1, 1], [], []>} : vector<16x16xbf16>, vector<16x256xbf16>, vector<16x256xf32> -> vector<16x256xf32>
    %c0_13 = arith.constant 0 : index
    %c110 = arith.constant 110 : index
    %11 = vector.load %arg8[%c0_13, %c110] : memref<16x512xbf16, #tpu.memory_space<vmem>>, vector<16x256xbf16>
    %c1 = arith.constant 1 : index
    %c0_14 = arith.constant 0 : index
    %c0_15 = arith.constant 0 : index
    %12 = vector.load %arg4[%c1, %c0_14, %c0_15] : memref<9x16x16xbf16, #tpu.memory_space<vmem>>, vector<1x16x16xbf16>
    %13 = vector.shape_cast %12 : vector<1x16x16xbf16> to vector<16x16xbf16>
    %cst_16 = arith.constant dense<0.000000e+00> : vector<16x256xf32>
    %14 = tpu.matmul %13, %11, %cst_16 {dimension_numbers = #tpu.dot_dimension_numbers<[1], [0], [0], [1], [0, 0, 1, 1], [], []>} : vector<16x16xbf16>, vector<16x256xbf16>, vector<16x256xf32> -> vector<16x256xf32>
    %15 = arith.addf %10, %14 : vector<16x256xf32>
    %c0_17 = arith.constant 0 : index
    %c111 = arith.constant 111 : index
    %16 = vector.load %arg8[%c0_17, %c111] : memref<16x512xbf16, #tpu.memory_space<vmem>>, vector<16x256xbf16>
    %c2 = arith.constant 2 : index
    %c0_18 = arith.constant 0 : index
    %c0_19 = arith.constant 0 : index
    %17 = vector.load %arg4[%c2, %c0_18, %c0_19] : memref<9x16x16xbf16, #tpu.memory_space<vmem>>, vector<1x16x16xbf16>
    %18 = vector.shape_cast %17 : vector<1x16x16xbf16> to vector<16x16xbf16>
    %cst_20 = arith.constant dense<0.000000e+00> : vector<16x256xf32>
    %19 = tpu.matmul %18, %16, %cst_20 {dimension_numbers = #tpu.dot_dimension_numbers<[1], [0], [0], [1], [0, 0, 1, 1], [], []>} : vector<16x16xbf16>, vector<16x256xbf16>, vector<16x256xf32> -> vector<16x256xf32>
    %20 = arith.addf %15, %19 : vector<16x256xf32>
    %c0_21 = arith.constant 0 : index
    %c127 = arith.constant 127 : index
    %21 = vector.load %arg8[%c0_21, %c127] : memref<16x512xbf16, #tpu.memory_space<vmem>>, vector<16x256xbf16>
    %c3 = arith.constant 3 : index
    %c0_22 = arith.constant 0 : index
    %c0_23 = arith.constant 0 : index
    %22 = vector.load %arg4[%c3, %c0_22, %c0_23] : memref<9x16x16xbf16, #tpu.memory_space<vmem>>, vector<1x16x16xbf16>
    %23 = vector.shape_cast %22 : vector<1x16x16xbf16> to vector<16x16xbf16>
    %cst_24 = arith.constant dense<0.000000e+00> : vector<16x256xf32>
    %24 = tpu.matmul %23, %21, %cst_24 {dimension_numbers = #tpu.dot_dimension_numbers<[1], [0], [0], [1], [0, 0, 1, 1], [], []>} : vector<16x16xbf16>, vector<16x256xbf16>, vector<16x256xf32> -> vector<16x256xf32>
    %25 = arith.addf %20, %24 : vector<16x256xf32>
    %c0_25 = arith.constant 0 : index
    %c128_26 = arith.constant 128 : index
    %26 = vector.load %arg8[%c0_25, %c128_26] : memref<16x512xbf16, #tpu.memory_space<vmem>>, vector<16x256xbf16>
    %c4 = arith.constant 4 : index
    %c0_27 = arith.constant 0 : index
    %c0_28 = arith.constant 0 : index
    %27 = vector.load %arg4[%c4, %c0_27, %c0_28] : memref<9x16x16xbf16, #tpu.memory_space<vmem>>, vector<1x16x16xbf16>
    %28 = vector.shape_cast %27 : vector<1x16x16xbf16> to vector<16x16xbf16>
    %cst_29 = arith.constant dense<0.000000e+00> : vector<16x256xf32>
    %29 = tpu.matmul %28, %26, %cst_29 {dimension_numbers = #tpu.dot_dimension_numbers<[1], [0], [0], [1], [0, 0, 1, 1], [], []>} : vector<16x16xbf16>, vector<16x256xbf16>, vector<16x256xf32> -> vector<16x256xf32>
    %30 = arith.addf %25, %29 : vector<16x256xf32>
    %c0_30 = arith.constant 0 : index
    %c129 = arith.constant 129 : index
    %31 = vector.load %arg8[%c0_30, %c129] : memref<16x512xbf16, #tpu.memory_space<vmem>>, vector<16x256xbf16>
    %c5 = arith.constant 5 : index
    %c0_31 = arith.constant 0 : index
    %c0_32 = arith.constant 0 : index
    %32 = vector.load %arg4[%c5, %c0_31, %c0_32] : memref<9x16x16xbf16, #tpu.memory_space<vmem>>, vector<1x16x16xbf16>
    %33 = vector.shape_cast %32 : vector<1x16x16xbf16> to vector<16x16xbf16>
    %cst_33 = arith.constant dense<0.000000e+00> : vector<16x256xf32>
    %34 = tpu.matmul %33, %31, %cst_33 {dimension_numbers = #tpu.dot_dimension_numbers<[1], [0], [0], [1], [0, 0, 1, 1], [], []>} : vector<16x16xbf16>, vector<16x256xbf16>, vector<16x256xf32> -> vector<16x256xf32>
    %35 = arith.addf %30, %34 : vector<16x256xf32>
    %c0_34 = arith.constant 0 : index
    %c145 = arith.constant 145 : index
    %36 = vector.load %arg8[%c0_34, %c145] : memref<16x512xbf16, #tpu.memory_space<vmem>>, vector<16x256xbf16>
    %c6 = arith.constant 6 : index
    %c0_35 = arith.constant 0 : index
    %c0_36 = arith.constant 0 : index
    %37 = vector.load %arg4[%c6, %c0_35, %c0_36] : memref<9x16x16xbf16, #tpu.memory_space<vmem>>, vector<1x16x16xbf16>
    %38 = vector.shape_cast %37 : vector<1x16x16xbf16> to vector<16x16xbf16>
    %cst_37 = arith.constant dense<0.000000e+00> : vector<16x256xf32>
    %39 = tpu.matmul %38, %36, %cst_37 {dimension_numbers = #tpu.dot_dimension_numbers<[1], [0], [0], [1], [0, 0, 1, 1], [], []>} : vector<16x16xbf16>, vector<16x256xbf16>, vector<16x256xf32> -> vector<16x256xf32>
    %40 = arith.addf %35, %39 : vector<16x256xf32>
    %c0_38 = arith.constant 0 : index
    %c146 = arith.constant 146 : index
    %41 = vector.load %arg8[%c0_38, %c146] : memref<16x512xbf16, #tpu.memory_space<vmem>>, vector<16x256xbf16>
    %c7 = arith.constant 7 : index
    %c0_39 = arith.constant 0 : index
    %c0_40 = arith.constant 0 : index
    %42 = vector.load %arg4[%c7, %c0_39, %c0_40] : memref<9x16x16xbf16, #tpu.memory_space<vmem>>, vector<1x16x16xbf16>
    %43 = vector.shape_cast %42 : vector<1x16x16xbf16> to vector<16x16xbf16>
    %cst_41 = arith.constant dense<0.000000e+00> : vector<16x256xf32>
    %44 = tpu.matmul %43, %41, %cst_41 {dimension_numbers = #tpu.dot_dimension_numbers<[1], [0], [0], [1], [0, 0, 1, 1], [], []>} : vector<16x16xbf16>, vector<16x256xbf16>, vector<16x256xf32> -> vector<16x256xf32>
    %45 = arith.addf %40, %44 : vector<16x256xf32>
    %c0_42 = arith.constant 0 : index
    %c147 = arith.constant 147 : index
    %46 = vector.load %arg8[%c0_42, %c147] : memref<16x512xbf16, #tpu.memory_space<vmem>>, vector<16x256xbf16>
    %c8 = arith.constant 8 : index
    %c0_43 = arith.constant 0 : index
    %c0_44 = arith.constant 0 : index
    %47 = vector.load %arg4[%c8, %c0_43, %c0_44] : memref<9x16x16xbf16, #tpu.memory_space<vmem>>, vector<1x16x16xbf16>
    %48 = vector.shape_cast %47 : vector<1x16x16xbf16> to vector<16x16xbf16>
    %cst_45 = arith.constant dense<0.000000e+00> : vector<16x256xf32>
    %49 = tpu.matmul %48, %46, %cst_45 {dimension_numbers = #tpu.dot_dimension_numbers<[1], [0], [0], [1], [0, 0, 1, 1], [], []>} : vector<16x16xbf16>, vector<16x256xbf16>, vector<16x256xf32> -> vector<16x256xf32>
    %50 = arith.addf %45, %49 : vector<16x256xf32>
    %c0_46 = arith.constant 0 : index
    %c0_47 = arith.constant 0 : index
    %51 = vector.load %arg5[%c0_46, %c0_47] : memref<16x256xf32, #tpu.memory_space<vmem>>, vector<16x256xf32>
    tpu.vector_store %arg5[%c0_46, %c0_47], %50 {strides = array<i32>} : memref<16x256xf32, #tpu.memory_space<vmem>>, vector<16x256xf32>,
    %52 = tpu.iota {dimensions = array<i32: 1>} : vector<1x256xi32>
    %53 = vector.broadcast %0 : i32 to vector<1x256xi32>
    %54 = arith.addi %53, %52 : vector<1x256xi32>
    %c0_i32 = arith.constant 0 : i32
    %55 = vector.broadcast %c0_i32 : i32 to vector<1x256xi32>
    %56 = arith.cmpi sge, %54, %55 : vector<1x256xi32>
    %c648_i32 = arith.constant 648 : i32
    %57 = vector.broadcast %c648_i32 : i32 to vector<1x256xi32>
    %58 = arith.cmpi slt, %54, %57 : vector<1x256xi32>
    %59 = arith.andi %56, %58 : vector<1x256xi1>
    %c0_i32_48 = arith.constant 0 : i32
    %60 = vector.broadcast %c0_i32_48 : i32 to vector<1x256xi32>
    %61 = arith.select %59, %54, %60 : vector<1x256xi1>, vector<1x256xi32>
    %62 = arith.sitofp %61 : vector<1x256xi32> to vector<1x256xf32>
    %cst_49 = arith.constant 0.00308641978 : f32
    %63 = vector.broadcast %cst_49 : f32 to vector<1x256xf32>
    %64 = arith.mulf %62, %63 : vector<1x256xf32>
    %65 = math.floor %64 : vector<1x256xf32>
    %66 = arith.fptosi %65 : vector<1x256xf32> to vector<1x256xi32>
    %c324_i32 = arith.constant 324 : i32
    %67 = vector.broadcast %c324_i32 : i32 to vector<1x256xi32>
    %68 = arith.muli %66, %67 : vector<1x256xi32>
    %69 = arith.subi %61, %68 : vector<1x256xi32>
    %c0_i32_50 = arith.constant 0 : i32
    %70 = vector.broadcast %c0_i32_50 : i32 to vector<1x256xi32>
    %71 = arith.cmpi slt, %69, %70 : vector<1x256xi32>
    %c324_i32_51 = arith.constant 324 : i32
    %72 = vector.broadcast %c324_i32_51 : i32 to vector<1x256xi32>
    %73 = arith.addi %69, %72 : vector<1x256xi32>
    %c324_i32_52 = arith.constant 324 : i32
    %74 = vector.broadcast %c324_i32_52 : i32 to vector<1x256xi32>
    %75 = arith.cmpi sge, %69, %74 : vector<1x256xi32>
    %c324_i32_53 = arith.constant 324 : i32
    %76 = vector.broadcast %c324_i32_53 : i32 to vector<1x256xi32>
    %77 = arith.subi %69, %76 : vector<1x256xi32>
    %78 = arith.select %75, %77, %69 : vector<1x256xi1>, vector<1x256xi32>
    %79 = arith.select %71, %73, %78 : vector<1x256xi1>, vector<1x256xi32>
    %80 = arith.sitofp %79 : vector<1x256xi32> to vector<1x256xf32>
    %cst_54 = arith.constant 0.055555556 : f32
    %81 = vector.broadcast %cst_54 : f32 to vector<1x256xf32>
    %82 = arith.mulf %80, %81 : vector<1x256xf32>
    %83 = math.floor %82 : vector<1x256xf32>
    %84 = arith.fptosi %83 : vector<1x256xf32> to vector<1x256xi32>
    %c18_i32 = arith.constant 18 : i32
    %85 = vector.broadcast %c18_i32 : i32 to vector<1x256xi32>
    %86 = arith.muli %84, %85 : vector<1x256xi32>
    %87 = arith.subi %79, %86 : vector<1x256xi32>
    %c0_i32_55 = arith.constant 0 : i32
    %88 = vector.broadcast %c0_i32_55 : i32 to vector<1x256xi32>
    %89 = arith.cmpi slt, %87, %88 : vector<1x256xi32>
    %c1_i32 = arith.constant 1 : i32
    %90 = vector.broadcast %c1_i32 : i32 to vector<1x256xi32>
    %91 = arith.subi %84, %90 : vector<1x256xi32>
    %c18_i32_56 = arith.constant 18 : i32
    %92 = vector.broadcast %c18_i32_56 : i32 to vector<1x256xi32>
    %93 = arith.cmpi sge, %87, %92 : vector<1x256xi32>
    %c1_i32_57 = arith.constant 1 : i32
    %94 = vector.broadcast %c1_i32_57 : i32 to vector<1x256xi32>
    %95 = arith.addi %84, %94 : vector<1x256xi32>
    %96 = arith.select %93, %95, %84 : vector<1x256xi1>, vector<1x256xi32>
    %97 = arith.select %89, %91, %96 : vector<1x256xi1>, vector<1x256xi32>
    %c0_i32_58 = arith.constant 0 : i32
    %98 = vector.broadcast %c0_i32_58 : i32 to vector<1x256xi32>
    %99 = arith.cmpi slt, %87, %98 : vector<1x256xi32>
    %c18_i32_59 = arith.constant 18 : i32
    %100 = vector.broadcast %c18_i32_59 : i32 to vector<1x256xi32>
    %101 = arith.addi %87, %100 : vector<1x256xi32>
    %c18_i32_60 = arith.constant 18 : i32
    %102 = vector.broadcast %c18_i32_60 : i32 to vector<1x256xi32>
    %103 = arith.cmpi sge, %87, %102 : vector<1x256xi32>
    %c18_i32_61 = arith.constant 18 : i32
    %104 = vector.broadcast %c18_i32_61 : i32 to vector<1x256xi32>
    %105 = arith.subi %87, %104 : vector<1x256xi32>
    %106 = arith.select %103, %105, %87 : vector<1x256xi1>, vector<1x256xi32>
    %107 = arith.select %99, %101, %106 : vector<1x256xi1>, vector<1x256xi32>
    %c1_i32_62 = arith.constant 1 : i32
    %108 = vector.broadcast %c1_i32_62 : i32 to vector<1x256xi32>
    %109 = arith.cmpi sge, %97, %108 : vector<1x256xi32>
    %110 = arith.andi %59, %109 : vector<1x256xi1>
    %c16_i32 = arith.constant 16 : i32
    %111 = vector.broadcast %c16_i32 : i32 to vector<1x256xi32>
    %112 = arith.cmpi sle, %97, %111 : vector<1x256xi32>
    %113 = arith.andi %110, %112 : vector<1x256xi1>
    %c1_i32_63 = arith.constant 1 : i32
    %114 = vector.broadcast %c1_i32_63 : i32 to vector<1x256xi32>
    %115 = arith.cmpi sge, %107, %114 : vector<1x256xi32>
    %116 = arith.andi %113, %115 : vector<1x256xi1>
    %c16_i32_64 = arith.constant 16 : i32
    %117 = vector.broadcast %c16_i32_64 : i32 to vector<1x256xi32>
    %118 = arith.cmpi sle, %107, %117 : vector<1x256xi32>
    %119 = arith.andi %116, %118 : vector<1x256xi1>
    %120 = arith.extui %119 : vector<1x256xi1> to vector<1x256xi32>
    %121 = arith.sitofp %120 : vector<1x256xi32> to vector<1x256xf32>
    %122 = vector.broadcast %121 : vector<1x256xf32> to vector<16x256xf32>
    %123 = arith.mulf %50, %122 : vector<16x256xf32>
    %cst_65 = arith.constant dense<0.000000e+00> : vector<16xf32>
    %124 = vector.multi_reduction <add>, %123, %cst_65 [1] : vector<16x256xf32> to vector<16xf32>
    %125 = arith.mulf %50, %50 : vector<16x256xf32>
    %126 = vector.broadcast %121 : vector<1x256xf32> to vector<16x256xf32>
    %127 = arith.mulf %125, %126 : vector<16x256xf32>
    %cst_66 = arith.constant dense<0.000000e+00> : vector<16xf32>
    %128 = vector.multi_reduction <add>, %127, %cst_66 [1] : vector<16x256xf32> to vector<16xf32>
    %129 = tpu.iota {dimensions = array<i32: 0>} : vector<8x16xi32>
    %c0_i32_67 = arith.constant 0 : i32
    %130 = vector.broadcast %c0_i32_67 : i32 to vector<8x16xi32>
    %131 = arith.cmpi eq, %129, %130 : vector<8x16xi32>
    %132 = vector.shape_cast %124 : vector<16xf32> to vector<1x16xf32>
    %cst_68 = arith.constant 0.000000e+00 : f32
    %133 = vector.shape_cast %132 : vector<1x16xf32> to vector<1x16xf32>
    %134 = vector.broadcast %133 : vector<1x16xf32> to vector<8x16xf32>
    %135 = vector.broadcast %cst_68 : f32 to vector<8x16xf32>
    %136 = arith.select %131, %134, %135 : vector<8x16xi1>, vector<8x16xf32>
    %c0_69 = arith.constant 0 : index
    %c0_70 = arith.constant 0 : index
    %c0_71 = arith.constant 0 : index
    %137 = vector.load %arg6[%c0_69, %c0_70, %c0_71] : memref<1x8x16xf32, #tpu.memory_space<vmem>>, vector<1x8x16xf32>
    %138 = vector.shape_cast %137 : vector<1x8x16xf32> to vector<8x16xf32>
    %139 = vector.shape_cast %136 : vector<8x16xf32> to vector<1x8x16xf32>
    tpu.vector_store %arg6[%c0_69, %c0_70, %c0_71], %139 {strides = array<i32>} : memref<1x8x16xf32, #tpu.memory_space<vmem>>, vector<1x8x16xf32>,
    %c0_i32_72 = arith.constant 0 : i32
    %140 = vector.broadcast %c0_i32_72 : i32 to vector<8x16xi32>
    %141 = arith.cmpi eq, %129, %140 : vector<8x16xi32>
    %142 = vector.shape_cast %128 : vector<16xf32> to vector<1x16xf32>
    %cst_73 = arith.constant 0.000000e+00 : f32
    %143 = vector.shape_cast %142 : vector<1x16xf32> to vector<1x16xf32>
    %144 = vector.broadcast %143 : vector<1x16xf32> to vector<8x16xf32>
    %145 = vector.broadcast %cst_73 : f32 to vector<8x16xf32>
    %146 = arith.select %141, %144, %145 : vector<8x16xi1>, vector<8x16xf32>
    %c0_74 = arith.constant 0 : index
    %c0_75 = arith.constant 0 : index
    %c0_76 = arith.constant 0 : index
    %147 = vector.load %arg7[%c0_74, %c0_75, %c0_76] : memref<1x8x16xf32, #tpu.memory_space<vmem>>, vector<1x8x16xf32>
    %148 = vector.shape_cast %147 : vector<1x8x16xf32> to vector<8x16xf32>
    %149 = vector.shape_cast %146 : vector<8x16xf32> to vector<1x8x16xf32>
    tpu.vector_store %arg7[%c0_74, %c0_75, %c0_76], %149 {strides = array<i32>} : memref<1x8x16xf32, #tpu.memory_space<vmem>>, vector<1x8x16xf32>,
    return
  }
  func.func @transform_0(%arg0: i32) -> (i32, i32) {
    %c2_i32 = arith.constant 2 : i32
    %0 = arith.muli %arg0, %c2_i32 : i32
    %c1_i32 = arith.constant 1 : i32
    %1 = arith.subi %0, %c1_i32 : i32
    %c0_i32 = arith.constant 0 : i32
    %2 = arith.maxsi %1, %c0_i32 : i32
    %c0_i32_0 = arith.constant 0 : i32
    %c0_i32_1 = arith.constant 0 : i32
    return %c0_i32_0, %2 : i32, i32
  }
  func.func @transform_1(%arg0: i32) -> (i32, i32) {
    %c0_i32 = arith.constant 0 : i32
    %c0_i32_0 = arith.constant 0 : i32
    return %c0_i32, %arg0 : i32, i32
  }
  func.func @transform_2(%arg0: i32) -> (i32, i32) {
    %c1_i32 = arith.constant 1 : i32
    %0 = arith.addi %arg0, %c1_i32 : i32
    %c2_i32 = arith.constant 2 : i32
    %1 = arith.muli %0, %c2_i32 : i32
    %c5_i32 = arith.constant 5 : i32
    %2 = arith.minsi %1, %c5_i32 : i32
    %c0_i32 = arith.constant 0 : i32
    %c0_i32_0 = arith.constant 0 : i32
    return %c0_i32, %2 : i32, i32
  }
  func.func @transform_3(%arg0: i32) -> (i32, i32, i32) {
    %c0_i32 = arith.constant 0 : i32
    %c0_i32_0 = arith.constant 0 : i32
    %c0_i32_1 = arith.constant 0 : i32
    %c0_i32_2 = arith.constant 0 : i32
    return %c0_i32, %c0_i32_0, %c0_i32_1 : i32, i32, i32
  }
  func.func @transform_4(%arg0: i32) -> (i32, i32) {
    %c0_i32 = arith.constant 0 : i32
    %c0_i32_0 = arith.constant 0 : i32
    return %c0_i32, %arg0 : i32, i32
  }
  func.func @transform_5(%arg0: i32) -> (i32, i32, i32) {
    %c0_i32 = arith.constant 0 : i32
    %c0_i32_0 = arith.constant 0 : i32
    %c0_i32_1 = arith.constant 0 : i32
    return %arg0, %c0_i32, %c0_i32_0 : i32, i32, i32
  }
  func.func @transform_6(%arg0: i32) -> (i32, i32, i32) {
    %c0_i32 = arith.constant 0 : i32
    %c0_i32_0 = arith.constant 0 : i32
    %c0_i32_1 = arith.constant 0 : i32
    return %arg0, %c0_i32, %c0_i32_0 : i32, i32, i32
  }
}

module attributes {stable_mosaic.version = 11 : i64} {
  func.func @_conv_kernel(%arg0: i32, %arg1: memref<16x128xf32, #tpu.memory_space<vmem>>, %arg2: memref<16x256xf32, #tpu.memory_space<vmem>>, %arg3: memref<16x128xf32, #tpu.memory_space<vmem>>, %arg4: memref<16x1xf32, #tpu.memory_space<vmem>>, %arg5: memref<16x1xf32, #tpu.memory_space<vmem>>, %arg6: memref<9x16x16xbf16, #tpu.memory_space<vmem>>, %arg7: memref<16x256xf32, #tpu.memory_space<vmem>>, %arg8: memref<1x8x16xf32, #tpu.memory_space<vmem>>, %arg9: memref<1x8x16xf32, #tpu.memory_space<vmem>>, %arg10: memref<16x512xbf16, #tpu.memory_space<vmem>>) attributes {dimension_semantics = [#tpu.dimension_semantics<parallel>], iteration_bounds = array<i64: 3>, scalar_prefetch = 0 : i64, scratch_operands = 1 : i64, tpu.core_type = #tpu.core_type<tc>, window_params = [{transform_indices = @transform_0, window_bounds = array<i64: 16, 128>}, {transform_indices = @transform_1, window_bounds = array<i64: 16, 256>}, {transform_indices = @transform_2, window_bounds = array<i64: 16, 128>}, {pipeline_mode = #tpu.pipeline_mode<synchronous>, transform_indices = @transform_3, window_bounds = array<i64: 16, 1>}, {pipeline_mode = #tpu.pipeline_mode<synchronous>, transform_indices = @transform_4, window_bounds = array<i64: 16, 1>}, {pipeline_mode = #tpu.pipeline_mode<synchronous>, transform_indices = @transform_5, window_bounds = array<i64: 9, 16, 16>}, {transform_indices = @transform_6, window_bounds = array<i64: 16, 256>}, {transform_indices = @transform_7, window_bounds = array<i64: 1, 8, 16>}, {transform_indices = @transform_8, window_bounds = array<i64: 1, 8, 16>}]} {
    %c256_i32 = arith.constant 256 : i32
    %0 = arith.muli %arg0, %c256_i32 : i32
    %c128_i32 = arith.constant 128 : i32
    %1 = arith.subi %0, %c128_i32 : i32
    %c0 = arith.constant 0 : index
    %c0_0 = arith.constant 0 : index
    %2 = vector.load %arg1[%c0, %c0_0] : memref<16x128xf32, #tpu.memory_space<vmem>>, vector<16x128xf32>
    %c0_1 = arith.constant 0 : index
    %c0_2 = arith.constant 0 : index
    %3 = vector.load %arg4[%c0_1, %c0_2] : memref<16x1xf32, #tpu.memory_space<vmem>>, vector<16x1xf32>
    %4 = vector.broadcast %3 : vector<16x1xf32> to vector<16x128xf32>
    %5 = arith.mulf %2, %4 : vector<16x128xf32>
    %c0_3 = arith.constant 0 : index
    %c0_4 = arith.constant 0 : index
    %6 = vector.load %arg5[%c0_3, %c0_4] : memref<16x1xf32, #tpu.memory_space<vmem>>, vector<16x1xf32>
    %7 = vector.broadcast %6 : vector<16x1xf32> to vector<16x128xf32>
    %8 = arith.addf %5, %7 : vector<16x128xf32>
    %cst = arith.constant 0.000000e+00 : f32
    %9 = vector.broadcast %cst : f32 to vector<16x128xf32>
    %10 = arith.maximumf %8, %9 : vector<16x128xf32>
    %11 = tpu.iota {dimensions = array<i32: 1>} : vector<1x128xi32>
    %12 = vector.broadcast %1 : i32 to vector<1x128xi32>
    %13 = arith.addi %12, %11 : vector<1x128xi32>
    %c0_i32 = arith.constant 0 : i32
    %14 = vector.broadcast %c0_i32 : i32 to vector<1x128xi32>
    %15 = arith.cmpi sge, %13, %14 : vector<1x128xi32>
    %c648_i32 = arith.constant 648 : i32
    %16 = vector.broadcast %c648_i32 : i32 to vector<1x128xi32>
    %17 = arith.cmpi slt, %13, %16 : vector<1x128xi32>
    %18 = arith.andi %15, %17 : vector<1x128xi1>
    %c0_i32_5 = arith.constant 0 : i32
    %19 = vector.broadcast %c0_i32_5 : i32 to vector<1x128xi32>
    %20 = arith.select %18, %13, %19 : vector<1x128xi1>, vector<1x128xi32>
    %21 = arith.sitofp %20 : vector<1x128xi32> to vector<1x128xf32>
    %cst_6 = arith.constant 0.00308641978 : f32
    %22 = vector.broadcast %cst_6 : f32 to vector<1x128xf32>
    %23 = arith.mulf %21, %22 : vector<1x128xf32>
    %24 = math.floor %23 : vector<1x128xf32>
    %25 = arith.fptosi %24 : vector<1x128xf32> to vector<1x128xi32>
    %c324_i32 = arith.constant 324 : i32
    %26 = vector.broadcast %c324_i32 : i32 to vector<1x128xi32>
    %27 = arith.muli %25, %26 : vector<1x128xi32>
    %28 = arith.subi %20, %27 : vector<1x128xi32>
    %c0_i32_7 = arith.constant 0 : i32
    %29 = vector.broadcast %c0_i32_7 : i32 to vector<1x128xi32>
    %30 = arith.cmpi slt, %28, %29 : vector<1x128xi32>
    %c324_i32_8 = arith.constant 324 : i32
    %31 = vector.broadcast %c324_i32_8 : i32 to vector<1x128xi32>
    %32 = arith.addi %28, %31 : vector<1x128xi32>
    %c324_i32_9 = arith.constant 324 : i32
    %33 = vector.broadcast %c324_i32_9 : i32 to vector<1x128xi32>
    %34 = arith.cmpi sge, %28, %33 : vector<1x128xi32>
    %c324_i32_10 = arith.constant 324 : i32
    %35 = vector.broadcast %c324_i32_10 : i32 to vector<1x128xi32>
    %36 = arith.subi %28, %35 : vector<1x128xi32>
    %37 = arith.select %34, %36, %28 : vector<1x128xi1>, vector<1x128xi32>
    %38 = arith.select %30, %32, %37 : vector<1x128xi1>, vector<1x128xi32>
    %39 = arith.sitofp %38 : vector<1x128xi32> to vector<1x128xf32>
    %cst_11 = arith.constant 0.055555556 : f32
    %40 = vector.broadcast %cst_11 : f32 to vector<1x128xf32>
    %41 = arith.mulf %39, %40 : vector<1x128xf32>
    %42 = math.floor %41 : vector<1x128xf32>
    %43 = arith.fptosi %42 : vector<1x128xf32> to vector<1x128xi32>
    %c18_i32 = arith.constant 18 : i32
    %44 = vector.broadcast %c18_i32 : i32 to vector<1x128xi32>
    %45 = arith.muli %43, %44 : vector<1x128xi32>
    %46 = arith.subi %38, %45 : vector<1x128xi32>
    %c0_i32_12 = arith.constant 0 : i32
    %47 = vector.broadcast %c0_i32_12 : i32 to vector<1x128xi32>
    %48 = arith.cmpi slt, %46, %47 : vector<1x128xi32>
    %c1_i32 = arith.constant 1 : i32
    %49 = vector.broadcast %c1_i32 : i32 to vector<1x128xi32>
    %50 = arith.subi %43, %49 : vector<1x128xi32>
    %c18_i32_13 = arith.constant 18 : i32
    %51 = vector.broadcast %c18_i32_13 : i32 to vector<1x128xi32>
    %52 = arith.cmpi sge, %46, %51 : vector<1x128xi32>
    %c1_i32_14 = arith.constant 1 : i32
    %53 = vector.broadcast %c1_i32_14 : i32 to vector<1x128xi32>
    %54 = arith.addi %43, %53 : vector<1x128xi32>
    %55 = arith.select %52, %54, %43 : vector<1x128xi1>, vector<1x128xi32>
    %56 = arith.select %48, %50, %55 : vector<1x128xi1>, vector<1x128xi32>
    %c0_i32_15 = arith.constant 0 : i32
    %57 = vector.broadcast %c0_i32_15 : i32 to vector<1x128xi32>
    %58 = arith.cmpi slt, %46, %57 : vector<1x128xi32>
    %c18_i32_16 = arith.constant 18 : i32
    %59 = vector.broadcast %c18_i32_16 : i32 to vector<1x128xi32>
    %60 = arith.addi %46, %59 : vector<1x128xi32>
    %c18_i32_17 = arith.constant 18 : i32
    %61 = vector.broadcast %c18_i32_17 : i32 to vector<1x128xi32>
    %62 = arith.cmpi sge, %46, %61 : vector<1x128xi32>
    %c18_i32_18 = arith.constant 18 : i32
    %63 = vector.broadcast %c18_i32_18 : i32 to vector<1x128xi32>
    %64 = arith.subi %46, %63 : vector<1x128xi32>
    %65 = arith.select %62, %64, %46 : vector<1x128xi1>, vector<1x128xi32>
    %66 = arith.select %58, %60, %65 : vector<1x128xi1>, vector<1x128xi32>
    %c1_i32_19 = arith.constant 1 : i32
    %67 = vector.broadcast %c1_i32_19 : i32 to vector<1x128xi32>
    %68 = arith.cmpi sge, %56, %67 : vector<1x128xi32>
    %69 = arith.andi %18, %68 : vector<1x128xi1>
    %c16_i32 = arith.constant 16 : i32
    %70 = vector.broadcast %c16_i32 : i32 to vector<1x128xi32>
    %71 = arith.cmpi sle, %56, %70 : vector<1x128xi32>
    %72 = arith.andi %69, %71 : vector<1x128xi1>
    %c1_i32_20 = arith.constant 1 : i32
    %73 = vector.broadcast %c1_i32_20 : i32 to vector<1x128xi32>
    %74 = arith.cmpi sge, %66, %73 : vector<1x128xi32>
    %75 = arith.andi %72, %74 : vector<1x128xi1>
    %c16_i32_21 = arith.constant 16 : i32
    %76 = vector.broadcast %c16_i32_21 : i32 to vector<1x128xi32>
    %77 = arith.cmpi sle, %66, %76 : vector<1x128xi32>
    %78 = arith.andi %75, %77 : vector<1x128xi1>
    %cst_22 = arith.constant 0.000000e+00 : f32
    %79 = vector.shape_cast %78 : vector<1x128xi1> to vector<1x128xi1>
    %80 = vector.broadcast %79 : vector<1x128xi1> to vector<16x128xi1>
    %81 = vector.broadcast %cst_22 : f32 to vector<16x128xf32>
    %82 = arith.select %80, %10, %81 : vector<16x128xi1>, vector<16x128xf32>
    %83 = arith.truncf %82 : vector<16x128xf32> to vector<16x128xbf16>
    %c0_23 = arith.constant 0 : index
    %c0_24 = arith.constant 0 : index
    %84 = vector.load %arg10[%c0_23, %c0_24] : memref<16x512xbf16, #tpu.memory_space<vmem>>, vector<16x128xbf16>
    tpu.vector_store %arg10[%c0_23, %c0_24], %83 {strides = array<i32>} : memref<16x512xbf16, #tpu.memory_space<vmem>>, vector<16x128xbf16>,
    %c0_25 = arith.constant 0 : index
    %c0_26 = arith.constant 0 : index
    %85 = vector.load %arg2[%c0_25, %c0_26] : memref<16x256xf32, #tpu.memory_space<vmem>>, vector<16x256xf32>
    %c0_27 = arith.constant 0 : index
    %c0_28 = arith.constant 0 : index
    %86 = vector.load %arg4[%c0_27, %c0_28] : memref<16x1xf32, #tpu.memory_space<vmem>>, vector<16x1xf32>
    %87 = vector.broadcast %86 : vector<16x1xf32> to vector<16x256xf32>
    %88 = arith.mulf %85, %87 : vector<16x256xf32>
    %c0_29 = arith.constant 0 : index
    %c0_30 = arith.constant 0 : index
    %89 = vector.load %arg5[%c0_29, %c0_30] : memref<16x1xf32, #tpu.memory_space<vmem>>, vector<16x1xf32>
    %90 = vector.broadcast %89 : vector<16x1xf32> to vector<16x256xf32>
    %91 = arith.addf %88, %90 : vector<16x256xf32>
    %cst_31 = arith.constant 0.000000e+00 : f32
    %92 = vector.broadcast %cst_31 : f32 to vector<16x256xf32>
    %93 = arith.maximumf %91, %92 : vector<16x256xf32>
    %94 = tpu.iota {dimensions = array<i32: 1>} : vector<1x256xi32>
    %95 = vector.broadcast %0 : i32 to vector<1x256xi32>
    %96 = arith.addi %95, %94 : vector<1x256xi32>
    %c0_i32_32 = arith.constant 0 : i32
    %97 = vector.broadcast %c0_i32_32 : i32 to vector<1x256xi32>
    %98 = arith.cmpi sge, %96, %97 : vector<1x256xi32>
    %c648_i32_33 = arith.constant 648 : i32
    %99 = vector.broadcast %c648_i32_33 : i32 to vector<1x256xi32>
    %100 = arith.cmpi slt, %96, %99 : vector<1x256xi32>
    %101 = arith.andi %98, %100 : vector<1x256xi1>
    %c0_i32_34 = arith.constant 0 : i32
    %102 = vector.broadcast %c0_i32_34 : i32 to vector<1x256xi32>
    %103 = arith.select %101, %96, %102 : vector<1x256xi1>, vector<1x256xi32>
    %104 = arith.sitofp %103 : vector<1x256xi32> to vector<1x256xf32>
    %cst_35 = arith.constant 0.00308641978 : f32
    %105 = vector.broadcast %cst_35 : f32 to vector<1x256xf32>
    %106 = arith.mulf %104, %105 : vector<1x256xf32>
    %107 = math.floor %106 : vector<1x256xf32>
    %108 = arith.fptosi %107 : vector<1x256xf32> to vector<1x256xi32>
    %c324_i32_36 = arith.constant 324 : i32
    %109 = vector.broadcast %c324_i32_36 : i32 to vector<1x256xi32>
    %110 = arith.muli %108, %109 : vector<1x256xi32>
    %111 = arith.subi %103, %110 : vector<1x256xi32>
    %c0_i32_37 = arith.constant 0 : i32
    %112 = vector.broadcast %c0_i32_37 : i32 to vector<1x256xi32>
    %113 = arith.cmpi slt, %111, %112 : vector<1x256xi32>
    %c324_i32_38 = arith.constant 324 : i32
    %114 = vector.broadcast %c324_i32_38 : i32 to vector<1x256xi32>
    %115 = arith.addi %111, %114 : vector<1x256xi32>
    %c324_i32_39 = arith.constant 324 : i32
    %116 = vector.broadcast %c324_i32_39 : i32 to vector<1x256xi32>
    %117 = arith.cmpi sge, %111, %116 : vector<1x256xi32>
    %c324_i32_40 = arith.constant 324 : i32
    %118 = vector.broadcast %c324_i32_40 : i32 to vector<1x256xi32>
    %119 = arith.subi %111, %118 : vector<1x256xi32>
    %120 = arith.select %117, %119, %111 : vector<1x256xi1>, vector<1x256xi32>
    %121 = arith.select %113, %115, %120 : vector<1x256xi1>, vector<1x256xi32>
    %122 = arith.sitofp %121 : vector<1x256xi32> to vector<1x256xf32>
    %cst_41 = arith.constant 0.055555556 : f32
    %123 = vector.broadcast %cst_41 : f32 to vector<1x256xf32>
    %124 = arith.mulf %122, %123 : vector<1x256xf32>
    %125 = math.floor %124 : vector<1x256xf32>
    %126 = arith.fptosi %125 : vector<1x256xf32> to vector<1x256xi32>
    %c18_i32_42 = arith.constant 18 : i32
    %127 = vector.broadcast %c18_i32_42 : i32 to vector<1x256xi32>
    %128 = arith.muli %126, %127 : vector<1x256xi32>
    %129 = arith.subi %121, %128 : vector<1x256xi32>
    %c0_i32_43 = arith.constant 0 : i32
    %130 = vector.broadcast %c0_i32_43 : i32 to vector<1x256xi32>
    %131 = arith.cmpi slt, %129, %130 : vector<1x256xi32>
    %c1_i32_44 = arith.constant 1 : i32
    %132 = vector.broadcast %c1_i32_44 : i32 to vector<1x256xi32>
    %133 = arith.subi %126, %132 : vector<1x256xi32>
    %c18_i32_45 = arith.constant 18 : i32
    %134 = vector.broadcast %c18_i32_45 : i32 to vector<1x256xi32>
    %135 = arith.cmpi sge, %129, %134 : vector<1x256xi32>
    %c1_i32_46 = arith.constant 1 : i32
    %136 = vector.broadcast %c1_i32_46 : i32 to vector<1x256xi32>
    %137 = arith.addi %126, %136 : vector<1x256xi32>
    %138 = arith.select %135, %137, %126 : vector<1x256xi1>, vector<1x256xi32>
    %139 = arith.select %131, %133, %138 : vector<1x256xi1>, vector<1x256xi32>
    %c0_i32_47 = arith.constant 0 : i32
    %140 = vector.broadcast %c0_i32_47 : i32 to vector<1x256xi32>
    %141 = arith.cmpi slt, %129, %140 : vector<1x256xi32>
    %c18_i32_48 = arith.constant 18 : i32
    %142 = vector.broadcast %c18_i32_48 : i32 to vector<1x256xi32>
    %143 = arith.addi %129, %142 : vector<1x256xi32>
    %c18_i32_49 = arith.constant 18 : i32
    %144 = vector.broadcast %c18_i32_49 : i32 to vector<1x256xi32>
    %145 = arith.cmpi sge, %129, %144 : vector<1x256xi32>
    %c18_i32_50 = arith.constant 18 : i32
    %146 = vector.broadcast %c18_i32_50 : i32 to vector<1x256xi32>
    %147 = arith.subi %129, %146 : vector<1x256xi32>
    %148 = arith.select %145, %147, %129 : vector<1x256xi1>, vector<1x256xi32>
    %149 = arith.select %141, %143, %148 : vector<1x256xi1>, vector<1x256xi32>
    %c1_i32_51 = arith.constant 1 : i32
    %150 = vector.broadcast %c1_i32_51 : i32 to vector<1x256xi32>
    %151 = arith.cmpi sge, %139, %150 : vector<1x256xi32>
    %152 = arith.andi %101, %151 : vector<1x256xi1>
    %c16_i32_52 = arith.constant 16 : i32
    %153 = vector.broadcast %c16_i32_52 : i32 to vector<1x256xi32>
    %154 = arith.cmpi sle, %139, %153 : vector<1x256xi32>
    %155 = arith.andi %152, %154 : vector<1x256xi1>
    %c1_i32_53 = arith.constant 1 : i32
    %156 = vector.broadcast %c1_i32_53 : i32 to vector<1x256xi32>
    %157 = arith.cmpi sge, %149, %156 : vector<1x256xi32>
    %158 = arith.andi %155, %157 : vector<1x256xi1>
    %c16_i32_54 = arith.constant 16 : i32
    %159 = vector.broadcast %c16_i32_54 : i32 to vector<1x256xi32>
    %160 = arith.cmpi sle, %149, %159 : vector<1x256xi32>
    %161 = arith.andi %158, %160 : vector<1x256xi1>
    %cst_55 = arith.constant 0.000000e+00 : f32
    %162 = vector.shape_cast %161 : vector<1x256xi1> to vector<1x256xi1>
    %163 = vector.broadcast %162 : vector<1x256xi1> to vector<16x256xi1>
    %164 = vector.broadcast %cst_55 : f32 to vector<16x256xf32>
    %165 = arith.select %163, %93, %164 : vector<16x256xi1>, vector<16x256xf32>
    %166 = arith.truncf %165 : vector<16x256xf32> to vector<16x256xbf16>
    %c0_56 = arith.constant 0 : index
    %c128 = arith.constant 128 : index
    %167 = vector.load %arg10[%c0_56, %c128] : memref<16x512xbf16, #tpu.memory_space<vmem>>, vector<16x256xbf16>
    tpu.vector_store %arg10[%c0_56, %c128], %166 {strides = array<i32>} : memref<16x512xbf16, #tpu.memory_space<vmem>>, vector<16x256xbf16>,
    %c256_i32_57 = arith.constant 256 : i32
    %168 = arith.addi %0, %c256_i32_57 : i32
    %c0_58 = arith.constant 0 : index
    %c0_59 = arith.constant 0 : index
    %169 = vector.load %arg3[%c0_58, %c0_59] : memref<16x128xf32, #tpu.memory_space<vmem>>, vector<16x128xf32>
    %c0_60 = arith.constant 0 : index
    %c0_61 = arith.constant 0 : index
    %170 = vector.load %arg4[%c0_60, %c0_61] : memref<16x1xf32, #tpu.memory_space<vmem>>, vector<16x1xf32>
    %171 = vector.broadcast %170 : vector<16x1xf32> to vector<16x128xf32>
    %172 = arith.mulf %169, %171 : vector<16x128xf32>
    %c0_62 = arith.constant 0 : index
    %c0_63 = arith.constant 0 : index
    %173 = vector.load %arg5[%c0_62, %c0_63] : memref<16x1xf32, #tpu.memory_space<vmem>>, vector<16x1xf32>
    %174 = vector.broadcast %173 : vector<16x1xf32> to vector<16x128xf32>
    %175 = arith.addf %172, %174 : vector<16x128xf32>
    %cst_64 = arith.constant 0.000000e+00 : f32
    %176 = vector.broadcast %cst_64 : f32 to vector<16x128xf32>
    %177 = arith.maximumf %175, %176 : vector<16x128xf32>
    %178 = tpu.iota {dimensions = array<i32: 1>} : vector<1x128xi32>
    %179 = vector.broadcast %168 : i32 to vector<1x128xi32>
    %180 = arith.addi %179, %178 : vector<1x128xi32>
    %c0_i32_65 = arith.constant 0 : i32
    %181 = vector.broadcast %c0_i32_65 : i32 to vector<1x128xi32>
    %182 = arith.cmpi sge, %180, %181 : vector<1x128xi32>
    %c648_i32_66 = arith.constant 648 : i32
    %183 = vector.broadcast %c648_i32_66 : i32 to vector<1x128xi32>
    %184 = arith.cmpi slt, %180, %183 : vector<1x128xi32>
    %185 = arith.andi %182, %184 : vector<1x128xi1>
    %c0_i32_67 = arith.constant 0 : i32
    %186 = vector.broadcast %c0_i32_67 : i32 to vector<1x128xi32>
    %187 = arith.select %185, %180, %186 : vector<1x128xi1>, vector<1x128xi32>
    %188 = arith.sitofp %187 : vector<1x128xi32> to vector<1x128xf32>
    %cst_68 = arith.constant 0.00308641978 : f32
    %189 = vector.broadcast %cst_68 : f32 to vector<1x128xf32>
    %190 = arith.mulf %188, %189 : vector<1x128xf32>
    %191 = math.floor %190 : vector<1x128xf32>
    %192 = arith.fptosi %191 : vector<1x128xf32> to vector<1x128xi32>
    %c324_i32_69 = arith.constant 324 : i32
    %193 = vector.broadcast %c324_i32_69 : i32 to vector<1x128xi32>
    %194 = arith.muli %192, %193 : vector<1x128xi32>
    %195 = arith.subi %187, %194 : vector<1x128xi32>
    %c0_i32_70 = arith.constant 0 : i32
    %196 = vector.broadcast %c0_i32_70 : i32 to vector<1x128xi32>
    %197 = arith.cmpi slt, %195, %196 : vector<1x128xi32>
    %c324_i32_71 = arith.constant 324 : i32
    %198 = vector.broadcast %c324_i32_71 : i32 to vector<1x128xi32>
    %199 = arith.addi %195, %198 : vector<1x128xi32>
    %c324_i32_72 = arith.constant 324 : i32
    %200 = vector.broadcast %c324_i32_72 : i32 to vector<1x128xi32>
    %201 = arith.cmpi sge, %195, %200 : vector<1x128xi32>
    %c324_i32_73 = arith.constant 324 : i32
    %202 = vector.broadcast %c324_i32_73 : i32 to vector<1x128xi32>
    %203 = arith.subi %195, %202 : vector<1x128xi32>
    %204 = arith.select %201, %203, %195 : vector<1x128xi1>, vector<1x128xi32>
    %205 = arith.select %197, %199, %204 : vector<1x128xi1>, vector<1x128xi32>
    %206 = arith.sitofp %205 : vector<1x128xi32> to vector<1x128xf32>
    %cst_74 = arith.constant 0.055555556 : f32
    %207 = vector.broadcast %cst_74 : f32 to vector<1x128xf32>
    %208 = arith.mulf %206, %207 : vector<1x128xf32>
    %209 = math.floor %208 : vector<1x128xf32>
    %210 = arith.fptosi %209 : vector<1x128xf32> to vector<1x128xi32>
    %c18_i32_75 = arith.constant 18 : i32
    %211 = vector.broadcast %c18_i32_75 : i32 to vector<1x128xi32>
    %212 = arith.muli %210, %211 : vector<1x128xi32>
    %213 = arith.subi %205, %212 : vector<1x128xi32>
    %c0_i32_76 = arith.constant 0 : i32
    %214 = vector.broadcast %c0_i32_76 : i32 to vector<1x128xi32>
    %215 = arith.cmpi slt, %213, %214 : vector<1x128xi32>
    %c1_i32_77 = arith.constant 1 : i32
    %216 = vector.broadcast %c1_i32_77 : i32 to vector<1x128xi32>
    %217 = arith.subi %210, %216 : vector<1x128xi32>
    %c18_i32_78 = arith.constant 18 : i32
    %218 = vector.broadcast %c18_i32_78 : i32 to vector<1x128xi32>
    %219 = arith.cmpi sge, %213, %218 : vector<1x128xi32>
    %c1_i32_79 = arith.constant 1 : i32
    %220 = vector.broadcast %c1_i32_79 : i32 to vector<1x128xi32>
    %221 = arith.addi %210, %220 : vector<1x128xi32>
    %222 = arith.select %219, %221, %210 : vector<1x128xi1>, vector<1x128xi32>
    %223 = arith.select %215, %217, %222 : vector<1x128xi1>, vector<1x128xi32>
    %c0_i32_80 = arith.constant 0 : i32
    %224 = vector.broadcast %c0_i32_80 : i32 to vector<1x128xi32>
    %225 = arith.cmpi slt, %213, %224 : vector<1x128xi32>
    %c18_i32_81 = arith.constant 18 : i32
    %226 = vector.broadcast %c18_i32_81 : i32 to vector<1x128xi32>
    %227 = arith.addi %213, %226 : vector<1x128xi32>
    %c18_i32_82 = arith.constant 18 : i32
    %228 = vector.broadcast %c18_i32_82 : i32 to vector<1x128xi32>
    %229 = arith.cmpi sge, %213, %228 : vector<1x128xi32>
    %c18_i32_83 = arith.constant 18 : i32
    %230 = vector.broadcast %c18_i32_83 : i32 to vector<1x128xi32>
    %231 = arith.subi %213, %230 : vector<1x128xi32>
    %232 = arith.select %229, %231, %213 : vector<1x128xi1>, vector<1x128xi32>
    %233 = arith.select %225, %227, %232 : vector<1x128xi1>, vector<1x128xi32>
    %c1_i32_84 = arith.constant 1 : i32
    %234 = vector.broadcast %c1_i32_84 : i32 to vector<1x128xi32>
    %235 = arith.cmpi sge, %223, %234 : vector<1x128xi32>
    %236 = arith.andi %185, %235 : vector<1x128xi1>
    %c16_i32_85 = arith.constant 16 : i32
    %237 = vector.broadcast %c16_i32_85 : i32 to vector<1x128xi32>
    %238 = arith.cmpi sle, %223, %237 : vector<1x128xi32>
    %239 = arith.andi %236, %238 : vector<1x128xi1>
    %c1_i32_86 = arith.constant 1 : i32
    %240 = vector.broadcast %c1_i32_86 : i32 to vector<1x128xi32>
    %241 = arith.cmpi sge, %233, %240 : vector<1x128xi32>
    %242 = arith.andi %239, %241 : vector<1x128xi1>
    %c16_i32_87 = arith.constant 16 : i32
    %243 = vector.broadcast %c16_i32_87 : i32 to vector<1x128xi32>
    %244 = arith.cmpi sle, %233, %243 : vector<1x128xi32>
    %245 = arith.andi %242, %244 : vector<1x128xi1>
    %cst_88 = arith.constant 0.000000e+00 : f32
    %246 = vector.shape_cast %245 : vector<1x128xi1> to vector<1x128xi1>
    %247 = vector.broadcast %246 : vector<1x128xi1> to vector<16x128xi1>
    %248 = vector.broadcast %cst_88 : f32 to vector<16x128xf32>
    %249 = arith.select %247, %177, %248 : vector<16x128xi1>, vector<16x128xf32>
    %250 = arith.truncf %249 : vector<16x128xf32> to vector<16x128xbf16>
    %c0_89 = arith.constant 0 : index
    %c384 = arith.constant 384 : index
    %251 = vector.load %arg10[%c0_89, %c384] : memref<16x512xbf16, #tpu.memory_space<vmem>>, vector<16x128xbf16>
    tpu.vector_store %arg10[%c0_89, %c384], %250 {strides = array<i32>} : memref<16x512xbf16, #tpu.memory_space<vmem>>, vector<16x128xbf16>,
    %c0_90 = arith.constant 0 : index
    %c109 = arith.constant 109 : index
    %252 = vector.load %arg10[%c0_90, %c109] : memref<16x512xbf16, #tpu.memory_space<vmem>>, vector<16x256xbf16>
    %c0_91 = arith.constant 0 : index
    %c0_92 = arith.constant 0 : index
    %c0_93 = arith.constant 0 : index
    %253 = vector.load %arg6[%c0_91, %c0_92, %c0_93] : memref<9x16x16xbf16, #tpu.memory_space<vmem>>, vector<1x16x16xbf16>
    %254 = vector.shape_cast %253 : vector<1x16x16xbf16> to vector<16x16xbf16>
    %cst_94 = arith.constant dense<0.000000e+00> : vector<16x256xf32>
    %255 = tpu.matmul %254, %252, %cst_94 {dimension_numbers = #tpu.dot_dimension_numbers<[1], [0], [0], [1], [0, 0, 1, 1], [], []>} : vector<16x16xbf16>, vector<16x256xbf16>, vector<16x256xf32> -> vector<16x256xf32>
    %c0_95 = arith.constant 0 : index
    %c110 = arith.constant 110 : index
    %256 = vector.load %arg10[%c0_95, %c110] : memref<16x512xbf16, #tpu.memory_space<vmem>>, vector<16x256xbf16>
    %c1 = arith.constant 1 : index
    %c0_96 = arith.constant 0 : index
    %c0_97 = arith.constant 0 : index
    %257 = vector.load %arg6[%c1, %c0_96, %c0_97] : memref<9x16x16xbf16, #tpu.memory_space<vmem>>, vector<1x16x16xbf16>
    %258 = vector.shape_cast %257 : vector<1x16x16xbf16> to vector<16x16xbf16>
    %cst_98 = arith.constant dense<0.000000e+00> : vector<16x256xf32>
    %259 = tpu.matmul %258, %256, %cst_98 {dimension_numbers = #tpu.dot_dimension_numbers<[1], [0], [0], [1], [0, 0, 1, 1], [], []>} : vector<16x16xbf16>, vector<16x256xbf16>, vector<16x256xf32> -> vector<16x256xf32>
    %260 = arith.addf %255, %259 : vector<16x256xf32>
    %c0_99 = arith.constant 0 : index
    %c111 = arith.constant 111 : index
    %261 = vector.load %arg10[%c0_99, %c111] : memref<16x512xbf16, #tpu.memory_space<vmem>>, vector<16x256xbf16>
    %c2 = arith.constant 2 : index
    %c0_100 = arith.constant 0 : index
    %c0_101 = arith.constant 0 : index
    %262 = vector.load %arg6[%c2, %c0_100, %c0_101] : memref<9x16x16xbf16, #tpu.memory_space<vmem>>, vector<1x16x16xbf16>
    %263 = vector.shape_cast %262 : vector<1x16x16xbf16> to vector<16x16xbf16>
    %cst_102 = arith.constant dense<0.000000e+00> : vector<16x256xf32>
    %264 = tpu.matmul %263, %261, %cst_102 {dimension_numbers = #tpu.dot_dimension_numbers<[1], [0], [0], [1], [0, 0, 1, 1], [], []>} : vector<16x16xbf16>, vector<16x256xbf16>, vector<16x256xf32> -> vector<16x256xf32>
    %265 = arith.addf %260, %264 : vector<16x256xf32>
    %c0_103 = arith.constant 0 : index
    %c127 = arith.constant 127 : index
    %266 = vector.load %arg10[%c0_103, %c127] : memref<16x512xbf16, #tpu.memory_space<vmem>>, vector<16x256xbf16>
    %c3 = arith.constant 3 : index
    %c0_104 = arith.constant 0 : index
    %c0_105 = arith.constant 0 : index
    %267 = vector.load %arg6[%c3, %c0_104, %c0_105] : memref<9x16x16xbf16, #tpu.memory_space<vmem>>, vector<1x16x16xbf16>
    %268 = vector.shape_cast %267 : vector<1x16x16xbf16> to vector<16x16xbf16>
    %cst_106 = arith.constant dense<0.000000e+00> : vector<16x256xf32>
    %269 = tpu.matmul %268, %266, %cst_106 {dimension_numbers = #tpu.dot_dimension_numbers<[1], [0], [0], [1], [0, 0, 1, 1], [], []>} : vector<16x16xbf16>, vector<16x256xbf16>, vector<16x256xf32> -> vector<16x256xf32>
    %270 = arith.addf %265, %269 : vector<16x256xf32>
    %c0_107 = arith.constant 0 : index
    %c128_108 = arith.constant 128 : index
    %271 = vector.load %arg10[%c0_107, %c128_108] : memref<16x512xbf16, #tpu.memory_space<vmem>>, vector<16x256xbf16>
    %c4 = arith.constant 4 : index
    %c0_109 = arith.constant 0 : index
    %c0_110 = arith.constant 0 : index
    %272 = vector.load %arg6[%c4, %c0_109, %c0_110] : memref<9x16x16xbf16, #tpu.memory_space<vmem>>, vector<1x16x16xbf16>
    %273 = vector.shape_cast %272 : vector<1x16x16xbf16> to vector<16x16xbf16>
    %cst_111 = arith.constant dense<0.000000e+00> : vector<16x256xf32>
    %274 = tpu.matmul %273, %271, %cst_111 {dimension_numbers = #tpu.dot_dimension_numbers<[1], [0], [0], [1], [0, 0, 1, 1], [], []>} : vector<16x16xbf16>, vector<16x256xbf16>, vector<16x256xf32> -> vector<16x256xf32>
    %275 = arith.addf %270, %274 : vector<16x256xf32>
    %c0_112 = arith.constant 0 : index
    %c129 = arith.constant 129 : index
    %276 = vector.load %arg10[%c0_112, %c129] : memref<16x512xbf16, #tpu.memory_space<vmem>>, vector<16x256xbf16>
    %c5 = arith.constant 5 : index
    %c0_113 = arith.constant 0 : index
    %c0_114 = arith.constant 0 : index
    %277 = vector.load %arg6[%c5, %c0_113, %c0_114] : memref<9x16x16xbf16, #tpu.memory_space<vmem>>, vector<1x16x16xbf16>
    %278 = vector.shape_cast %277 : vector<1x16x16xbf16> to vector<16x16xbf16>
    %cst_115 = arith.constant dense<0.000000e+00> : vector<16x256xf32>
    %279 = tpu.matmul %278, %276, %cst_115 {dimension_numbers = #tpu.dot_dimension_numbers<[1], [0], [0], [1], [0, 0, 1, 1], [], []>} : vector<16x16xbf16>, vector<16x256xbf16>, vector<16x256xf32> -> vector<16x256xf32>
    %280 = arith.addf %275, %279 : vector<16x256xf32>
    %c0_116 = arith.constant 0 : index
    %c145 = arith.constant 145 : index
    %281 = vector.load %arg10[%c0_116, %c145] : memref<16x512xbf16, #tpu.memory_space<vmem>>, vector<16x256xbf16>
    %c6 = arith.constant 6 : index
    %c0_117 = arith.constant 0 : index
    %c0_118 = arith.constant 0 : index
    %282 = vector.load %arg6[%c6, %c0_117, %c0_118] : memref<9x16x16xbf16, #tpu.memory_space<vmem>>, vector<1x16x16xbf16>
    %283 = vector.shape_cast %282 : vector<1x16x16xbf16> to vector<16x16xbf16>
    %cst_119 = arith.constant dense<0.000000e+00> : vector<16x256xf32>
    %284 = tpu.matmul %283, %281, %cst_119 {dimension_numbers = #tpu.dot_dimension_numbers<[1], [0], [0], [1], [0, 0, 1, 1], [], []>} : vector<16x16xbf16>, vector<16x256xbf16>, vector<16x256xf32> -> vector<16x256xf32>
    %285 = arith.addf %280, %284 : vector<16x256xf32>
    %c0_120 = arith.constant 0 : index
    %c146 = arith.constant 146 : index
    %286 = vector.load %arg10[%c0_120, %c146] : memref<16x512xbf16, #tpu.memory_space<vmem>>, vector<16x256xbf16>
    %c7 = arith.constant 7 : index
    %c0_121 = arith.constant 0 : index
    %c0_122 = arith.constant 0 : index
    %287 = vector.load %arg6[%c7, %c0_121, %c0_122] : memref<9x16x16xbf16, #tpu.memory_space<vmem>>, vector<1x16x16xbf16>
    %288 = vector.shape_cast %287 : vector<1x16x16xbf16> to vector<16x16xbf16>
    %cst_123 = arith.constant dense<0.000000e+00> : vector<16x256xf32>
    %289 = tpu.matmul %288, %286, %cst_123 {dimension_numbers = #tpu.dot_dimension_numbers<[1], [0], [0], [1], [0, 0, 1, 1], [], []>} : vector<16x16xbf16>, vector<16x256xbf16>, vector<16x256xf32> -> vector<16x256xf32>
    %290 = arith.addf %285, %289 : vector<16x256xf32>
    %c0_124 = arith.constant 0 : index
    %c147 = arith.constant 147 : index
    %291 = vector.load %arg10[%c0_124, %c147] : memref<16x512xbf16, #tpu.memory_space<vmem>>, vector<16x256xbf16>
    %c8 = arith.constant 8 : index
    %c0_125 = arith.constant 0 : index
    %c0_126 = arith.constant 0 : index
    %292 = vector.load %arg6[%c8, %c0_125, %c0_126] : memref<9x16x16xbf16, #tpu.memory_space<vmem>>, vector<1x16x16xbf16>
    %293 = vector.shape_cast %292 : vector<1x16x16xbf16> to vector<16x16xbf16>
    %cst_127 = arith.constant dense<0.000000e+00> : vector<16x256xf32>
    %294 = tpu.matmul %293, %291, %cst_127 {dimension_numbers = #tpu.dot_dimension_numbers<[1], [0], [0], [1], [0, 0, 1, 1], [], []>} : vector<16x16xbf16>, vector<16x256xbf16>, vector<16x256xf32> -> vector<16x256xf32>
    %295 = arith.addf %290, %294 : vector<16x256xf32>
    %c0_128 = arith.constant 0 : index
    %c0_129 = arith.constant 0 : index
    %296 = vector.load %arg7[%c0_128, %c0_129] : memref<16x256xf32, #tpu.memory_space<vmem>>, vector<16x256xf32>
    tpu.vector_store %arg7[%c0_128, %c0_129], %295 {strides = array<i32>} : memref<16x256xf32, #tpu.memory_space<vmem>>, vector<16x256xf32>,
    %297 = tpu.iota {dimensions = array<i32: 1>} : vector<1x256xi32>
    %298 = vector.broadcast %0 : i32 to vector<1x256xi32>
    %299 = arith.addi %298, %297 : vector<1x256xi32>
    %c0_i32_130 = arith.constant 0 : i32
    %300 = vector.broadcast %c0_i32_130 : i32 to vector<1x256xi32>
    %301 = arith.cmpi sge, %299, %300 : vector<1x256xi32>
    %c648_i32_131 = arith.constant 648 : i32
    %302 = vector.broadcast %c648_i32_131 : i32 to vector<1x256xi32>
    %303 = arith.cmpi slt, %299, %302 : vector<1x256xi32>
    %304 = arith.andi %301, %303 : vector<1x256xi1>
    %c0_i32_132 = arith.constant 0 : i32
    %305 = vector.broadcast %c0_i32_132 : i32 to vector<1x256xi32>
    %306 = arith.select %304, %299, %305 : vector<1x256xi1>, vector<1x256xi32>
    %307 = arith.sitofp %306 : vector<1x256xi32> to vector<1x256xf32>
    %cst_133 = arith.constant 0.00308641978 : f32
    %308 = vector.broadcast %cst_133 : f32 to vector<1x256xf32>
    %309 = arith.mulf %307, %308 : vector<1x256xf32>
    %310 = math.floor %309 : vector<1x256xf32>
    %311 = arith.fptosi %310 : vector<1x256xf32> to vector<1x256xi32>
    %c324_i32_134 = arith.constant 324 : i32
    %312 = vector.broadcast %c324_i32_134 : i32 to vector<1x256xi32>
    %313 = arith.muli %311, %312 : vector<1x256xi32>
    %314 = arith.subi %306, %313 : vector<1x256xi32>
    %c0_i32_135 = arith.constant 0 : i32
    %315 = vector.broadcast %c0_i32_135 : i32 to vector<1x256xi32>
    %316 = arith.cmpi slt, %314, %315 : vector<1x256xi32>
    %c324_i32_136 = arith.constant 324 : i32
    %317 = vector.broadcast %c324_i32_136 : i32 to vector<1x256xi32>
    %318 = arith.addi %314, %317 : vector<1x256xi32>
    %c324_i32_137 = arith.constant 324 : i32
    %319 = vector.broadcast %c324_i32_137 : i32 to vector<1x256xi32>
    %320 = arith.cmpi sge, %314, %319 : vector<1x256xi32>
    %c324_i32_138 = arith.constant 324 : i32
    %321 = vector.broadcast %c324_i32_138 : i32 to vector<1x256xi32>
    %322 = arith.subi %314, %321 : vector<1x256xi32>
    %323 = arith.select %320, %322, %314 : vector<1x256xi1>, vector<1x256xi32>
    %324 = arith.select %316, %318, %323 : vector<1x256xi1>, vector<1x256xi32>
    %325 = arith.sitofp %324 : vector<1x256xi32> to vector<1x256xf32>
    %cst_139 = arith.constant 0.055555556 : f32
    %326 = vector.broadcast %cst_139 : f32 to vector<1x256xf32>
    %327 = arith.mulf %325, %326 : vector<1x256xf32>
    %328 = math.floor %327 : vector<1x256xf32>
    %329 = arith.fptosi %328 : vector<1x256xf32> to vector<1x256xi32>
    %c18_i32_140 = arith.constant 18 : i32
    %330 = vector.broadcast %c18_i32_140 : i32 to vector<1x256xi32>
    %331 = arith.muli %329, %330 : vector<1x256xi32>
    %332 = arith.subi %324, %331 : vector<1x256xi32>
    %c0_i32_141 = arith.constant 0 : i32
    %333 = vector.broadcast %c0_i32_141 : i32 to vector<1x256xi32>
    %334 = arith.cmpi slt, %332, %333 : vector<1x256xi32>
    %c1_i32_142 = arith.constant 1 : i32
    %335 = vector.broadcast %c1_i32_142 : i32 to vector<1x256xi32>
    %336 = arith.subi %329, %335 : vector<1x256xi32>
    %c18_i32_143 = arith.constant 18 : i32
    %337 = vector.broadcast %c18_i32_143 : i32 to vector<1x256xi32>
    %338 = arith.cmpi sge, %332, %337 : vector<1x256xi32>
    %c1_i32_144 = arith.constant 1 : i32
    %339 = vector.broadcast %c1_i32_144 : i32 to vector<1x256xi32>
    %340 = arith.addi %329, %339 : vector<1x256xi32>
    %341 = arith.select %338, %340, %329 : vector<1x256xi1>, vector<1x256xi32>
    %342 = arith.select %334, %336, %341 : vector<1x256xi1>, vector<1x256xi32>
    %c0_i32_145 = arith.constant 0 : i32
    %343 = vector.broadcast %c0_i32_145 : i32 to vector<1x256xi32>
    %344 = arith.cmpi slt, %332, %343 : vector<1x256xi32>
    %c18_i32_146 = arith.constant 18 : i32
    %345 = vector.broadcast %c18_i32_146 : i32 to vector<1x256xi32>
    %346 = arith.addi %332, %345 : vector<1x256xi32>
    %c18_i32_147 = arith.constant 18 : i32
    %347 = vector.broadcast %c18_i32_147 : i32 to vector<1x256xi32>
    %348 = arith.cmpi sge, %332, %347 : vector<1x256xi32>
    %c18_i32_148 = arith.constant 18 : i32
    %349 = vector.broadcast %c18_i32_148 : i32 to vector<1x256xi32>
    %350 = arith.subi %332, %349 : vector<1x256xi32>
    %351 = arith.select %348, %350, %332 : vector<1x256xi1>, vector<1x256xi32>
    %352 = arith.select %344, %346, %351 : vector<1x256xi1>, vector<1x256xi32>
    %c1_i32_149 = arith.constant 1 : i32
    %353 = vector.broadcast %c1_i32_149 : i32 to vector<1x256xi32>
    %354 = arith.cmpi sge, %342, %353 : vector<1x256xi32>
    %355 = arith.andi %304, %354 : vector<1x256xi1>
    %c16_i32_150 = arith.constant 16 : i32
    %356 = vector.broadcast %c16_i32_150 : i32 to vector<1x256xi32>
    %357 = arith.cmpi sle, %342, %356 : vector<1x256xi32>
    %358 = arith.andi %355, %357 : vector<1x256xi1>
    %c1_i32_151 = arith.constant 1 : i32
    %359 = vector.broadcast %c1_i32_151 : i32 to vector<1x256xi32>
    %360 = arith.cmpi sge, %352, %359 : vector<1x256xi32>
    %361 = arith.andi %358, %360 : vector<1x256xi1>
    %c16_i32_152 = arith.constant 16 : i32
    %362 = vector.broadcast %c16_i32_152 : i32 to vector<1x256xi32>
    %363 = arith.cmpi sle, %352, %362 : vector<1x256xi32>
    %364 = arith.andi %361, %363 : vector<1x256xi1>
    %365 = arith.extui %364 : vector<1x256xi1> to vector<1x256xi32>
    %366 = arith.sitofp %365 : vector<1x256xi32> to vector<1x256xf32>
    %367 = vector.broadcast %366 : vector<1x256xf32> to vector<16x256xf32>
    %368 = arith.mulf %295, %367 : vector<16x256xf32>
    %cst_153 = arith.constant dense<0.000000e+00> : vector<16xf32>
    %369 = vector.multi_reduction <add>, %368, %cst_153 [1] : vector<16x256xf32> to vector<16xf32>
    %370 = arith.mulf %295, %295 : vector<16x256xf32>
    %371 = vector.broadcast %366 : vector<1x256xf32> to vector<16x256xf32>
    %372 = arith.mulf %370, %371 : vector<16x256xf32>
    %cst_154 = arith.constant dense<0.000000e+00> : vector<16xf32>
    %373 = vector.multi_reduction <add>, %372, %cst_154 [1] : vector<16x256xf32> to vector<16xf32>
    %374 = tpu.iota {dimensions = array<i32: 0>} : vector<8x16xi32>
    %c0_i32_155 = arith.constant 0 : i32
    %375 = vector.broadcast %c0_i32_155 : i32 to vector<8x16xi32>
    %376 = arith.cmpi eq, %374, %375 : vector<8x16xi32>
    %377 = vector.shape_cast %369 : vector<16xf32> to vector<1x16xf32>
    %cst_156 = arith.constant 0.000000e+00 : f32
    %378 = vector.shape_cast %377 : vector<1x16xf32> to vector<1x16xf32>
    %379 = vector.broadcast %378 : vector<1x16xf32> to vector<8x16xf32>
    %380 = vector.broadcast %cst_156 : f32 to vector<8x16xf32>
    %381 = arith.select %376, %379, %380 : vector<8x16xi1>, vector<8x16xf32>
    %c0_157 = arith.constant 0 : index
    %c0_158 = arith.constant 0 : index
    %c0_159 = arith.constant 0 : index
    %382 = vector.load %arg8[%c0_157, %c0_158, %c0_159] : memref<1x8x16xf32, #tpu.memory_space<vmem>>, vector<1x8x16xf32>
    %383 = vector.shape_cast %382 : vector<1x8x16xf32> to vector<8x16xf32>
    %384 = vector.shape_cast %381 : vector<8x16xf32> to vector<1x8x16xf32>
    tpu.vector_store %arg8[%c0_157, %c0_158, %c0_159], %384 {strides = array<i32>} : memref<1x8x16xf32, #tpu.memory_space<vmem>>, vector<1x8x16xf32>,
    %c0_i32_160 = arith.constant 0 : i32
    %385 = vector.broadcast %c0_i32_160 : i32 to vector<8x16xi32>
    %386 = arith.cmpi eq, %374, %385 : vector<8x16xi32>
    %387 = vector.shape_cast %373 : vector<16xf32> to vector<1x16xf32>
    %cst_161 = arith.constant 0.000000e+00 : f32
    %388 = vector.shape_cast %387 : vector<1x16xf32> to vector<1x16xf32>
    %389 = vector.broadcast %388 : vector<1x16xf32> to vector<8x16xf32>
    %390 = vector.broadcast %cst_161 : f32 to vector<8x16xf32>
    %391 = arith.select %386, %389, %390 : vector<8x16xi1>, vector<8x16xf32>
    %c0_162 = arith.constant 0 : index
    %c0_163 = arith.constant 0 : index
    %c0_164 = arith.constant 0 : index
    %392 = vector.load %arg9[%c0_162, %c0_163, %c0_164] : memref<1x8x16xf32, #tpu.memory_space<vmem>>, vector<1x8x16xf32>
    %393 = vector.shape_cast %392 : vector<1x8x16xf32> to vector<8x16xf32>
    %394 = vector.shape_cast %391 : vector<8x16xf32> to vector<1x8x16xf32>
    tpu.vector_store %arg9[%c0_162, %c0_163, %c0_164], %394 {strides = array<i32>} : memref<1x8x16xf32, #tpu.memory_space<vmem>>, vector<1x8x16xf32>,
    return
  }
  func.func @transform_0(%arg0: i32) -> (i32, i32) {
    %c2_i32 = arith.constant 2 : i32
    %0 = arith.muli %arg0, %c2_i32 : i32
    %c1_i32 = arith.constant 1 : i32
    %1 = arith.subi %0, %c1_i32 : i32
    %c0_i32 = arith.constant 0 : i32
    %2 = arith.maxsi %1, %c0_i32 : i32
    %c0_i32_0 = arith.constant 0 : i32
    %c0_i32_1 = arith.constant 0 : i32
    return %c0_i32_0, %2 : i32, i32
  }
  func.func @transform_1(%arg0: i32) -> (i32, i32) {
    %c0_i32 = arith.constant 0 : i32
    %c0_i32_0 = arith.constant 0 : i32
    return %c0_i32, %arg0 : i32, i32
  }
  func.func @transform_2(%arg0: i32) -> (i32, i32) {
    %c1_i32 = arith.constant 1 : i32
    %0 = arith.addi %arg0, %c1_i32 : i32
    %c2_i32 = arith.constant 2 : i32
    %1 = arith.muli %0, %c2_i32 : i32
    %c5_i32 = arith.constant 5 : i32
    %2 = arith.minsi %1, %c5_i32 : i32
    %c0_i32 = arith.constant 0 : i32
    %c0_i32_0 = arith.constant 0 : i32
    return %c0_i32, %2 : i32, i32
  }
  func.func @transform_3(%arg0: i32) -> (i32, i32) {
    %c0_i32 = arith.constant 0 : i32
    %c0_i32_0 = arith.constant 0 : i32
    %c0_i32_1 = arith.constant 0 : i32
    return %c0_i32, %c0_i32_0 : i32, i32
  }
  func.func @transform_4(%arg0: i32) -> (i32, i32) {
    %c0_i32 = arith.constant 0 : i32
    %c0_i32_0 = arith.constant 0 : i32
    %c0_i32_1 = arith.constant 0 : i32
    return %c0_i32, %c0_i32_0 : i32, i32
  }
  func.func @transform_5(%arg0: i32) -> (i32, i32, i32) {
    %c0_i32 = arith.constant 0 : i32
    %c0_i32_0 = arith.constant 0 : i32
    %c0_i32_1 = arith.constant 0 : i32
    %c0_i32_2 = arith.constant 0 : i32
    return %c0_i32, %c0_i32_0, %c0_i32_1 : i32, i32, i32
  }
  func.func @transform_6(%arg0: i32) -> (i32, i32) {
    %c0_i32 = arith.constant 0 : i32
    %c0_i32_0 = arith.constant 0 : i32
    return %c0_i32, %arg0 : i32, i32
  }
  func.func @transform_7(%arg0: i32) -> (i32, i32, i32) {
    %c0_i32 = arith.constant 0 : i32
    %c0_i32_0 = arith.constant 0 : i32
    %c0_i32_1 = arith.constant 0 : i32
    return %arg0, %c0_i32, %c0_i32_0 : i32, i32, i32
  }
  func.func @transform_8(%arg0: i32) -> (i32, i32, i32) {
    %c0_i32 = arith.constant 0 : i32
    %c0_i32_0 = arith.constant 0 : i32
    %c0_i32_1 = arith.constant 0 : i32
    return %arg0, %c0_i32, %c0_i32_0 : i32, i32, i32
  }
}

</mosaic_0001>

<bundles_post_ra>
// kernel: double_conv.5
= control target key start
LH: loop header
LB: loop body
LE: loop exit
PB: predicated region body
PF: predicated region fallthrough
CT: control target
= control target key end

     0   :  { %s415_s12 = smov 0   ;;  %s417_s13 = smov 0   ;;  %s487_s0 = inlined_call_operand.vmem [shape: f32[16,768], index: 0, kind: input, shape index: {}]   ;;  %s488_s1 = inlined_call_operand.vmem [shape: f32[16,1], index: 1, kind: input, shape index: {}]   ;;  %s489_s2 = inlined_call_operand.vmem [shape: f32[16,1], index: 2, kind: input, shape index: {}]   ;;  %s490_s3 = inlined_call_operand.vmem [shape: f32[16,768], index: 3, kind: output, shape index: {}]  }
   0x1   :  { %s419_s14 = smov 0  }
   0x2 LB: > { %s326_s15 = sadd.s32 4294967295, %s392_s14   ;;  %s432_s16 = sadd.s32 1, %s392_s14   ;;  %s392_s14 = sphi %s419_s14, %s494_s14   ;;  %s388_s13 = sphi %s417_s13, %s493_s13   ;;  %s384_s12 = sphi %s415_s12, %s492_s12  }
   0x3   : > { %s17_s17 = ssub.s32 %s392_s14, %s432_s16  ;;  %s20_s18 = sadd.s32 1, %s388_s13 }
   0x4   : > { %p18_p0 = scmp.eq.s32.totalorder %s17_s17, 0  ;;  %p27_p1 = scmp.ne.s32.totalorder %s388_s13, %s384_s12 }
   0x5   : > { %p28_p2 = scmp.eq.s32.totalorder %s392_s14, 0  ;;  %p99_p3 = scmp.eq.s32.totalorder %s326_s15, 2 }
   0x6   : > { %s443_s19 = scalar_select %p18_p0, %s388_s13, %s20_s18  }
   0x7   : > { %p29_p4 = por %p28_p2, %p27_p1  ;;  %p445_p5 = por %p99_p3, %p27_p1 }
   0x8   : > { %p329_p6 = scmp.ge.s32.totalorder %s392_s14, 3 }
   0xa   : > { %127 = sbr.rel (%p329_p6) target bundleno = 23 (0x17), region = 24 }
   0xf   : > { %130 = sbr.rel (!%p29_p4) target bundleno = 23 (0x17), region = 28  ;;  %s132_s21 = sand.u32 (%p29_p4), 1, %s388_s13  }
  0x10   : > { %s341_s22 = sshll.u32 (%p29_p4), %s392_s14, 4  ;;  %s330_s23 = sshll.u32 (%p29_p4), %s132_s21, 5 }
  0x11   : > { %s137_s26 = scalar_lea.vmem (%p29_p4), %s487_s0, %s341_s22  ;;  %s134_s27 = scalar_lea.vmem (%p29_p4), [#allocation2], %s330_s23 }
  0x12   : > { %v150_v0 = vld [vmem:[%s137_s26] sm:$0xff] (%p29_p4)  ;;  %v152_v1 = vld [vmem:[%s137_s26 + $0x8] sm:$0xff] (%p29_p4)  ;;  %v154_v2 = vld [vmem:[%s137_s26 + $0x30] sm:$0xff] (%p29_p4) }
  0x13   : > { %151 = vst [vmem:[%s134_s27] sm:$0xff] (%p29_p4), %v150_v0  ;;  %v156_v3 = vld [vmem:[%s137_s26 + $0x38] sm:$0xff] (%p29_p4) }
  0x14   : > { %153 = vst [vmem:[%s134_s27 + $0x8] sm:$0xff] %v152_v1 }
  0x15   : > { %155 = vst [vmem:[%s134_s27 + $0x10] sm:$0xff] %v154_v2 }
  0x16   : > { %157 = vst [vmem:[%s134_s27 + $0x18] sm:$0xff] %v156_v3 }
  0x17 PF: > { %p333_p7 = scmp.ge.s32.totalorder %s392_s14, 1  ;;  %p162_p8 = scmp.lt.s32.totalorder %s392_s14, 4 }
  0x19   : > { %p163_p9 = pnand %p333_p7, %p162_p8 }
  0x1a   : > { %s169_s9 = sand.u32 (!%p163_p9), 1, %s384_s12  }
  0x1b   : > { %166 = sbr.rel (%p163_p9) target bundleno = 173 (0xad), region = 51  ;;  %s334_s10 = sshll.u32 (!%p163_p9), %s169_s9, 5 }
  0x1c   : > { %s171_s11 = scalar_lea.vmem (!%p163_p9), [#allocation2], %s334_s10  ;;  %s190_s17 = scalar_lea.vmem (!%p163_p9), [#allocation3], %s334_s10 }
  0x20   : > { %v213_v4 = vld [vmem:[%s489_s2] sm:$0xff]  ;;  %v394_v6 = vmov 0   ;;  %v214_v7 = vld [vmem:[%s489_s2 + $0x8] sm:$0xff]  ;;  %v195_v19 = vld [vmem:[%s171_s11 + $0x10] sm:$0xff]  ;;  %s342_s12 = sshll.u32 (%p445_p5), %s326_s15, 4 }
  0x21   : > { %v197_v5 = vld [vmem:[%s488_s1] sm:$0xff]  ;;  %369 = vset.pattern.permute.xlu1 %v394_v6  ;;  %368 = vset.pattern.permute.xlu0 %v394_v6  ;;  %v198_v8 = vld [vmem:[%s488_s1 + $0x8] sm:$0xff]  ;;  %v196_v20 = vld [vmem:[%s171_s11 + $0x18] sm:$0xff]  ;;  %s246_s22 = scalar_lea.vmem (%p445_p5), %s490_s3, %s342_s12 }
  0x22   : > { %217 = vperm.xlu1 %369, %v213_v4   ;;  %201 = vperm.xlu0 %368, %v197_v5   ;;  %v193_v9 = vld [vmem:[%s171_s11] sm:$0xff]  ;;  %v194_v10 = vld [vmem:[%s171_s11 + $0x8] sm:$0xff] }
  0x2a   : > { %222 = vperm.xlu1 %369, %v214_v7   ;;  %206 = vperm.xlu0 %368, %v198_v8  }
  0x94   : > { %v218_v11 = vpop.permute.xlu1 %217  ;;  %v202_v12 = vpop.permute.xlu0 %201 }
  0x95   : > { %v209_v13 = vmul.f32 %v202_v12, %v193_v9  ;;  %v210_v14 = vmul.f32 %v202_v12, %v194_v10 }
  0x97   : > { %v225_v15 = vadd.f32 %v218_v11, %v209_v13  ;;  %v226_v16 = vadd.f32 %v218_v11, %v210_v14 }
  0x99   : > { %v229_v17 = vmax.f32 %v225_v15, 0.0  ;;  %v230_v18 = vmax.f32 %v226_v16, 0.0 }
  0x9b   : > { %233 = vst [vmem:[%s190_s17] sm:$0xff] %v229_v17 }
  0x9c   : > { %234 = vst [vmem:[%s190_s17 + $0x8] sm:$0xff] %v230_v18  ;;  %v207_v21 = vpop.permute.xlu0 %206  ;;  %v223_v24 = vpop.permute.xlu1 %222 }
  0x9d   : > { %v211_v22 = vmul.f32 %v207_v21, %v195_v19  ;;  %v212_v23 = vmul.f32 %v207_v21, %v196_v20 }
  0x9f   : > { %v227_v25 = vadd.f32 %v223_v24, %v211_v22  ;;  %v228_v26 = vadd.f32 %v223_v24, %v212_v23 }
  0xa0   : > { %243 = sbr.rel (!%p445_p5) target bundleno = 173 (0xad), region = 59 }
  0xa1   : > { %v231_v27 = vmax.f32 %v227_v25, 0.0  ;;  %v232_v28 = vmax.f32 %v228_v26, 0.0 }
  0xa2   : > { %v259_v29 = vld [vmem:[%s190_s17] sm:$0xff] (%p445_p5) }
  0xa3   : > { %235 = vst [vmem:[%s190_s17 + $0x10] sm:$0xff] %v231_v27  ;;  %v261_v30 = vld [vmem:[%s190_s17 + $0x8] sm:$0xff] (%p445_p5) }
  0xa4   : > { %236 = vst [vmem:[%s190_s17 + $0x18] sm:$0xff] %v232_v28 }
  0xa5   : > { %260 = vst [vmem:[%s246_s22] sm:$0xff] %v259_v29 }
  0xa6   : > { %262 = vst [vmem:[%s246_s22 + $0x8] sm:$0xff] %v261_v30 }
  0xaa   : > { %v263_v31 = vld [vmem:[%s190_s17 + $0x10] sm:$0xff] }
  0xab   : > { %v265_v32 = vld [vmem:[%s190_s17 + $0x18] sm:$0xff]  ;;  %264 = vst [vmem:[%s246_s22 + $0x30] sm:$0xff] %v263_v31 }
  0xac   : > { %266 = vst [vmem:[%s246_s22 + $0x38] sm:$0xff] %v265_v32 }
  0xad PF: > { %p10_p10 = scmp.ge.s32.totalorder %s432_s16, 5   ;;  %s492_s12 = smov %s388_s13 }
  0xae   : > { %s493_s13 = smov %s443_s19  ;;  %s494_s14 = smov %s432_s16 }
  0xaf   :  { %12 = sbr.rel (!%p10_p10) target bundleno = 2 (0x2), region = 113 }

// kernel: double_conv.3
= control target key start
LH: loop header
LB: loop body
LE: loop exit
PB: predicated region body
PF: predicated region fallthrough
CT: control target
= control target key end

     0   :  { %s1691_s21 = smov 0   ;;  %s1693_s22 = smov 0   ;;  %s1989_s0 = inlined_call_operand.vmem [shape: bf16[16,768], index: 0, kind: input, shape index: {}, may-alias: {0,1,2}]   ;;  %s1990_s1 = inlined_call_operand.vmem [shape: bf16[16,768], index: 1, kind: input, shape index: {}, may-alias: {0,1,2}]   ;;  %s1991_s2 = inlined_call_operand.vmem [shape: bf16[16,768], index: 2, kind: input, shape index: {}, may-alias: {0,1,2}]   ;;  %s1992_s3 = inlined_call_operand.vmem [shape: bf16[9,16,16], index: 3, kind: input, shape index: {}]   ;;  %s1993_s4 = inlined_call_operand.vmem [shape: f32[16,768], index: 4, kind: output, shape index: {0}]   ;;  %s1994_s5 = inlined_call_operand.vmem [shape: f32[3,8,16], index: 5, kind: output, shape index: {1}]   ;;  %s1995_s6 = inlined_call_operand.vmem [shape: f32[3,8,16], index: 6, kind: output, shape index: {2}]  }
   0x1   :  { %s1695_s23 = smov 0   ;;  %s1697_s24 = smov 0  }
   0x2   :  { %s1699_s25 = smov 0   ;;  %s1701_s26 = smov 0  }
   0x3   :  { %s1703_s27 = smov 0  }
   0x4 LB: > { %1999 = sst [smem:[#allocation7_spill]] %s1641_s26  ;;  %s1727_s28 = sadd.s32 1, %s1645_s27   ;;  %s1645_s27 = sphi %s1703_s27, %s2011_s27   ;;  %s1641_s26 = sphi %s1701_s26, %s2014_s26   ;;  %s1637_s25 = sphi %s1699_s25, %s2013_s25   ;;  %s1633_s24 = sphi %s1697_s24, %s2018_s24   ;;  %s1629_s23 = sphi %s1695_s23, %s2017_s23   ;;  %s1625_s22 = sphi %s1693_s22, %s2016_s22   ;;  %s1621_s21 = sphi %s1691_s21, %s2015_s21  }
   0x5   : > { %2000 = sst [smem:[#allocation8_spill]] %s1727_s28  ;;  %s1348_s29 = sshll.u32 %s1645_s27, 1 }
   0x6   : > { %s32_s30 = sadd.s32 1, %s1641_s26  ;;  %s1349_s7 = sadd.s32 4294967295, %s1348_s29 }
   0x7   : > { %s1490_s8 = sadd.s32 2, %s1348_s29  ;;  %p23_p0 = scmp.gt.s32.totalorder %s1349_s7, 0 }
   0x8   : > { %s1351_s9 = sadd.s32 4294967295, %s1490_s8  ;;  %p39_p2 = scmp.ne.s32.totalorder %s1641_s26, %s1637_s25 }
   0x9   : > { %p27_p1 = scmp.gt.s32.totalorder %s1351_s9, 0  ;;  %s2020_s7 = smov (!%p23_p0, %s1349_s7), 0 }
   0xa   : > { %p40_p3 = scmp.eq.s32.totalorder %s1645_s27, 0  ;;  %s55_s10 = ssub.s32 %s1645_s27, %s1727_s28 }
   0xb   : > { %s2022_s9 = smov (!%p27_p1, %s1351_s9), 0  ;;  %p56_p4 = scmp.eq.s32.totalorder %s55_s10, 0 }
   0xc   : > { %s29_s11 = ssub.s32 %s2020_s7, %s2022_s9  ;;  %p1741_p6 = por %p40_p3, %p39_p2 }
   0xd   : > { %p30_p5 = scmp.eq.s32.totalorder %s29_s11, 0  ;;  %s58_s13 = sadd.s32 1, %s1633_s24 }
   0xe   : > { %p65_p7 = scmp.ne.s32.totalorder %s1633_s24, %s1629_s23  ;;  %p83_p9 = scmp.lt.s32.totalorder %s1490_s8, 5 }
   0xf   : > { %s1749_s14 = scalar_select %p30_p5, %s1641_s26, %s32_s30  }
  0x10   : > { %s1752_s15 = scalar_select %p56_p4, %s1633_s24, %s58_s13  }
  0x11   : > { %2002 = sst [smem:[#allocation9_spill]] %s1749_s14  ;;  %p1759_p8 = por %p65_p7, %p40_p3 }
  0x12   : > { %2003 = sst [smem:[#allocation10_spill]] %s1752_s15  ;;  %s1764_s17 = sadd.s32 4294967295, %s1645_s27  }
  0x13   : > { %s1494_s18 = sadd.s32 2, %s1490_s8  ;;  %s2024_s8 = smov (!%p83_p9, %s1490_s8), 5 }
  0x14   : > { %p87_p10 = scmp.lt.s32.totalorder %s1494_s18, 5  ;;  %p99_p11 = scmp.ne.s32.totalorder %s1625_s22, %s1621_s21 }
  0x15   : > { %p150_p12 = scmp.eq.s32.totalorder %s1764_s17, 2  ;;  %s92_s30 = sadd.s32 1, %s1625_s22 }
  0x16   : > { %s2026_s18 = smov (!%p87_p10, %s1494_s18), 5  ;;  %p1773_p13 = por %p99_p11, %p40_p3 }
  0x17   : > { %p1780_p0 = por %p150_p12, %p65_p7  ;;  %s89_s29 = ssub.s32 %s2024_s8, %s2026_s18 }
  0x18   : > { %p90_p1 = scmp.eq.s32.totalorder %s89_s29, 0  ;;  %p1355_p2 = scmp.ge.s32.totalorder %s1645_s27, 3 }
  0x1a   : > { %s1787_s9 = scalar_select %p90_p1, %s1625_s22, %s92_s30  }
  0x1b   : > { %227 = sbr.rel (%p1355_p2) target bundleno = 50 (0x32), region = 20 }
  0x20   : > { %230 = sbr.rel (!%p1741_p6) target bundleno = 38 (0x26), region = 24  ;;  %s232_s10 = sand.u32 (%p1741_p6), 1, %s1641_s26  }
  0x21   : > { %s1359_s11 = sshll.u32 (%p1741_p6), %s2020_s7, 2  ;;  %s1356_s13 = sshll.u32 (%p1741_p6), %s232_s10, 3 }
  0x22   : > { %s240_s28 = scalar_lea.vmem (%p1741_p6), %s1989_s0, %s1359_s11  ;;  %s234_s18 = scalar_lea.vmem (%p1741_p6), [#allocation3], %s1356_s13 }
  0x23   : > { %v257_v0 = vld [vmem:[%s240_s28] sm:$0xf] (%p1741_p6)  ;;  %v259_v1 = vld [vmem:[%s240_s28 + $0x18] sm:$0xf] (%p1741_p6) }
  0x24   : > { %258 = vst [vmem:[%s234_s18] sm:$0xf] (%p1741_p6), %v257_v0 }
  0x25   : > { %260 = vst [vmem:[%s234_s18 + $0x4] sm:$0xf] %v259_v1 }
  0x26 PF: > { %288 = sbr.rel (!%p1759_p8) target bundleno = 44 (0x2c), region = 65  ;;  %s290_s12 = sand.u32 (%p1759_p8), 1, %s1633_s24  }
  0x27   : > { %s1495_s29 = sshll.u32 (%p1759_p8), %s1645_s27, 3  ;;  %s1360_s30 = sshll.u32 (%p1759_p8), %s290_s12, 4 }
  0x28   : > { %s295_s26 = scalar_lea.vmem (%p1759_p8), %s1990_s1, %s1495_s29  ;;  %s292_s14 = scalar_lea.vmem (%p1759_p8), [#allocation4], %s1360_s30 }
  0x29   : > { %v326_v2 = vld [vmem:[%s295_s26] sm:$0xff] (%p1759_p8)  ;;  %v328_v3 = vld [vmem:[%s295_s26 + $0x18] sm:$0xff] (%p1759_p8) }
  0x2a   : > { %327 = vst [vmem:[%s292_s14] sm:$0xff] (%p1759_p8), %v326_v2 }
  0x2b   : > { %329 = vst [vmem:[%s292_s14 + $0x8] sm:$0xff] %v328_v3 }
  0x2c PF: > { %335 = sbr.rel (!%p1773_p13) target bundleno = 50 (0x32), region = 103  ;;  %s337_s28 = sand.u32 (%p1773_p13), 1, %s1625_s22  }
  0x2d   : > { %s1365_s15 = sshll.u32 (%p1773_p13), %s2024_s8, 2  ;;  %s1363_s16 = sshll.u32 (%p1773_p13), %s337_s28, 3 }
  0x2e   : > { %s345_s18 = scalar_lea.vmem (%p1773_p13), %s1991_s2, %s1365_s15  ;;  %s339_s12 = scalar_lea.vmem (%p1773_p13), [#allocation5], %s1363_s16 }
  0x2f   : > { %v362_v4 = vld [vmem:[%s345_s18] sm:$0xf] (%p1773_p13)  ;;  %v364_v5 = vld [vmem:[%s345_s18 + $0x18] sm:$0xf] (%p1773_p13) }
  0x30   : > { %363 = vst [vmem:[%s339_s12] sm:$0xf] (%p1773_p13), %v362_v4 }
  0x31   : > { %365 = vst [vmem:[%s339_s12 + $0x4] sm:$0xf] %v364_v5 }
  0x32 PF: > { %p1366_p3 = scmp.ge.s32.totalorder %s1645_s27, 1  ;;  %p392_p4 = scmp.lt.s32.totalorder %s1645_s27, 4 }
  0x34   : > { %p393_p5 = pnand %p1366_p3, %p392_p4 }
  0x35   : > { %s406_s26 = sand.u32 (!%p393_p5), 1, %s1629_s23   ;;  %s399_s19 = sand.u32 (!%p393_p5), 1, %s1637_s25  }
  0x36   : > { %396 = sbr.rel (%p393_p5) target bundleno = 527 (0x20f), region = 144  ;;  %s1368_s8 = sshll.u32 (!%p393_p5), %s406_s26, 4 }
  0x37   : > { %s1367_s29 = sshll.u32 (!%p393_p5), %s399_s19, 3  ;;  %s408_s30 = scalar_lea.vmem (!%p393_p5), [#allocation4], %s1368_s8 }
  0x38   : > { %s401_s7 = scalar_lea.vmem (!%p393_p5), [#allocation3], %s1367_s29  ;;  %s1647_s25 = smov (!%p393_p5), 18  }
  0x39   : > { %s1648_s27 = smov (!%p393_p5), 19   ;;  %s413_s10 = sand.u32 (!%p393_p5), 1, %s1621_s21  }
  0x3a   : > { %s1369_s14 = sshll.u32 (!%p393_p5), %s413_s10, 3  ;;  %s1649_s28 = smov (!%p393_p5), 17  }
  0x3b   : > { %v481_v6 = vld [vmem:[%s408_s30] sm:$0xff]  ;;  %v482_v7 = vld [vmem:[%s408_s30 + $0x8] sm:$0xff]  ;;  %s415_s15 = scalar_lea.vmem [#allocation5], %s1369_s14  ;;  %s1650_s16 = smov 1   ;;  %vm570_vm0 = vcmask 154624   ;;  %vm527_vm1 = vcmask 130048  }
  0x3c   : > { %483 = vst [vmem:[#allocation2 + $0x4] sm:$0xff] %v481_v6  ;;  %v477_v8 = vld [vmem:[%s401_s7] sm:$0xf]  ;;  %v478_v9 = vld [vmem:[%s401_s7 + $0x4] sm:$0xf]  ;;  %s1651_s21 = smov 127  }
  0x3d   : > { %484 = vst [vmem:[#allocation2 + $0x14] sm:$0xff] %v482_v7  ;;  %v485_v19 = vld [vmem:[%s415_s15] sm:$0xf]  ;;  %v486_v20 = vld [vmem:[%s415_s15 + $0x4] sm:$0xf]  ;;  %s1652_s11 = smov 111  }
  0x3e   : > { %479 = vst [vmem:[#allocation2] sm:$0xf] %v477_v8  ;;  %s1653_s13 = smov 110   ;;  %s1654_s18 = smov 109   ;;  %v1501_v33 = vld [vmem:[%s1992_s3] sm:$0xff]  ;;  %vm522_vm2 = vcmask 146432  }
  0x3f   : > { %480 = vst [vmem:[#allocation2 + $0x10] sm:$0xf] %v478_v9  ;;  %v1502_v42 = vld [vmem:[%s1992_s3 + $0x8] sm:$0xff]  ;;  %vm620_vm3 = vcmask 138240   ;;  %vm674_vm4 = vcmask 7168   ;;  %v1504_v56 = vld [vmem:[%s1992_s3 + $0x18] sm:$0xff] }
  0x40   : > { %487 = vst [vmem:[#allocation2 + $0xc] sm:$0xf] %v485_v19  ;;  %v1503_v60 = vld [vmem:[%s1992_s3 + $0x10] sm:$0xff]  ;;  %vm800_vm5 = vcmask 1039360   ;;  %vm854_vm6 = vcmask 908288   ;;  %v1511_v3 = vld [vmem:[%s1992_s3 + $0x28] sm:$0xff] }
  0x41   : > { %488 = vst [vmem:[#allocation2 + $0x1c] sm:$0xf] %v486_v20  ;;  %v1507_v6 = vld [vmem:[%s1992_s3 + $0x20] sm:$0xff]  ;;  %vm908_vm7 = vcmask 900096   ;;  %vm962_vm8 = vcmask 891904   ;;  %s1373_s8 = sshll.u32 %s1764_s17, 8 }
  0x42   : > { %v1514_v20 = vld [vmem:[%s1992_s3 + $0x40] sm:$0xff]  ;;  %s1370_s19 = sshll.u32 %s406_s26, 5  ;;  %p467_p6 = scmp.lt.s32.totalorder %s1764_s17, 2 }
  0x43   : > { %v1390_v10 = vld [vmem:[#allocation2 + $0x8] sm:$0xf]  ;;  %v1498_v11 = vld [vmem:[#allocation2 + $0x4] sm:$0xf]  ;;  %s1937_s23 = scalar_lea.vmem [#allocation6], %s1370_s19 }
  0x44   : > { %v1500_v12 = vld [vmem:[#allocation2 + $0x14] sm:$0xf0]  ;;  %v1384_v13 = vld [vmem:[#allocation2 + $0x10] sm:$0xf0]  ;;  %v1508_v21 = vld [vmem:[#allocation2 + $0x8] sm:$0xf] }
  0x45   : > { %v1391_v14 = vor.u32 %v1500_v12, %v1390_v10  ;;  %v1382_v15 = vld [vmem:[#allocation2] sm:$0xf]  ;;  %v1387_v16 = vor.u32 %v1498_v11, %v1384_v13  ;;  %v1442_v22 = vld [vmem:[#allocation2 + $0x14] sm:$0xf0]  ;;  %v1440_v24 = vld [vmem:[#allocation2 + $0x4] sm:$0xf] }
  0x46   : > { %v1499_v17 = vld [vmem:[#allocation2 + $0xc] sm:$0xf0]  ;;  %v1509_v25 = vld [vmem:[#allocation2 + $0x10] sm:$0xf0]  ;;  %v1445_v27 = vor.u32 %v1508_v21, %v1442_v22  ;;  %v1505_v43 = vld [vmem:[#allocation2 + $0x8] sm:$0xf]  ;;  %v1006_v21 = vlaneseq }
  0x47   : > { %520 = vrot.lane.b32.xlu1 %v1391_v14, %s1647_s25  ;;  %v1383_v18 = vor.u32 %v1499_v17, %v1382_v15  ;;  %566 = vrot.lane.b32.xlu2 %v1387_v16, %s1648_s27  ;;  %v1448_v23 = vld [vmem:[#allocation2 + $0xc] sm:$0xf]  ;;  %v1441_v29 = vor.u32 %v1509_v25, %v1440_v24  ;;  %v1426_v44 = vld [vmem:[#allocation2 + $0x14] sm:$0xf0]  ;;  %v1424_v45 = vld [vmem:[#allocation2 + $0x4] sm:$0xf]  ;;  %v1009_v24 = vstv %s1373_s8 }
  0x48   : > { %v1510_v26 = vld [vmem:[#allocation2 + $0x18] sm:$0xf0]  ;;  %v1506_v46 = vld [vmem:[#allocation2 + $0x10] sm:$0xf0]  ;;  %v1429_v47 = vor.u32 %v1505_v43, %v1426_v44  ;;  %v1865_v22 = vand.u32 127, %v1006_v21  ;;  %s468_s26 = scalar_select %p467_p6, %s1764_s17, 2 }
  0x49   : > { %516 = vrot.lane.b32.xlu0 %v1383_v18, %s1647_s25  ;;  %v1449_v28 = vor.u32 %v1510_v26, %v1448_v23  ;;  %v1425_v50 = vor.u32 %v1506_v46, %v1424_v45  ;;  %v1513_v15 = vld [vmem:[%s1992_s3 + $0x38] sm:$0xff] }
  0x4a   : > { %v1008_v23 = vadd.s32 128, %v1865_v22  ;;  %v1010_v25 = vadd.s32 %v1009_v24, %v1865_v22  ;;  %s1371_s29 = sshll.u32 %s468_s26, 3 }
  0x4b   : > { %s474_s14 = scalar_lea.vmem %s1995_s6, %s1371_s29 }
  0x4c   : > { %v1011_v26 = vadd.s32 %v1009_v24, %v1008_v23  ;;  %vm1012_vm9 = vcmp.ge.s32.totalorder %v1010_v25, 0  ;;  %vm1014_vm11 = vcmp.lt.s32.totalorder %v1010_v25, 648 }
  0x4d   : > { %vm1869_vm13 = vmand %vm1012_vm9, %vm1014_vm11 }
  0x4e   : > { %vm1013_vm10 = vcmp.ge.s32.totalorder %v1011_v26, 0  ;;  %vm1015_vm12 = vcmp.lt.s32.totalorder %v1011_v26, 648 }
  0x4f   : > { %564 = vrot.lane.b32.xlu1 %v1383_v18, %s1648_s27  ;;  %568 = vrot.lane.b32.xlu2 %v1391_v14, %s1648_s27  ;;  %vm1873_vm14 = vmand %vm1013_vm10, %vm1015_vm12 }
  0x51   : > { %518 = vrot.lane.b32.xlu0 %v1387_v16, %s1647_s25  ;;  %s470_s25 = scalar_lea.vmem %s1994_s5, %s1371_s29 }
  0x57   : > { %616 = vrot.lane.b32.xlu1 %v1387_v16, %s1649_s28  ;;  %618 = vrot.lane.b32.xlu2 %v1391_v14, %s1649_s28 }
  0x59   : > { %614 = vrot.lane.b32.xlu0 %v1383_v18, %s1649_s28  ;;  %s1515_s28 = sshll.u32 (%p1780_p0), %s1764_s17, 4 }
  0x5f   : > { %670 = vrot.lane.b32.xlu1 %v1387_v16, %s1650_s16  ;;  %672 = vrot.lane.b32.xlu2 %v1391_v14, %s1650_s16 }
  0x61   : > { %668 = vrot.lane.b32.xlu0 %v1383_v18, %s1650_s16  ;;  %v1512_v18 = vld [vmem:[%s1992_s3 + $0x30] sm:$0xff] }
  0x67   : > { %796 = vrot.lane.b32.xlu1 %v1445_v27, %s1651_s21  ;;  %798 = vrot.lane.b32.xlu2 %v1449_v28, %s1651_s21 }
  0x69   : > { %794 = vrot.lane.b32.xlu0 %v1441_v29, %s1651_s21  ;;  %s1176_s21 = scalar_lea.vmem (%p1780_p0), %s1993_s4, %s1515_s28 }
  0x6f   : > { %850 = vrot.lane.b32.xlu1 %v1445_v27, %s1652_s11  ;;  %852 = vrot.lane.b32.xlu2 %v1449_v28, %s1652_s11 }
  0x71   : > { %848 = vrot.lane.b32.xlu0 %v1441_v29, %s1652_s11 }
  0x77   : > { %904 = vrot.lane.b32.xlu1 %v1445_v27, %s1653_s13  ;;  %906 = vrot.lane.b32.xlu2 %v1449_v28, %s1653_s13 }
  0x79   : > { %902 = vrot.lane.b32.xlu0 %v1441_v29, %s1653_s13 }
  0x7f   : > { %958 = vrot.lane.b32.xlu1 %v1445_v27, %s1654_s18  ;;  %960 = vrot.lane.b32.xlu2 %v1449_v28, %s1654_s18 }
  0x81   : > { %956 = vrot.lane.b32.xlu0 %v1441_v29, %s1654_s18  ;;  %v1018_v29 = vsel %vm1869_vm13, %v1010_v25, 0 }
  0xa1   : > { %v567_v30 = vpop.permute.xlu2 %566 }
  0xa9   : > { %v569_v31 = vpop.permute.xlu2 %568 }
  0xaa   : > { %v572_v32 = vsel %vm570_vm0, %v567_v30, %v569_v31  ;;  %v1020_v31 = vcvt.s32.f32 %v1018_v29 }
  0xab   : > { %599 = vmatpush.bf16.msra.mxu3 %v572_v32 }
  0xae   : > { %1399 = vmatmul.msk.bf16.vlgmr.msra.gmra.mxu3 %vm527_vm1, %v1501_v33 }
  0xb1   : > { %v619_v37 = vpop.permute.xlu2 %618 }
  0xb9   : > { %v521_v34 = vpop.permute.xlu1 %520  ;;  %v673_v52 = vpop.permute.xlu2 %672 }
  0xbb   : > { %v517_v35 = vpop.permute.xlu0 %516 }
  0xc1   : > { %v565_v36 = vpop.permute.xlu1 %564  ;;  %v799_v58 = vpop.permute.xlu2 %798 }
  0xc2   : > { %v571_v38 = vsel %vm570_vm0, %v565_v36, %v567_v30  ;;  %v1019_v30 = vsel %vm1873_vm14, %v1011_v26, 0 }
  0xc3   : > { %v519_v39 = vpop.permute.xlu0 %518  ;;  %585 = vmatpush.bf16.msra.mxu2 %v571_v38 }
  0xc4   : > { %v523_v40 = vsel %vm522_vm2, %v517_v35, %v519_v39  ;;  %v524_v41 = vsel %vm522_vm2, %v519_v39, %v521_v34  ;;  %v1021_v34 = vcvt.s32.f32 %v1019_v30  ;;  %v1022_v35 = vmul.f32 0.0030864198, %v1020_v31 }
  0xc5   : > { %538 = vmatpush.bf16.msra.mxu0 %v523_v40  ;;  %552 = vmatpush.bf16.msra.mxu1 %v524_v41 }
  0xc6   : > { %1398 = vmatmul.msk.bf16.vlgmr.msra.gmra.mxu2 %vm527_vm1, %v1501_v33  ;;  %v1024_v38 = vfloor.f32 %v1022_v35 }
  0xc8   : > { %1392 = vmatmul.msk.bf16.vlgmr.msra.gmra.mxu0 %vm527_vm1, %v1502_v42  ;;  %1393 = vmatmul.msk.bf16.vlgmr.msra.gmra.mxu1 %vm527_vm1, %v1502_v42  ;;  %v1519_v41 = vcvt.f32.s32 %v1024_v38 }
  0xc9   : > { %v617_v48 = vpop.permute.xlu1 %616  ;;  %v853_v1 = vpop.permute.xlu2 %852 }
  0xca   : > { %v622_v49 = vsel %vm620_vm3, %v617_v48, %v619_v37  ;;  %v1023_v37 = vmul.f32 0.0030864198, %v1021_v34  ;;  %v1028_v43 = vmul.u32 324, %v1519_v41 }
  0xcb   : > { %v615_v51 = vpop.permute.xlu0 %614  ;;  %649 = vmatpush.bf16.msrb.mxu1 %v622_v49 }
  0xcc   : > { %v621_v53 = vsel %vm620_vm3, %v615_v51, %v617_v48  ;;  %v1025_v40 = vfloor.f32 %v1023_v37 }
  0xcd   : > { %635 = vmatpush.bf16.msrb.mxu0 %v621_v53 }
  0xce   : > { %v1521_v42 = vcvt.f32.s32 %v1025_v40 }
  0xcf   : > { %758 = vmatpush.bf16.msra.mxu1 %v1429_v47  ;;  %v1030_v47 = vsub.s32 %v1018_v29, %v1028_v43 }
  0xd0   : > { %v1029_v46 = vmul.u32 324, %v1521_v42 }
  0xd1   : > { %744 = vmatpush.bf16.msra.mxu0 %v1425_v50  ;;  %v671_v54 = vpop.permute.xlu1 %670  ;;  %v907_v8 = vpop.permute.xlu2 %906  ;;  %v1476_v49 = vadd.s32 4294966972, %v1030_v47  ;;  %v1034_v51 = vadd.s32 324, %v1030_v47  ;;  %vm1036_vm15 = vcmp.ge.s32.totalorder %v1030_v47, 324  ;;  %vm1032_vm2 = vcmp.lt.s32.totalorder %v1030_v47, 0 }
  0xd2   : > { %v676_v55 = vsel %vm674_vm4, %v671_v54, %v673_v52  ;;  %v1031_v48 = vsub.s32 %v1019_v30, %v1029_v46 }
  0xd3   : > { %v669_v57 = vpop.permute.xlu0 %668  ;;  %703 = vmatpush.bf16.msrb.mxu3 %v676_v55  ;;  %v1040_v55 = vsel %vm1036_vm15, %v1476_v49, %v1030_v47 }
  0xd4   : > { %v675_v59 = vsel %vm674_vm4, %v669_v57, %v671_v54  ;;  %v1035_v52 = vadd.s32 324, %v1031_v48  ;;  %vm1037_vm0 = vcmp.ge.s32.totalorder %v1031_v48, 324  ;;  %vm1033_vm3 = vcmp.lt.s32.totalorder %v1031_v48, 0 }
  0xd5   : > { %689 = vmatpush.bf16.msrb.mxu2 %v675_v59  ;;  %v1477_v54 = vadd.s32 4294966972, %v1031_v48  ;;  %v1042_v57 = vsel %vm1032_vm2, %v1034_v51, %v1040_v55 }
  0xd6   : > { %1415 = vmatmul.msk.bf16.vlgmr.msrb.gmra.mxu3 %vm527_vm1, %v1504_v56 }
  0xd8   : > { %1406 = vmatmul.msk.bf16.vlgmr.msrb.gmra.mxu0 %vm527_vm1, %v1503_v60  ;;  %1407 = vmatmul.msk.bf16.vlgmr.msrb.gmra.mxu1 %vm527_vm1, %v1503_v60 }
  0xd9   : > { %1414 = vmatmul.msk.bf16.vlgmr.msrb.gmra.mxu2 %vm527_vm1, %v1504_v56  ;;  %v797_v61 = vpop.permute.xlu1 %796  ;;  %v961_v13 = vpop.permute.xlu2 %960  ;;  %v1041_v56 = vsel %vm1037_vm0, %v1477_v54, %v1031_v48 }
  0xda   : > { %v802_v62 = vsel %vm800_vm5, %v797_v61, %v799_v58  ;;  %v1043_v60 = vsel %vm1033_vm3, %v1035_v52, %v1041_v56 }
  0xdb   : > { %v795_v63 = vpop.permute.xlu0 %794  ;;  %829 = vmatpush.bf16.msra.mxu3 %v802_v62  ;;  %v1045_v62 = vcvt.s32.f32 %v1043_v60 }
  0xdc   : > { %v801_v0 = vsel %vm800_vm5, %v795_v63, %v797_v61  ;;  %v1044_v61 = vcvt.s32.f32 %v1042_v57 }
  0xdd   : > { %815 = vmatpush.bf16.msra.mxu2 %v801_v0 }
  0xde   : > { %v1046_v63 = vmul.f32 0.055555556, %v1044_v61 }
  0xe1   : > { %v851_v2 = vpop.permute.xlu1 %850 }
  0xe2   : > { %v856_v4 = vsel %vm854_vm6, %v851_v2, %v853_v1  ;;  %v1047_v1 = vmul.f32 0.055555556, %v1045_v62 }
  0xe3   : > { %v849_v5 = vpop.permute.xlu0 %848  ;;  %883 = vmatpush.bf16.msrb.mxu1 %v856_v4 }
  0xe4   : > { %v855_v7 = vsel %vm854_vm6, %v849_v5, %v851_v2 }
  0xe5   : > { %869 = vmatpush.bf16.msrb.mxu0 %v855_v7 }
  0xe6   : > { %1451 = vmatmul.msk.bf16.vlgmr.msra.gmra.mxu3 %vm527_vm1, %v1511_v3 }
  0xe8   : > { %1430 = vmatmul.msk.bf16.vlgmr.msra.gmra.mxu0 %vm527_vm1, %v1507_v6  ;;  %1431 = vmatmul.msk.bf16.vlgmr.msra.gmra.mxu1 %vm527_vm1, %v1507_v6  ;;  %v1049_v6 = vfloor.f32 %v1047_v1 }
  0xe9   : > { %1450 = vmatmul.msk.bf16.vlgmr.msra.gmra.mxu2 %vm527_vm1, %v1511_v3  ;;  %v905_v9 = vpop.permute.xlu1 %904  ;;  %v1048_v3 = vfloor.f32 %v1046_v63 }
  0xea   : > { %v910_v10 = vsel %vm908_vm7, %v905_v9, %v907_v8 }
  0xeb   : > { %v903_v11 = vpop.permute.xlu0 %902  ;;  %937 = vmatpush.bf16.msrb.mxu3 %v910_v10  ;;  %v1523_v7 = vcvt.f32.s32 %v1048_v3 }
  0xec   : > { %v909_v12 = vsel %vm908_vm7, %v903_v11, %v905_v9  ;;  %v1525_v9 = vcvt.f32.s32 %v1049_v6 }
  0xed   : > { %923 = vmatpush.bf16.msrb.mxu2 %v909_v12  ;;  %v1052_v11 = vmul.u32 18, %v1523_v7  ;;  %v1478_v25 = vadd.s32 4294967295, %v1523_v7 }
  0xee   : > { %v1479_v26 = vadd.s32 4294967295, %v1525_v9 }
  0xf1   : > { %v959_v14 = vpop.permute.xlu1 %958 }
  0xf2   : > { %v964_v16 = vsel %vm962_vm8, %v959_v14, %v961_v13 }
  0xf3   : > { %v957_v17 = vpop.permute.xlu0 %956  ;;  %991 = vmatpush.bf16.msra.mxu1 %v964_v16 }
  0xf4   : > { %v963_v19 = vsel %vm962_vm8, %v957_v17, %v959_v14  ;;  %v1053_v14 = vmul.u32 18, %v1525_v9 }
  0xf5   : > { %977 = vmatpush.bf16.msra.mxu0 %v963_v19 }
  0xf6   : > { %1467 = vmatmul.msk.bf16.vlgmr.msrb.gmra.mxu3 %vm527_vm1, %v1513_v15  ;;  %v1055_v16 = vsub.s32 %v1043_v60, %v1053_v14 }
  0xf8   : > { %1458 = vmatmul.msk.bf16.vlgmr.msrb.gmra.mxu0 %vm527_vm1, %v1512_v18  ;;  %1459 = vmatmul.msk.bf16.vlgmr.msrb.gmra.mxu1 %vm527_vm1, %v1512_v18  ;;  %v1062_v18 = vadd.s32 1, %v1523_v7  ;;  %vm1061_vm5 = vcmp.ge.s32.totalorder %v1055_v16, 18  ;;  %vm1057_vm7 = vcmp.lt.s32.totalorder %v1055_v16, 0  ;;  %v1481_v35 = vadd.s32 4294967278, %v1055_v16 }
  0xf9   : > { %1466 = vmatmul.msk.bf16.vlgmr.msrb.gmra.mxu2 %vm527_vm1, %v1513_v15  ;;  %v1054_v15 = vsub.s32 %v1042_v57, %v1052_v11  ;;  %v1069_v46 = vadd.s32 18, %v1055_v16 }
  0xfa   : > { %v1073_v48 = vsel %vm1061_vm5, %v1481_v35, %v1055_v16 }
  0xfb   : > { %vm1060_vm4 = vcmp.ge.s32.totalorder %v1054_v15, 18  ;;  %vm1056_vm6 = vcmp.lt.s32.totalorder %v1054_v15, 0  ;;  %v1480_v31 = vadd.s32 4294967278, %v1054_v15  ;;  %v1068_v41 = vadd.s32 18, %v1054_v15 }
  0xfc   : > { %v1064_v29 = vsel %vm1060_vm4, %v1062_v18, %v1523_v7  ;;  %v1075_v54 = vsel %vm1057_vm7, %v1069_v46, %v1073_v48 }
  0xfd   : > { %v1066_v34 = vsel %vm1056_vm6, %v1478_v25, %v1064_v29  ;;  %v1072_v47 = vsel %vm1060_vm4, %v1480_v31, %v1054_v15  ;;  %vm1085_vm4 = vcmp.ge.s32.totalorder %v1075_v54, 1 }
  0xfe   : > { %vm1076_vm8 = vcmp.ge.s32.totalorder %v1066_v34, 1  ;;  %v1074_v52 = vsel %vm1056_vm6, %v1068_v41, %v1072_v47  ;;  %vm1080_vm11 = vcmp.le.s32.totalorder %v1066_v34, 16  ;;  %vm1089_vm6 = vcmp.le.s32.totalorder %v1075_v54, 16 }
  0xff   : > { %vm1078_vm10 = vmand %vm1869_vm13, %vm1076_vm8  ;;  %vm1084_vm2 = vcmp.ge.s32.totalorder %v1074_v52, 1  ;;  %v1126_v54 = vadd.s32 4294967288, %v1865_v22 }
 0x100   : > { %vm1082_vm0 = vmand %vm1078_vm10, %vm1080_vm11 }
 0x101   : > { %vm1086_vm13 = vmand %vm1082_vm0, %vm1084_vm2 }
 0x108   : > { %1474 = vmatmul.msk.bf16.vlgmr.msra.gmra.mxu0 %vm527_vm1, %v1514_v20  ;;  %1475 = vmatmul.msk.bf16.vlgmr.msra.gmra.mxu1 %vm527_vm1, %v1514_v20  ;;  %v1063_v20 = vadd.s32 1, %v1525_v9 }
 0x10a   : > { %v1065_v30 = vsel %vm1061_vm5, %v1063_v20, %v1525_v9  ;;  %vm1088_vm5 = vcmp.le.s32.totalorder %v1074_v52, 16  ;;  %v1655_v9 = vmov 0.0   ;;  %v1121_v52 = vshrl.u32 %v1006_v21, 7 }
 0x10b   : > { %v1067_v37 = vsel %vm1057_vm7, %v1479_v26, %v1065_v30  ;;  %vm1090_vm7 = vmand %vm1086_vm13, %vm1088_vm5 }
 0x10c   : > { %vm1077_vm9 = vcmp.ge.s32.totalorder %v1067_v37, 1  ;;  %vm1081_vm15 = vcmp.le.s32.totalorder %v1067_v37, 16  ;;  %vm1122_vm10 = vcmp.eq.s32.totalorder %v1121_v52, 0 }
 0x10d   : > { %vm1079_vm12 = vmand %vm1873_vm14, %vm1077_vm9  ;;  %vm1128_vm9 = vcmask 130112  }
 0x10e   : > { %vm1083_vm3 = vmand %vm1079_vm12, %vm1081_vm15 }
 0x10f   : > { %vm1087_vm14 = vmand %vm1083_vm3, %vm1085_vm4 }
 0x110   : > { %vm1091_vm8 = vmand %vm1087_vm14, %vm1089_vm6 }
 0x111   : > { %v1483_v11 = vsel %vm1091_vm8, 1.0, %v1655_v9 }
 0x131   : > { %v1885_v36 = vpop.f32.mrf.mxu3 }
 0x139   : > { %v1893_v50 = vpop.f32.mrf.mxu3 }
 0x145   : > { %v1881_v32 = vpop.f32.mrf.mxu0  ;;  %v1883_v33 = vpop.f32.mrf.mxu1 }
 0x146   : > { %v602_v49 = vadd.f32 %v1885_v36, %v1883_v33 }
 0x149   : > { %v1887_v39 = vpop.f32.mrf.mxu2 }
 0x14a   : > { %v588_v51 = vadd.f32 %v1887_v39, %v1881_v32 }
 0x14d   : > { %v1889_v44 = vpop.f32.mrf.mxu0  ;;  %v1891_v45 = vpop.f32.mrf.mxu1 }
 0x14e   : > { %v604_v28 = vadd.f32 %v1893_v50, %v1891_v45 }
 0x151   : > { %v1895_v53 = vpop.f32.mrf.mxu2 }
 0x155   : > { %v637_v58 = vpop.f32.mrf.mxu0  ;;  %v651_v59 = vpop.f32.mrf.mxu1 }
 0x156   : > { %v656_v55 = vadd.f32 %v637_v58, %v588_v51  ;;  %v657_v56 = vadd.f32 %v651_v59, %v602_v49  ;;  %v590_v58 = vadd.f32 %v1895_v53, %v1889_v44 }
 0x159   : > { %v705_v0 = vpop.f32.mrf.mxu3 }
 0x15a   : > { %v711_v36 = vadd.f32 %v705_v0, %v657_v56 }
 0x15c   : > { %v691_v2 = vpop.f32.mrf.mxu2 }
 0x15d   : > { %v1897_v4 = vpop.f32.mrf.mxu0  ;;  %v1899_v5 = vpop.f32.mrf.mxu1  ;;  %v710_v33 = vadd.f32 %v691_v2, %v656_v55 }
 0x15e   : > { %v658_v63 = vadd.f32 %v1897_v4, %v590_v58  ;;  %v659_v0 = vadd.f32 %v1899_v5, %v604_v28  ;;  %v1482_v5 = vsel %vm1090_vm7, 1.0, %v1655_v9 }
 0x161   : > { %v1901_v8 = vpop.f32.mrf.mxu3 }
 0x162   : > { %v713_v44 = vadd.f32 %v1901_v8, %v659_v0 }
 0x164   : > { %v1903_v10 = vpop.f32.mrf.mxu2 }
 0x165   : > { %v746_v12 = vpop.f32.mrf.mxu0  ;;  %v760_v13 = vpop.f32.mrf.mxu1  ;;  %v712_v45 = vadd.f32 %v1903_v10, %v658_v63 }
 0x166   : > { %v765_v57 = vadd.f32 %v746_v12, %v710_v33  ;;  %v766_v27 = vadd.f32 %v760_v13, %v711_v36 }
 0x169   : > { %v831_v17 = vpop.f32.mrf.mxu3 }
 0x16a   : > { %v837_v62 = vadd.f32 %v831_v17, %v766_v27 }
 0x16c   : > { %v817_v19 = vpop.f32.mrf.mxu2 }
 0x16d   : > { %v1905_v23 = vpop.f32.mrf.mxu0  ;;  %v1907_v24 = vpop.f32.mrf.mxu1  ;;  %v836_v61 = vadd.f32 %v817_v19, %v765_v57 }
 0x16e   : > { %v767_v3 = vadd.f32 %v1905_v23, %v712_v45  ;;  %v768_v6 = vadd.f32 %v1907_v24, %v713_v44 }
 0x171   : > { %v833_v40 = vpop.f32.mrf.mxu3 }
 0x172   : > { %v839_v15 = vadd.f32 %v833_v40, %v768_v6 }
 0x174   : > { %v819_v38 = vpop.f32.mrf.mxu2 }
 0x175   : > { %v871_v42 = vpop.f32.mrf.mxu0  ;;  %v885_v43 = vpop.f32.mrf.mxu1  ;;  %v838_v14 = vadd.f32 %v819_v38, %v767_v3 }
 0x176   : > { %v890_v1 = vadd.f32 %v871_v42, %v836_v61  ;;  %v891_v2 = vadd.f32 %v885_v43, %v837_v62 }
 0x179   : > { %v939_v60 = vpop.f32.mrf.mxu3 }
 0x17a   : > { %v945_v53 = vadd.f32 %v939_v60, %v891_v2 }
 0x17c   : > { %v925_v59 = vpop.f32.mrf.mxu2 }
 0x17d   : > { %v873_v32 = vpop.f32.mrf.mxu0  ;;  %v887_v39 = vpop.f32.mrf.mxu1  ;;  %v944_v50 = vadd.f32 %v925_v59, %v890_v1 }
 0x17e   : > { %v892_v18 = vadd.f32 %v873_v32, %v838_v14  ;;  %v893_v23 = vadd.f32 %v887_v39, %v839_v15 }
 0x181   : > { %v941_v20 = vpop.f32.mrf.mxu3 }
 0x182   : > { %v947_v30 = vadd.f32 %v941_v20, %v893_v23 }
 0x184   : > { %v927_v19 = vpop.f32.mrf.mxu2 }
 0x185   : > { %v979_v7 = vpop.f32.mrf.mxu0  ;;  %v993_v4 = vpop.f32.mrf.mxu1  ;;  %v946_v29 = vadd.f32 %v927_v19, %v892_v18 }
 0x186   : > { %v998_v12 = vadd.f32 %v979_v7, %v944_v50  ;;  %v999_v13 = vadd.f32 %v993_v4, %v945_v53 }
 0x188   : > { %1002 = vst [vmem:[%s1937_s23] sm:$0xff] %v998_v12  ;;  %v1106_v8 = vmul.f32 %v998_v12, %v998_v12  ;;  %v1107_v10 = vmul.f32 %v999_v13, %v999_v13  ;;  %v1096_v16 = vmul.f32 %v1482_v5, %v998_v12  ;;  %v1097_v17 = vmul.f32 %v1483_v11, %v999_v13 }
 0x189   : > { %1003 = vst [vmem:[%s1937_s23 + $0x8] sm:$0xff] %v999_v13 }
 0x18a   : > { %v1100_v24 = vadd.f32 %v1097_v17, %v1096_v16  ;;  %v1110_v25 = vmul.f32 %v1482_v5, %v1106_v8  ;;  %v1111_v26 = vmul.f32 %v1483_v11, %v1107_v10 }
 0x18c   : > { %1101 = vadd.xlane.f32.xlu0 %v1100_v24  ;;  %v1114_v31 = vadd.f32 %v1111_v26, %v1110_v25 }
 0x18d   : > { %v981_v34 = vpop.f32.mrf.mxu0  ;;  %v995_v35 = vpop.f32.mrf.mxu1 }
 0x18e   : > { %v1000_v37 = vadd.f32 %v981_v34, %v946_v29  ;;  %v1001_v38 = vadd.f32 %v995_v35, %v947_v30  ;;  %1115 = vadd.xlane.f32.xlu2 %v1114_v31 }
 0x190   : > { %1004 = vst [vmem:[%s1937_s23 + $0x10] sm:$0xff] %v1000_v37  ;;  %v1108_v40 = vmul.f32 %v1000_v37, %v1000_v37  ;;  %v1109_v41 = vmul.f32 %v1001_v38, %v1001_v38  ;;  %v1098_v42 = vmul.f32 %v1482_v5, %v1000_v37  ;;  %v1099_v43 = vmul.f32 %v1483_v11, %v1001_v38  ;;  %v1191_v59 = vld [vmem:[%s1937_s23 + $0x8] sm:$0xff] (%p1780_p0) }
 0x191   : > { %1005 = vst [vmem:[%s1937_s23 + $0x18] sm:$0xff] %v1001_v38 }
 0x192   : > { %v1103_v46 = vadd.f32 %v1099_v43, %v1098_v42  ;;  %v1112_v47 = vmul.f32 %v1482_v5, %v1108_v40  ;;  %v1113_v48 = vmul.f32 %v1483_v11, %v1109_v41  ;;  %1192 = vst [vmem:[%s1176_s21 + $0x8] sm:$0xff] (%p1780_p0), %v1191_v59 }
 0x194   : > { %1104 = vadd.xlane.f32.xlu1 %v1103_v46  ;;  %v1117_v49 = vadd.f32 %v1113_v48, %v1112_v47 }
 0x196   : > { %1118 = vadd.xlane.f32.xlu2 %v1117_v49 }
 0x197   : > { %v1193_v60 = vld [vmem:[%s1937_s23 + $0x10] sm:$0xff] (%p1780_p0) }
 0x198   : > { %v1195_v61 = vld [vmem:[%s1937_s23 + $0x18] sm:$0xff] (%p1780_p0)  ;;  %1194 = vst [vmem:[%s1176_s21 + $0x30] sm:$0xff] (%p1780_p0), %v1193_v60 }
 0x199   : > { %1196 = vst [vmem:[%s1176_s21 + $0x38] sm:$0xff] (%p1780_p0), %v1195_v61 }
 0x1ff   : > { %v1102_v55 = vpop.xlane.xlu0 %1101 }
 0x200   : > { %v1125_v33 = vperm.slane %v1102_v55, %v1865_v22 }
 0x201   : > { %v1116_v51 = vpop.xlane.xlu2 %1115 }
 0x202   : > { %v1147_v39 = vperm.slane %v1116_v51, %v1865_v22  ;;  %v1189_v22 = vld [vmem:[%s1937_s23] sm:$0xff] (%p1780_p0) }
 0x203   : > { %1190 = vst [vmem:[%s1176_s21] sm:$0xff] (%p1780_p0), %v1189_v22 }
 0x207   : > { %v1105_v56 = vpop.xlane.xlu1 %1104 }
 0x208   : > { %v1127_v36 = vperm.slane %v1105_v56, %v1126_v54 }
 0x209   : > { %v1119_v32 = vpop.xlane.xlu2 %1118 }
 0x20a   : > { %v1129_v57 = vsel %vm1128_vm9, %v1127_v36, %v1125_v33  ;;  %v1148_v27 = vperm.slane %v1119_v32, %v1126_v54  ;;  %1173 = sbr.rel (!%p1780_p0) target bundleno = 527 (0x20f), region = 160 }
 0x20b   : > { %v1143_v21 = vsel %vm1122_vm10, %v1129_v57, 0.0 }
 0x20c   : > { %1144 = vst.msk [vmem:[%s470_s25] sm:$0xff] %vm527_vm1, %v1143_v21  ;;  %v1149_v28 = vsel %vm1128_vm9, %v1148_v27, %v1147_v39 }
 0x20d   : > { %v1157_v58 = vsel %vm1122_vm10, %v1149_v28, 0.0 }
 0x20e   : > { %1158 = vst.msk [vmem:[%s474_s14] sm:$0xff] %vm527_vm1, %v1157_v58 }
 0x20f PF: > { %s2011_s27 = sld [smem:[#allocation8_spill]]  ;;  %s2015_s21 = smov %s1625_s22 }
 0x210   : > { %s2012_s20 = sld [smem:[#allocation10_spill]]  ;;  %s2016_s22 = smov %s1787_s9 }
 0x211   : > { %s2013_s25 = sld [smem:[#allocation7_spill]]  ;;  %s2017_s23 = smov %s1633_s24 }
 0x212   : > { %s2014_s26 = sld [smem:[#allocation9_spill]] }
 0x215   : > { %p14_p7 = scmp.ge.s32.totalorder %s2011_s27, 5  }
 0x216   : > { %s2018_s24 = smov %s2012_s20 }
 0x217   :  { %16 = sbr.rel (!%p14_p7) target bundleno = 4 (0x4), region = 262 }

// kernel: double_conv.4
= control target key start
LH: loop header
LB: loop body
LE: loop exit
PB: predicated region body
PF: predicated region fallthrough
CT: control target
= control target key end

     0   :  { %s2288_s0 = inlined_call_operand.vmem [shape: f32[16,768], index: 0, kind: input, shape index: {}, may-alias: {0,1,2}]   ;;  %s2289_s1 = inlined_call_operand.vmem [shape: f32[16,768], index: 1, kind: input, shape index: {}, may-alias: {0,1,2}]   ;;  %s2290_s2 = inlined_call_operand.vmem [shape: f32[16,768], index: 2, kind: input, shape index: {}, may-alias: {0,1,2}]   ;;  %s2291_s3 = inlined_call_operand.vmem [shape: f32[16,1], index: 3, kind: input, shape index: {}]   ;;  %s2292_s4 = inlined_call_operand.vmem [shape: f32[16,1], index: 4, kind: input, shape index: {}]   ;;  %s2293_s5 = inlined_call_operand.vmem [shape: bf16[9,16,16], index: 5, kind: input, shape index: {}]   ;;  %s2294_s6 = inlined_call_operand.vmem [shape: f32[16,768], index: 6, kind: output, shape index: {0}]   ;;  %s2295_s7 = inlined_call_operand.vmem [shape: f32[3,8,16], index: 7, kind: output, shape index: {1}]   ;;  %s2296_s8 = inlined_call_operand.vmem [shape: f32[3,8,16], index: 8, kind: output, shape index: {2}]  }
   0x1   :  { %2301 = sst [smem:[#allocation12_spill]] %s2294_s6 }
   0x2   :  { %s1949_s27 = smov 0   ;;  %s1951_s28 = smov 0  }
   0x3   :  { %s1953_s29 = smov 0   ;;  %s1955_s30 = smov 0  }
   0x4   :  { %s1957_s9 = smov 0   ;;  %s1959_s10 = smov 0  }
   0x5   :  { %s1961_s11 = smov 0  }
   0x6 LB: > { %2302 = sst [smem:[#allocation7_spill]] %s1888_s10  ;;  %s1985_s12 = sadd.s32 1, %s1892_s11   ;;  %s1892_s11 = sphi %s1961_s11, %s2327_s11   ;;  %s1888_s10 = sphi %s1959_s10, %s2330_s10   ;;  %s1884_s9 = sphi %s1957_s9, %s2329_s9   ;;  %s1880_s30 = sphi %s1955_s30, %s2334_s30   ;;  %s1876_s29 = sphi %s1953_s29, %s2333_s29   ;;  %s1872_s28 = sphi %s1951_s28, %s2332_s28   ;;  %s1868_s27 = sphi %s1949_s27, %s2331_s27  }
   0x7   : > { %2303 = sst [smem:[#allocation8_spill]] %s1985_s12  ;;  %s1576_s13 = sshll.u32 %s1892_s11, 1 }
   0x8   : > { %s34_s14 = sadd.s32 1, %s1888_s10  ;;  %s1577_s15 = sadd.s32 4294967295, %s1576_s13 }
   0x9   : > { %s1725_s16 = sadd.s32 2, %s1576_s13  ;;  %p25_p0 = scmp.gt.s32.totalorder %s1577_s15, 0 }
   0xa   : > { %s1579_s17 = sadd.s32 4294967295, %s1725_s16  ;;  %p41_p2 = scmp.ne.s32.totalorder %s1888_s10, %s1884_s9 }
   0xb   : > { %p29_p1 = scmp.gt.s32.totalorder %s1579_s17, 0  ;;  %s2336_s15 = smov (!%p25_p0, %s1577_s15), 0 }
   0xc   : > { %p42_p3 = scmp.eq.s32.totalorder %s1892_s11, 0  ;;  %s57_s18 = ssub.s32 %s1892_s11, %s1985_s12 }
   0xd   : > { %s2338_s17 = smov (!%p29_p1, %s1579_s17), 0  ;;  %p58_p4 = scmp.eq.s32.totalorder %s57_s18, 0 }
   0xe   : > { %s31_s19 = ssub.s32 %s2336_s15, %s2338_s17  ;;  %p1999_p6 = por %p42_p3, %p41_p2 }
   0xf   : > { %p32_p5 = scmp.eq.s32.totalorder %s31_s19, 0  ;;  %s60_s21 = sadd.s32 1, %s1880_s30 }
  0x10   : > { %p67_p7 = scmp.ne.s32.totalorder %s1880_s30, %s1876_s29  ;;  %p85_p9 = scmp.lt.s32.totalorder %s1725_s16, 5 }
  0x11   : > { %s2007_s22 = scalar_select %p32_p5, %s1888_s10, %s34_s14  }
  0x12   : > { %s2010_s23 = scalar_select %p58_p4, %s1880_s30, %s60_s21  }
  0x13   : > { %2305 = sst [smem:[#allocation9_spill]] %s2007_s22  ;;  %p2017_p8 = por %p67_p7, %p42_p3 }
  0x14   : > { %2306 = sst [smem:[#allocation10_spill]] %s2010_s23  ;;  %s2022_s25 = sadd.s32 4294967295, %s1892_s11  }
  0x15   : > { %s1729_s26 = sadd.s32 2, %s1725_s16  ;;  %s2340_s16 = smov (!%p85_p9, %s1725_s16), 5 }
  0x16   : > { %p89_p10 = scmp.lt.s32.totalorder %s1729_s26, 5  ;;  %p101_p11 = scmp.ne.s32.totalorder %s1872_s28, %s1868_s27 }
  0x17   : > { %p194_p12 = scmp.eq.s32.totalorder %s2022_s25, 2  ;;  %s94_s18 = sadd.s32 1, %s1872_s28 }
  0x18   : > { %s2342_s26 = smov (!%p89_p10, %s1729_s26), 5  ;;  %p2031_p13 = por %p101_p11, %p42_p3 }
  0x19   : > { %p2038_p0 = por %p194_p12, %p67_p7  ;;  %s91_s17 = ssub.s32 %s2340_s16, %s2342_s26 }
  0x1a   : > { %p92_p1 = scmp.eq.s32.totalorder %s91_s17, 0  ;;  %p1583_p2 = scmp.ge.s32.totalorder %s1892_s11, 3 }
  0x1b   : > { %s2309_s14 = scalar_select %p2038_p0, 1, 0 }
  0x1c   : > { %s2045_s19 = scalar_select %p92_p1, %s1872_s28, %s94_s18  }
  0x1d   : > { %2310 = sst [smem:[#allocation11_spill]] %s2309_s14  ;;  %277 = sbr.rel (%p1583_p2) target bundleno = 54 (0x36), region = 28 }
  0x22   : > { %280 = sbr.rel (!%p1999_p6) target bundleno = 40 (0x28), region = 32  ;;  %s282_s21 = sand.u32 (%p1999_p6), 1, %s1888_s10  }
  0x23   : > { %s1587_s22 = sshll.u32 (%p1999_p6), %s2336_s15, 3  ;;  %s1584_s23 = sshll.u32 (%p1999_p6), %s282_s21, 4 }
  0x24   : > { %s290_s14 = scalar_lea.vmem (%p1999_p6), %s2288_s0, %s1587_s22  ;;  %s284_s26 = scalar_lea.vmem (%p1999_p6), [#allocation3], %s1584_s23 }
  0x25   : > { %v321_v0 = vld [vmem:[%s290_s14] sm:$0xff] (%p1999_p6)  ;;  %v323_v1 = vld [vmem:[%s290_s14 + $0x30] sm:$0xff] (%p1999_p6) }
  0x26   : > { %322 = vst [vmem:[%s284_s26] sm:$0xff] (%p1999_p6), %v321_v0 }
  0x27   : > { %324 = vst [vmem:[%s284_s26 + $0x8] sm:$0xff] %v323_v1 }
  0x28 PF: > { %330 = sbr.rel (!%p2017_p8) target bundleno = 48 (0x30), region = 70  ;;  %s332_s20 = sand.u32 (%p2017_p8), 1, %s1880_s30  }
  0x29   : > { %s1730_s17 = sshll.u32 (%p2017_p8), %s1892_s11, 4  ;;  %s1588_s18 = sshll.u32 (%p2017_p8), %s332_s20, 5 }
  0x2a   : > { %s337_s10 = scalar_lea.vmem (%p2017_p8), %s2289_s1, %s1730_s17  ;;  %s334_s6 = scalar_lea.vmem (%p2017_p8), [#allocation4], %s1588_s18 }
  0x2b   : > { %v350_v2 = vld [vmem:[%s337_s10] sm:$0xff] (%p2017_p8)  ;;  %v352_v3 = vld [vmem:[%s337_s10 + $0x8] sm:$0xff] (%p2017_p8)  ;;  %v354_v4 = vld [vmem:[%s337_s10 + $0x30] sm:$0xff] (%p2017_p8) }
  0x2c   : > { %351 = vst [vmem:[%s334_s6] sm:$0xff] (%p2017_p8), %v350_v2  ;;  %v356_v5 = vld [vmem:[%s337_s10 + $0x38] sm:$0xff] (%p2017_p8) }
  0x2d   : > { %353 = vst [vmem:[%s334_s6 + $0x8] sm:$0xff] %v352_v3 }
  0x2e   : > { %355 = vst [vmem:[%s334_s6 + $0x10] sm:$0xff] %v354_v4 }
  0x2f   : > { %357 = vst [vmem:[%s334_s6 + $0x18] sm:$0xff] %v356_v5 }
  0x30 PF: > { %363 = sbr.rel (!%p2031_p13) target bundleno = 54 (0x36), region = 93  ;;  %s365_s12 = sand.u32 (%p2031_p13), 1, %s1872_s28  }
  0x31   : > { %s1593_s22 = sshll.u32 (%p2031_p13), %s2340_s16, 3  ;;  %s1591_s23 = sshll.u32 (%p2031_p13), %s365_s12, 4 }
  0x32   : > { %s373_s26 = scalar_lea.vmem (%p2031_p13), %s2290_s2, %s1593_s22  ;;  %s367_s20 = scalar_lea.vmem (%p2031_p13), [#allocation5], %s1591_s23 }
  0x33   : > { %v404_v6 = vld [vmem:[%s373_s26] sm:$0xff] (%p2031_p13)  ;;  %v406_v7 = vld [vmem:[%s373_s26 + $0x30] sm:$0xff] (%p2031_p13) }
  0x34   : > { %405 = vst [vmem:[%s367_s20] sm:$0xff] (%p2031_p13), %v404_v6 }
  0x35   : > { %407 = vst [vmem:[%s367_s20 + $0x8] sm:$0xff] %v406_v7 }
  0x36 PF: > { %p1594_p3 = scmp.ge.s32.totalorder %s1892_s11, 1  ;;  %p412_p4 = scmp.lt.s32.totalorder %s1892_s11, 4 }
  0x38   : > { %p413_p5 = pnand %p1594_p3, %p412_p4 }
  0x39   : > { %s2087_s6 = sshll.u32 (!%p413_p5), %s2022_s25, 8  ;;  %s419_s23 = sand.u32 (!%p413_p5), 1, %s1884_s9  }
  0x3a   : > { %416 = sbr.rel (%p413_p5) target bundleno = 660 (0x294), region = 131  ;;  %s1602_s12 = sadd.s32 (!%p413_p5), 4294967168, %s2087_s6 }
  0x3b   : > { %s722_s22 = sadd.s32 (!%p413_p5), 256, %s2087_s6  ;;  %s2129_s24 = sshll.u32 (!%p413_p5), %s419_s23, 4 }
  0x3c   : > { %s421_s9 = scalar_lea.vmem (!%p413_p5), [#allocation3], %s2129_s24  ;;  %s426_s14 = sand.u32 (!%p413_p5), 1, %s1876_s29  }
  0x3d   : > { %s2148_s26 = sshll.u32 (!%p413_p5), %s426_s14, 5  ;;  %s433_s29 = sand.u32 (!%p413_p5), 1, %s1868_s27  }
  0x3e   : > { %s428_s20 = scalar_lea.vmem (!%p413_p5), [#allocation4], %s2148_s26  ;;  %s2168_s10 = sshll.u32 (!%p413_p5), %s433_s29, 4 }
  0x3f   : > { %v590_v8 = vld [vmem:[%s2291_s3] sm:$0xff]  ;;  %v1894_v9 = vmov 0   ;;  %v591_v11 = vld [vmem:[%s2291_s3 + $0x8] sm:$0xff]  ;;  %v534_v13 = vlaneseq  ;;  %v536_v15 = vstv %s1602_s12  ;;  %v627_v25 = vstv %s2087_s6  ;;  %s435_s27 = scalar_lea.vmem [#allocation5], %s2168_s10  ;;  %s1895_s16 = smov 18  }
  0x40   : > { %1836 = vset.pattern.permute.xlu1 %v1894_v9  ;;  %1835 = vset.pattern.permute.xlu0 %v1894_v9  ;;  %v518_v10 = vld [vmem:[%s2292_s4] sm:$0xff]  ;;  %v519_v12 = vld [vmem:[%s2292_s4 + $0x8] sm:$0xff]  ;;  %v755_v42 = vstv %s722_s22  ;;  %s1896_s13 = smov 19   ;;  %s1897_s17 = smov 17  }
  0x41   : > { %594 = vperm.xlu1 %1836, %v590_v8   ;;  %508 = vperm.xlu0 %1835, %v590_v8   ;;  %v2091_v14 = vand.u32 127, %v534_v13  ;;  %s1898_s11 = smov 1   ;;  %s1899_s18 = smov 127  }
  0x42   : > { %1837 = vset.pattern.permute.xlu2 %v1894_v9  ;;  %s1900_s15 = smov 111   ;;  %s1901_s21 = smov 110  }
  0x43   : > { %522 = vperm.xlu2 %1837, %v518_v10   ;;  %v537_v16 = vadd.s32 %v536_v15, %v2091_v14  ;;  %v626_v23 = vadd.s32 128, %v2091_v14  ;;  %v628_v26 = vadd.s32 %v627_v25, %v2091_v14  ;;  %v756_v44 = vadd.s32 %v755_v42, %v2091_v14  ;;  %s1902_s6 = smov 109   ;;  %s2236_s12 = scalar_lea.vmem [#allocation6], %s2148_s26 }
  0x44   : > { %p491_p6 = scmp.lt.s32.totalorder %s2022_s25, 2 }
  0x45   : > { %vm538_vm0 = vcmp.ge.s32.totalorder %v537_v16, 0  ;;  %vm539_vm1 = vcmp.lt.s32.totalorder %v537_v16, 648  ;;  %v629_v27 = vadd.s32 %v627_v25, %v626_v23  ;;  %vm630_vm3 = vcmp.ge.s32.totalorder %v628_v26, 0 }
  0x46   : > { %vm2094_vm2 = vmand %vm538_vm0, %vm539_vm1  ;;  %vm632_vm5 = vcmp.lt.s32.totalorder %v628_v26, 648  ;;  %vm757_vm11 = vcmp.ge.s32.totalorder %v756_v44, 0  ;;  %vm758_vm12 = vcmp.lt.s32.totalorder %v756_v44, 648  ;;  %s492_s26 = scalar_select %p491_p6, %s2022_s25, 2 }
  0x47   : > { %v541_v18 = vsel %vm2094_vm2, %v537_v16, 0  ;;  %vm631_vm4 = vcmp.ge.s32.totalorder %v629_v27, 0  ;;  %vm633_vm6 = vcmp.lt.s32.totalorder %v629_v27, 648  ;;  %vm2103_vm7 = vmand %vm630_vm3, %vm632_vm5 }
  0x48   : > { %v542_v19 = vcvt.s32.f32 %v541_v18  ;;  %vm2107_vm9 = vmand %vm631_vm4, %vm633_vm6  ;;  %v636_v33 = vsel %vm2103_vm7, %v628_v26, 0  ;;  %s1599_s22 = sshll.u32 %s492_s26, 3 }
  0x49   : > { %599 = vperm.xlu1 %1836, %v591_v11   ;;  %513 = vperm.xlu0 %1835, %v591_v11   ;;  %v637_v35 = vsel %vm2107_vm9, %v629_v27, 0  ;;  %v638_v36 = vcvt.s32.f32 %v636_v33  ;;  %vm2117_vm13 = vmand %vm757_vm11, %vm758_vm12 }
  0x4a   : > { %v543_v20 = vmul.f32 0.0030864198, %v542_v19  ;;  %v639_v38 = vcvt.s32.f32 %v637_v35  ;;  %v760_v51 = vsel %vm2117_vm13, %v756_v44, 0 }
  0x4b   : > { %527 = vperm.xlu2 %1837, %v519_v12   ;;  %v640_v40 = vmul.f32 0.0030864198, %v638_v36  ;;  %v761_v54 = vcvt.s32.f32 %v760_v51 }
  0x4c   : > { %v544_v21 = vfloor.f32 %v543_v20  ;;  %v641_v41 = vmul.f32 0.0030864198, %v639_v38 }
  0x4d   : > { %v642_v43 = vfloor.f32 %v640_v40  ;;  %v762_v60 = vmul.f32 0.0030864198, %v761_v54 }
  0x4e   : > { %v1754_v22 = vcvt.f32.s32 %v544_v21  ;;  %v643_v46 = vfloor.f32 %v641_v41 }
  0x4f   : > { %v1758_v47 = vcvt.f32.s32 %v642_v43  ;;  %v763_v2 = vfloor.f32 %v762_v60 }
  0x50   : > { %v546_v24 = vmul.u32 324, %v1754_v22  ;;  %v1760_v48 = vcvt.f32.s32 %v643_v46 }
  0x51   : > { %615 = vperm.xlu1 %1836, %v519_v12   ;;  %610 = vperm.xlu0 %1835, %v518_v10   ;;  %v646_v50 = vmul.u32 324, %v1758_v47  ;;  %v1766_v6 = vcvt.f32.s32 %v763_v2 }
  0x52   : > { %v547_v28 = vsub.s32 %v541_v18, %v546_v24  ;;  %v647_v53 = vmul.u32 324, %v1760_v48 }
  0x53   : > { %729 = vperm.xlu2 %1837, %v590_v8   ;;  %v648_v55 = vsub.s32 %v636_v33, %v646_v50 }
  0x54   : > { %v1603_v29 = vadd.s32 4294966972, %v547_v28  ;;  %v549_v31 = vadd.s32 324, %v547_v28  ;;  %vm550_vm8 = vcmp.ge.s32.totalorder %v547_v28, 324  ;;  %vm548_vm10 = vcmp.lt.s32.totalorder %v547_v28, 0 }
  0x55   : > { %v649_v56 = vsub.s32 %v637_v35, %v647_v53  ;;  %v1606_v57 = vadd.s32 4294966972, %v648_v55  ;;  %v652_v59 = vadd.s32 324, %v648_v55  ;;  %vm654_vm14 = vcmp.ge.s32.totalorder %v648_v55, 324 }
  0x56   : > { %v552_v34 = vsel %vm550_vm8, %v1603_v29, %v547_v28  ;;  %vm650_vm15 = vcmp.lt.s32.totalorder %v648_v55, 0 }
  0x57   : > { %v553_v37 = vsel %vm548_vm10, %v549_v31, %v552_v34  ;;  %v653_v61 = vadd.s32 324, %v649_v56  ;;  %vm655_vm0 = vcmp.ge.s32.totalorder %v649_v56, 324  ;;  %vm651_vm1 = vcmp.lt.s32.totalorder %v649_v56, 0 }
  0x58   : > { %v554_v39 = vcvt.s32.f32 %v553_v37  ;;  %v1607_v62 = vadd.s32 4294966972, %v649_v56  ;;  %v658_v63 = vsel %vm654_vm14, %v1606_v57, %v648_v55 }
  0x59   : > { %743 = vperm.xlu1 %1836, %v518_v10   ;;  %734 = vperm.xlu0 %1835, %v591_v11   ;;  %v660_v1 = vsel %vm650_vm15, %v652_v59, %v658_v63  ;;  %v765_v11 = vmul.u32 324, %v1766_v6  ;;  %v502_v59 = vld [vmem:[%s421_s9] sm:$0xff] }
  0x5a   : > { %v555_v45 = vmul.f32 0.055555556, %v554_v39  ;;  %v659_v3 = vsel %vm655_vm0, %v1607_v62, %v649_v56  ;;  %v662_v4 = vcvt.s32.f32 %v660_v1 }
  0x5b   : > { %748 = vperm.xlu2 %1837, %v519_v12   ;;  %v661_v5 = vsel %vm651_vm1, %v653_v61, %v659_v3  ;;  %v766_v16 = vsub.s32 %v760_v51, %v765_v11 }
  0x5c   : > { %v556_v52 = vfloor.f32 %v555_v45  ;;  %v663_v7 = vcvt.s32.f32 %v661_v5  ;;  %v664_v8 = vmul.f32 0.055555556, %v662_v4 }
  0x5d   : > { %vm769_vm4 = vcmp.ge.s32.totalorder %v766_v16, 324  ;;  %v1612_v22 = vadd.s32 4294966972, %v766_v16  ;;  %v768_v24 = vadd.s32 324, %v766_v16  ;;  %vm767_vm6 = vcmp.lt.s32.totalorder %v766_v16, 0 }
  0x5e   : > { %v1756_v58 = vcvt.f32.s32 %v556_v52  ;;  %v665_v12 = vmul.f32 0.055555556, %v663_v7  ;;  %v666_v15 = vfloor.f32 %v664_v8 }
  0x5f   : > { %v771_v28 = vsel %vm769_vm4, %v1612_v22, %v766_v16 }
  0x60   : > { %v558_v0 = vmul.u32 18, %v1756_v58  ;;  %v563_v18 = vadd.s32 1, %v1756_v58  ;;  %v667_v19 = vfloor.f32 %v665_v12  ;;  %v1762_v20 = vcvt.f32.s32 %v666_v15 }
  0x61   : > { %v1604_v23 = vadd.s32 4294967295, %v1756_v58  ;;  %v772_v33 = vsel %vm767_vm6, %v768_v24, %v771_v28  ;;  %v589_v28 = vld [vmem:[%s428_s20 + $0x18] sm:$0xff] }
  0x62   : > { %v559_v10 = vsub.s32 %v553_v37, %v558_v0  ;;  %v1764_v21 = vcvt.f32.s32 %v667_v19  ;;  %v670_v27 = vmul.u32 18, %v1762_v20  ;;  %v773_v38 = vcvt.s32.f32 %v772_v33 }
  0x63   : > { %v680_v40 = vadd.s32 1, %v1762_v20  ;;  %v1608_v44 = vadd.s32 4294967295, %v1762_v20 }
  0x64   : > { %vm562_vm3 = vcmp.ge.s32.totalorder %v559_v10, 18  ;;  %vm560_vm5 = vcmp.lt.s32.totalorder %v559_v10, 0  ;;  %v1605_v26 = vadd.s32 4294967278, %v559_v10  ;;  %v671_v29 = vmul.u32 18, %v1764_v21 }
  0x65   : > { %v564_v25 = vsel %vm562_vm3, %v563_v18, %v1756_v58  ;;  %v566_v34 = vadd.s32 18, %v559_v10  ;;  %v672_v36 = vsub.s32 %v660_v1, %v670_v27  ;;  %v774_v41 = vmul.f32 0.055555556, %v773_v38  ;;  %v588_v27 = vld [vmem:[%s428_s20 + $0x10] sm:$0xff] }
  0x66   : > { %v565_v31 = vsel %vm560_vm5, %v1604_v23, %v564_v25  ;;  %v568_v35 = vsel %vm562_vm3, %v1605_v26, %v559_v10  ;;  %v673_v37 = vsub.s32 %v661_v5, %v671_v29  ;;  %v681_v42 = vadd.s32 1, %v1764_v21  ;;  %v503_v10 = vld [vmem:[%s421_s9 + $0x8] sm:$0xff]  ;;  %v586_v23 = vld [vmem:[%s428_s20] sm:$0xff]  ;;  %s494_s9 = scalar_lea.vmem %s2295_s7, %s1599_s22 }
  0x67   : > { %vm570_vm8 = vcmp.ge.s32.totalorder %v565_v31, 1  ;;  %v569_v39 = vsel %vm560_vm5, %v566_v34, %v568_v35  ;;  %vm572_vm11 = vcmp.le.s32.totalorder %v565_v31, 16  ;;  %vm678_vm12 = vcmp.ge.s32.totalorder %v672_v36, 18  ;;  %v587_v26 = vld [vmem:[%s428_s20 + $0x8] sm:$0xff]  ;;  %s498_s20 = scalar_lea.vmem %s2296_s8, %s1599_s22 }
  0x68   : > { %vm571_vm10 = vmand %vm2094_vm2, %vm570_vm8  ;;  %vm679_vm14 = vcmp.ge.s32.totalorder %v673_v37, 18  ;;  %v775_v43 = vfloor.f32 %v774_v41  ;;  %vm574_vm15 = vcmp.ge.s32.totalorder %v569_v39, 1  ;;  %vm674_vm1 = vcmp.lt.s32.totalorder %v672_v36, 0 }
  0x69   : > { %vm573_vm0 = vmand %vm571_vm10, %vm572_vm11  ;;  %v1609_v45 = vadd.s32 4294967295, %v1764_v21  ;;  %v682_v46 = vsel %vm678_vm12, %v680_v40, %v1762_v20  ;;  %vm675_vm3 = vcmp.lt.s32.totalorder %v673_v37, 0  ;;  %v683_v17 = vsel %vm679_vm14, %v681_v42, %v1764_v21 }
  0x6a   : > { %v1768_v47 = vcvt.f32.s32 %v775_v43  ;;  %v1610_v48 = vadd.s32 4294967278, %v672_v36  ;;  %vm575_vm2 = vmand %vm573_vm0, %vm574_vm15  ;;  %vm576_vm4 = vcmp.le.s32.totalorder %v569_v39, 16  ;;  %v684_v51 = vsel %vm674_vm1, %v1608_v44, %v682_v46 }
  0x6b   : > { %v1611_v52 = vadd.s32 4294967278, %v673_v37  ;;  %v685_v54 = vsel %vm675_vm3, %v1609_v45, %v683_v17  ;;  %v686_v56 = vadd.s32 18, %v672_v36  ;;  %vm577_vm5 = vmand %vm575_vm2, %vm576_vm4  ;;  %v687_v57 = vadd.s32 18, %v673_v37 }
  0x6c   : > { %v777_v50 = vmul.u32 18, %v1768_v47  ;;  %v690_v58 = vsel %vm678_vm12, %v1610_v48, %v672_v36  ;;  %vm694_vm6 = vcmp.ge.s32.totalorder %v684_v51, 1  ;;  %vm695_vm8 = vcmp.ge.s32.totalorder %v685_v54, 1 }
  0x6d   : > { %v691_v60 = vsel %vm679_vm14, %v1611_v52, %v673_v37  ;;  %v782_v61 = vadd.s32 1, %v1768_v47  ;;  %v578_v0 = vsel %vm577_vm5, 1, %v1894_v9  ;;  %v692_v1 = vsel %vm674_vm1, %v686_v56, %v690_v58  ;;  %vm696_vm11 = vmand %vm2103_vm7, %vm694_vm6  ;;  %v724_v58 = vld [vmem:[%s435_s27 + $0x8] sm:$0xff] }
  0x6e   : > { %v778_v55 = vsub.s32 %v772_v33, %v777_v50  ;;  %vm698_vm12 = vcmp.le.s32.totalorder %v684_v51, 16  ;;  %v693_v3 = vsel %vm675_vm3, %v687_v57, %v691_v60  ;;  %vm697_vm15 = vmand %vm2107_vm9, %vm695_vm8  ;;  %vm699_vm14 = vcmp.le.s32.totalorder %v685_v54, 16  ;;  %v723_v51 = vld [vmem:[%s435_s27] sm:$0xff]  ;;  %s1750_s27 = sshll.u32 (%p2038_p0), %s2022_s25, 4 }
  0x6f   : > { %v1613_v4 = vadd.s32 4294967295, %v1768_v47  ;;  %vm700_vm2 = vmand %vm696_vm11, %vm698_vm12  ;;  %vm702_vm1 = vcmp.ge.s32.totalorder %v692_v1, 1  ;;  %vm579_vm4 = vcmp.eq.s32.totalorder %v578_v0, 1  ;;  %vm703_vm7 = vcmp.ge.s32.totalorder %v693_v3, 1 }
  0x70   : > { %vm781_vm10 = vcmp.ge.s32.totalorder %v778_v55, 18  ;;  %vm779_vm0 = vcmp.lt.s32.totalorder %v778_v55, 0  ;;  %vm701_vm5 = vmand %vm697_vm15, %vm699_vm14  ;;  %v1614_v30 = vadd.s32 4294967278, %v778_v55  ;;  %vm706_vm3 = vcmp.le.s32.totalorder %v692_v1, 16 }
  0x71   : > { %v783_v5 = vsel %vm781_vm10, %v782_v61, %v1768_v47  ;;  %vm704_vm9 = vmand %vm700_vm2, %vm702_vm1  ;;  %vm707_vm8 = vcmp.le.s32.totalorder %v693_v3, 16  ;;  %v785_v12 = vadd.s32 18, %v778_v55 }
  0x72   : > { %v784_v32 = vsel %vm779_vm0, %v1613_v4, %v783_v5  ;;  %vm705_vm6 = vmand %vm701_vm5, %vm703_vm7  ;;  %v787_v19 = vsel %vm781_vm10, %v1614_v30, %v778_v55 }
  0x73   : > { %vm789_vm11 = vcmp.ge.s32.totalorder %v784_v32, 1  ;;  %vm2155_vm12 = vmand %vm704_vm9, %vm706_vm3  ;;  %v788_v25 = vsel %vm779_vm0, %v785_v12, %v787_v19  ;;  %vm791_vm14 = vcmp.le.s32.totalorder %v784_v32, 16  ;;  %vm838_vm3 = vcmask 146432  }
  0x74   : > { %vm2159_vm15 = vmand %vm705_vm6, %vm707_vm8  ;;  %v710_v33 = vsel %vm2155_vm12, 1, %v1894_v9  ;;  %vm795_vm2 = vcmp.le.s32.totalorder %v788_v25, 16  ;;  %vm843_vm6 = vcmask 130048   ;;  %vm886_vm8 = vcmask 154624  }
  0x75   : > { %vm790_vm10 = vmand %vm2117_vm13, %vm789_vm11  ;;  %v711_v34 = vsel %vm2159_vm15, 1, %v1894_v9  ;;  %vm793_vm13 = vcmp.ge.s32.totalorder %v788_v25, 1  ;;  %vm712_vm5 = vcmp.eq.s32.totalorder %v710_v33, 1  ;;  %vm936_vm11 = vcmask 138240  }
  0x76   : > { %vm2176_vm0 = vmand %vm790_vm10, %vm791_vm14  ;;  %vm713_vm7 = vcmp.eq.s32.totalorder %v711_v34, 1  ;;  %vm990_vm10 = vcmask 7168   ;;  %vm1116_vm14 = vcmask 1039360  }
  0x77   : > { %vm794_vm1 = vmand %vm2176_vm0, %vm793_vm13  ;;  %vm1170_vm0 = vcmask 908288   ;;  %vm1224_vm13 = vcmask 900096  }
  0x9d   : > { %v523_v53 = vpop.permute.xlu2 %522 }
  0xa5   : > { %v528_v7 = vpop.permute.xlu2 %527 }
  0xad   : > { %v730_v49 = vpop.permute.xlu2 %729 }
  0xb3   : > { %v595_v62 = vpop.permute.xlu1 %594  ;;  %v509_v63 = vpop.permute.xlu0 %508 }
  0xb4   : > { %v516_v2 = vmul.f32 %v509_v63, %v502_v59  ;;  %v602_v31 = vmul.f32 %v595_v62, %v586_v23  ;;  %v603_v36 = vmul.f32 %v595_v62, %v587_v26  ;;  %v737_v59 = vmul.f32 %v730_v49, %v723_v51 }
  0xb5   : > { %v749_v3 = vpop.permute.xlu2 %748 }
  0xb6   : > { %v530_v6 = vadd.f32 %v523_v53, %v516_v2 }
  0xb8   : > { %v532_v8 = vmax.f32 %v530_v6, 0.0 }
  0xba   : > { %v580_v11 = vsel %vm579_vm4, %v532_v8, 0.0 }
  0xbb   : > { %v582_v15 = vpack.c.bf16 %v580_v11, %v580_v11  ;;  %v600_v16 = vpop.permute.xlu1 %599  ;;  %v514_v18 = vpop.permute.xlu0 %513 }
  0xbc   : > { %v517_v20 = vmul.f32 %v514_v18, %v503_v10  ;;  %v604_v37 = vmul.f32 %v600_v16, %v588_v27  ;;  %v605_v38 = vmul.f32 %v600_v16, %v589_v28 }
  0xbd   : > { %584 = vst [vmem:[#allocation2] sm:$0xf] %v582_v15 }
  0xbe   : > { %v531_v24 = vadd.f32 %v528_v7, %v517_v20 }
  0xc0   : > { %v533_v29 = vmax.f32 %v531_v24, 0.0 }
  0xc2   : > { %v581_v39 = vsel %vm579_vm4, %v533_v29, 0.0  ;;  %vm796_vm4 = vmand %vm794_vm1, %vm795_vm2  ;;  %vm1278_vm2 = vcmask 891904  }
  0xc3   : > { %v583_v40 = vpack.c.bf16 %v581_v39, %v581_v39  ;;  %v616_v41 = vpop.permute.xlu1 %615  ;;  %v611_v42 = vpop.permute.xlu0 %610  ;;  %v797_v60 = vsel %vm796_vm4, 1, %v1894_v9 }
  0xc4   : > { %v620_v43 = vadd.f32 %v616_v41, %v604_v37  ;;  %v621_v44 = vadd.f32 %v616_v41, %v605_v38  ;;  %v618_v45 = vadd.f32 %v611_v42, %v602_v31  ;;  %v619_v46 = vadd.f32 %v611_v42, %v603_v36  ;;  %v1623_v1 = vld [vmem:[#allocation2] sm:$0xf]  ;;  %v1737_v38 = vld [vmem:[%s2293_s5 + $0x8] sm:$0xff] }
  0xc5   : > { %585 = vst [vmem:[#allocation2 + $0x10] sm:$0xf] %v583_v40  ;;  %vm798_vm9 = vcmp.eq.s32.totalorder %v797_v60, 1 }
  0xc6   : > { %v624_v47 = vmax.f32 %v620_v43, 0.0  ;;  %v625_v17 = vmax.f32 %v621_v44, 0.0  ;;  %v622_v48 = vmax.f32 %v618_v45, 0.0  ;;  %v623_v50 = vmax.f32 %v619_v46, 0.0  ;;  %v1736_v44 = vld [vmem:[%s2293_s5] sm:$0xff] }
  0xc8   : > { %v716_v52 = vsel %vm712_vm5, %v624_v47, 0.0  ;;  %v717_v53 = vsel %vm713_vm7, %v625_v17, 0.0  ;;  %v714_v54 = vsel %vm712_vm5, %v622_v48, 0.0  ;;  %v715_v55 = vsel %vm713_vm7, %v623_v50, 0.0 }
  0xc9   : > { %v719_v56 = vpack.c.bf16 %v717_v53, %v716_v52  ;;  %v718_v57 = vpack.c.bf16 %v715_v55, %v714_v54 }
  0xcb   : > { %721 = vst [vmem:[#allocation2 + $0x14] sm:$0xff] %v719_v56  ;;  %v744_v61 = vpop.permute.xlu1 %743  ;;  %v735_v62 = vpop.permute.xlu0 %734  ;;  %v1738_v56 = vld [vmem:[%s2293_s5 + $0x10] sm:$0xff] }
  0xcc   : > { %720 = vst [vmem:[#allocation2 + $0x4] sm:$0xff] %v718_v57  ;;  %v751_v63 = vadd.f32 %v744_v61, %v737_v59  ;;  %v738_v0 = vmul.f32 %v735_v62, %v724_v58  ;;  %v1734_v2 = vld [vmem:[#allocation2 + $0xc] sm:$0xf0]  ;;  %v1739_v61 = vld [vmem:[%s2293_s5 + $0x18] sm:$0xff] }
  0xcd   : > { %v1624_v4 = vor.u32 %v1734_v2, %v1623_v1  ;;  %v1742_v2 = vld [vmem:[%s2293_s5 + $0x20] sm:$0xff] }
  0xce   : > { %v753_v5 = vmax.f32 %v751_v63, 0.0  ;;  %v752_v6 = vadd.f32 %v749_v3, %v738_v0 }
  0xcf   : > { %832 = vrot.lane.b32.xlu0 %v1624_v4, %s1895_s16 }
  0xd0   : > { %v799_v30 = vsel %vm798_vm9, %v753_v5, 0.0  ;;  %v754_v7 = vmax.f32 %v752_v6, 0.0 }
  0xd1   : > { %v801_v8 = vpack.c.bf16 %v799_v30, %v799_v30 }
  0xd2   : > { %v800_v32 = vsel %vm798_vm9, %v754_v7, 0.0  ;;  %v1735_v9 = vld [vmem:[#allocation2 + $0x14] sm:$0xf0]  ;;  %v1625_v10 = vld [vmem:[#allocation2 + $0x10] sm:$0xf0]  ;;  %v1746_v7 = vld [vmem:[%s2293_s5 + $0x28] sm:$0xff] }
  0xd3   : > { %803 = vst [vmem:[#allocation2 + $0xc] sm:$0xf] %v801_v8  ;;  %v802_v11 = vpack.c.bf16 %v800_v32, %v800_v32  ;;  %v1631_v12 = vld [vmem:[#allocation2 + $0x8] sm:$0xf]  ;;  %v1733_v15 = vld [vmem:[#allocation2 + $0x4] sm:$0xf] }
  0xd4   : > { %v1632_v16 = vor.u32 %v1735_v9, %v1631_v12  ;;  %v1628_v18 = vor.u32 %v1733_v15, %v1625_v10  ;;  %v1681_v19 = vld [vmem:[#allocation2 + $0x4] sm:$0xf]  ;;  %v1744_v20 = vld [vmem:[#allocation2 + $0x10] sm:$0xf0]  ;;  %v1743_v25 = vld [vmem:[#allocation2 + $0x8] sm:$0xf] }
  0xd5   : > { %804 = vst [vmem:[#allocation2 + $0x1c] sm:$0xf] %v802_v11  ;;  %v1682_v23 = vor.u32 %v1744_v20, %v1681_v19  ;;  %v1683_v26 = vld [vmem:[#allocation2 + $0x14] sm:$0xf0]  ;;  %v1665_v45 = vld [vmem:[#allocation2 + $0x4] sm:$0xf] }
  0xd6   : > { %836 = vrot.lane.b32.xlu2 %v1632_v16, %s1895_s16  ;;  %834 = vrot.lane.b32.xlu1 %v1628_v18, %s1895_s16  ;;  %v1686_v29 = vor.u32 %v1743_v25, %v1683_v26  ;;  %v1741_v46 = vld [vmem:[#allocation2 + $0x10] sm:$0xf0]  ;;  %v1740_v47 = vld [vmem:[#allocation2 + $0x8] sm:$0xf]  ;;  %v1667_v17 = vld [vmem:[#allocation2 + $0x14] sm:$0xf0] }
  0xd7   : > { %880 = vrot.lane.b32.xlu0 %v1624_v4, %s1896_s13  ;;  %v1666_v54 = vor.u32 %v1741_v46, %v1665_v45  ;;  %v1670_v55 = vor.u32 %v1740_v47, %v1667_v17  ;;  %v1747_v12 = vld [vmem:[%s2293_s5 + $0x30] sm:$0xff] }
  0xda   : > { %v1689_v27 = vld [vmem:[#allocation2 + $0xc] sm:$0xf] }
  0xdc   : > { %v1745_v24 = vld [vmem:[#allocation2 + $0x18] sm:$0xf0] }
  0xdd   : > { %v1690_v28 = vor.u32 %v1745_v24, %v1689_v27  ;;  %v1749_v24 = vld [vmem:[%s2293_s5 + $0x40] sm:$0xff] }
  0xde   : > { %884 = vrot.lane.b32.xlu2 %v1632_v16, %s1896_s13  ;;  %882 = vrot.lane.b32.xlu1 %v1628_v18, %s1896_s13 }
  0xdf   : > { %930 = vrot.lane.b32.xlu0 %v1624_v4, %s1897_s17 }
  0xe6   : > { %934 = vrot.lane.b32.xlu2 %v1632_v16, %s1897_s17  ;;  %932 = vrot.lane.b32.xlu1 %v1628_v18, %s1897_s17  ;;  %s2326_s17 = sld [smem:[#allocation12_spill]] (%p2038_p0) }
  0xe7   : > { %984 = vrot.lane.b32.xlu0 %v1624_v4, %s1898_s11 }
  0xee   : > { %988 = vrot.lane.b32.xlu2 %v1632_v16, %s1898_s11  ;;  %986 = vrot.lane.b32.xlu1 %v1628_v18, %s1898_s11  ;;  %s1404_s11 = scalar_lea.vmem (%p2038_p0), %s2326_s17, %s1750_s27 }
  0xef   : > { %1110 = vrot.lane.b32.xlu0 %v1682_v23, %s1899_s18 }
  0xf6   : > { %1114 = vrot.lane.b32.xlu2 %v1690_v28, %s1899_s18  ;;  %1112 = vrot.lane.b32.xlu1 %v1686_v29, %s1899_s18 }
  0xf7   : > { %1164 = vrot.lane.b32.xlu0 %v1682_v23, %s1900_s15 }
  0xfe   : > { %1168 = vrot.lane.b32.xlu2 %v1690_v28, %s1900_s15  ;;  %1166 = vrot.lane.b32.xlu1 %v1686_v29, %s1900_s15 }
  0xff   : > { %1218 = vrot.lane.b32.xlu0 %v1682_v23, %s1901_s21 }
 0x106   : > { %1222 = vrot.lane.b32.xlu2 %v1690_v28, %s1901_s21  ;;  %1220 = vrot.lane.b32.xlu1 %v1686_v29, %s1901_s21 }
 0x107   : > { %1272 = vrot.lane.b32.xlu0 %v1682_v23, %s1902_s6  ;;  %v1748_v23 = vld [vmem:[%s2293_s5 + $0x38] sm:$0xff] }
 0x10e   : > { %1276 = vrot.lane.b32.xlu2 %v1690_v28, %s1902_s6  ;;  %1274 = vrot.lane.b32.xlu1 %v1686_v29, %s1902_s6 }
 0x130   : > { %v837_v31 = vpop.permute.xlu2 %836 }
 0x138   : > { %v885_v34 = vpop.permute.xlu2 %884 }
 0x140   : > { %v935_v39 = vpop.permute.xlu2 %934 }
 0x141   : > { %v833_v33 = vpop.permute.xlu0 %832 }
 0x148   : > { %v835_v35 = vpop.permute.xlu1 %834  ;;  %v989_v48 = vpop.permute.xlu2 %988 }
 0x149   : > { %v839_v49 = vsel %vm838_vm3, %v833_v33, %v835_v35  ;;  %v840_v36 = vsel %vm838_vm3, %v835_v35, %v837_v31  ;;  %v881_v37 = vpop.permute.xlu0 %880 }
 0x14a   : > { %854 = vmatpush.bf16.msra.mxu0 %v839_v49  ;;  %868 = vmatpush.bf16.msra.mxu1 %v840_v36 }
 0x14d   : > { %1633 = vmatmul.msk.bf16.vlgmr.msra.gmra.mxu0 %vm843_vm6, %v1737_v38  ;;  %1634 = vmatmul.msk.bf16.vlgmr.msra.gmra.mxu1 %vm843_vm6, %v1737_v38 }
 0x150   : > { %v883_v40 = vpop.permute.xlu1 %882  ;;  %v1115_v58 = vpop.permute.xlu2 %1114 }
 0x151   : > { %v887_v41 = vsel %vm886_vm8, %v881_v37, %v883_v40  ;;  %v888_v42 = vsel %vm886_vm8, %v883_v40, %v885_v34  ;;  %v931_v43 = vpop.permute.xlu0 %930 }
 0x152   : > { %901 = vmatpush.bf16.msra.mxu2 %v887_v41  ;;  %915 = vmatpush.bf16.msra.mxu3 %v888_v42 }
 0x155   : > { %1639 = vmatmul.msk.bf16.vlgmr.msra.gmra.mxu2 %vm843_vm6, %v1736_v44  ;;  %1640 = vmatmul.msk.bf16.vlgmr.msra.gmra.mxu3 %vm843_vm6, %v1736_v44 }
 0x158   : > { %v933_v50 = vpop.permute.xlu1 %932  ;;  %v1169_v3 = vpop.permute.xlu2 %1168 }
 0x159   : > { %v937_v51 = vsel %vm936_vm11, %v931_v43, %v933_v50  ;;  %v938_v52 = vsel %vm936_vm11, %v933_v50, %v935_v39  ;;  %v985_v53 = vpop.permute.xlu0 %984 }
 0x15a   : > { %951 = vmatpush.bf16.msrb.mxu0 %v937_v51  ;;  %965 = vmatpush.bf16.msrb.mxu1 %v938_v52 }
 0x15d   : > { %1647 = vmatmul.msk.bf16.vlgmr.msrb.gmra.mxu0 %vm843_vm6, %v1738_v56  ;;  %1648 = vmatmul.msk.bf16.vlgmr.msrb.gmra.mxu1 %vm843_vm6, %v1738_v56 }
 0x15e   : > { %1060 = vmatpush.bf16.msra.mxu0 %v1666_v54  ;;  %1074 = vmatpush.bf16.msra.mxu1 %v1670_v55 }
 0x160   : > { %v987_v57 = vpop.permute.xlu1 %986  ;;  %v1223_v8 = vpop.permute.xlu2 %1222 }
 0x161   : > { %v991_v59 = vsel %vm990_vm10, %v985_v53, %v987_v57  ;;  %v992_v60 = vsel %vm990_vm10, %v987_v57, %v989_v48  ;;  %v1111_v62 = vpop.permute.xlu0 %1110 }
 0x162   : > { %1005 = vmatpush.bf16.msrb.mxu2 %v991_v59  ;;  %1019 = vmatpush.bf16.msrb.mxu3 %v992_v60 }
 0x165   : > { %1655 = vmatmul.msk.bf16.vlgmr.msrb.gmra.mxu2 %vm843_vm6, %v1739_v61  ;;  %1656 = vmatmul.msk.bf16.vlgmr.msrb.gmra.mxu3 %vm843_vm6, %v1739_v61 }
 0x168   : > { %v1113_v63 = vpop.permute.xlu1 %1112  ;;  %v1277_v15 = vpop.permute.xlu2 %1276 }
 0x169   : > { %v1117_v0 = vsel %vm1116_vm14, %v1111_v62, %v1113_v63  ;;  %v1118_v1 = vsel %vm1116_vm14, %v1113_v63, %v1115_v58  ;;  %v1165_v4 = vpop.permute.xlu0 %1164 }
 0x16a   : > { %1131 = vmatpush.bf16.msra.mxu2 %v1117_v0  ;;  %1145 = vmatpush.bf16.msra.mxu3 %v1118_v1 }
 0x16d   : > { %1671 = vmatmul.msk.bf16.vlgmr.msra.gmra.mxu0 %vm843_vm6, %v1742_v2  ;;  %1672 = vmatmul.msk.bf16.vlgmr.msra.gmra.mxu1 %vm843_vm6, %v1742_v2 }
 0x170   : > { %v1167_v5 = vpop.permute.xlu1 %1166 }
 0x171   : > { %v1171_v6 = vsel %vm1170_vm0, %v1165_v4, %v1167_v5  ;;  %v1172_v30 = vsel %vm1170_vm0, %v1167_v5, %v1169_v3  ;;  %v1219_v32 = vpop.permute.xlu0 %1218 }
 0x172   : > { %1185 = vmatpush.bf16.msrb.mxu0 %v1171_v6  ;;  %1199 = vmatpush.bf16.msrb.mxu1 %v1172_v30 }
 0x175   : > { %1691 = vmatmul.msk.bf16.vlgmr.msra.gmra.mxu2 %vm843_vm6, %v1746_v7  ;;  %1692 = vmatmul.msk.bf16.vlgmr.msra.gmra.mxu3 %vm843_vm6, %v1746_v7 }
 0x178   : > { %v1221_v9 = vpop.permute.xlu1 %1220 }
 0x179   : > { %v1225_v10 = vsel %vm1224_vm13, %v1219_v32, %v1221_v9  ;;  %v1226_v11 = vsel %vm1224_vm13, %v1221_v9, %v1223_v8  ;;  %v1273_v16 = vpop.permute.xlu0 %1272 }
 0x17a   : > { %1239 = vmatpush.bf16.msrb.mxu2 %v1225_v10  ;;  %1253 = vmatpush.bf16.msrb.mxu3 %v1226_v11 }
 0x17d   : > { %1699 = vmatmul.msk.bf16.vlgmr.msrb.gmra.mxu0 %vm843_vm6, %v1747_v12  ;;  %1700 = vmatmul.msk.bf16.vlgmr.msrb.gmra.mxu1 %vm843_vm6, %v1747_v12 }
 0x180   : > { %v1275_v18 = vpop.permute.xlu1 %1274 }
 0x181   : > { %v1279_v19 = vsel %vm1278_vm2, %v1273_v16, %v1275_v18  ;;  %v1280_v20 = vsel %vm1278_vm2, %v1275_v18, %v1277_v15  ;;  %v1903_v18 = vmov 0.0  }
 0x182   : > { %1293 = vmatpush.bf16.msra.mxu0 %v1279_v19  ;;  %1307 = vmatpush.bf16.msra.mxu1 %v1280_v20  ;;  %v1717_v19 = vsel %vm2155_vm12, 1.0, %v1903_v18  ;;  %v1718_v20 = vsel %vm2159_vm15, 1.0, %v1903_v18  ;;  %vm1356_vm12 = vcmask 130112  }
 0x185   : > { %1707 = vmatmul.msk.bf16.vlgmr.msrb.gmra.mxu2 %vm843_vm6, %v1748_v23  ;;  %1708 = vmatmul.msk.bf16.vlgmr.msrb.gmra.mxu3 %vm843_vm6, %v1748_v23 }
 0x18d   : > { %1715 = vmatmul.msk.bf16.vlgmr.msra.gmra.mxu0 %vm843_vm6, %v1749_v24  ;;  %1716 = vmatmul.msk.bf16.vlgmr.msra.gmra.mxu1 %vm843_vm6, %v1749_v24 }
 0x1ca   : > { %v856_v25 = vpop.f32.mrf.mxu0  ;;  %v870_v26 = vpop.f32.mrf.mxu1 }
 0x1d2   : > { %v858_v27 = vpop.f32.mrf.mxu0  ;;  %v872_v28 = vpop.f32.mrf.mxu1 }
 0x1d8   : > { %v903_v29 = vpop.f32.mrf.mxu2  ;;  %v917_v31 = vpop.f32.mrf.mxu3 }
 0x1d9   : > { %v904_v46 = vadd.f32 %v903_v29, %v856_v25  ;;  %v918_v47 = vadd.f32 %v917_v31, %v870_v26 }
 0x1da   : > { %v953_v33 = vpop.f32.mrf.mxu0  ;;  %v967_v34 = vpop.f32.mrf.mxu1 }
 0x1db   : > { %v972_v52 = vadd.f32 %v953_v33, %v904_v46  ;;  %v973_v53 = vadd.f32 %v967_v34, %v918_v47 }
 0x1e0   : > { %v905_v35 = vpop.f32.mrf.mxu2  ;;  %v919_v49 = vpop.f32.mrf.mxu3 }
 0x1e1   : > { %v906_v56 = vadd.f32 %v905_v35, %v858_v27  ;;  %v920_v57 = vadd.f32 %v919_v49, %v872_v28 }
 0x1e2   : > { %v955_v36 = vpop.f32.mrf.mxu0  ;;  %v969_v37 = vpop.f32.mrf.mxu1 }
 0x1e3   : > { %v974_v62 = vadd.f32 %v955_v36, %v906_v56  ;;  %v975_v1 = vadd.f32 %v969_v37, %v920_v57 }
 0x1e8   : > { %v1007_v38 = vpop.f32.mrf.mxu2  ;;  %v1021_v39 = vpop.f32.mrf.mxu3 }
 0x1e9   : > { %v1026_v54 = vadd.f32 %v1007_v38, %v972_v52  ;;  %v1027_v55 = vadd.f32 %v1021_v39, %v973_v53  ;;  %v1349_v52 = vshrl.u32 %v534_v13, 7  ;;  %v1354_v53 = vadd.s32 4294967288, %v2091_v14 }
 0x1ea   : > { %v1062_v40 = vpop.f32.mrf.mxu0  ;;  %v1076_v41 = vpop.f32.mrf.mxu1 }
 0x1eb   : > { %v1081_v60 = vadd.f32 %v1062_v40, %v1026_v54  ;;  %v1082_v61 = vadd.f32 %v1076_v41, %v1027_v55  ;;  %vm1350_vm15 = vcmp.eq.s32.totalorder %v1349_v52, 0 }
 0x1f0   : > { %v1009_v42 = vpop.f32.mrf.mxu2  ;;  %v1023_v43 = vpop.f32.mrf.mxu3 }
 0x1f1   : > { %v1028_v4 = vadd.f32 %v1009_v42, %v974_v62  ;;  %v1029_v5 = vadd.f32 %v1023_v43, %v975_v1 }
 0x1f2   : > { %v1064_v44 = vpop.f32.mrf.mxu0  ;;  %v1078_v45 = vpop.f32.mrf.mxu1 }
 0x1f3   : > { %v1083_v7 = vadd.f32 %v1064_v44, %v1028_v4  ;;  %v1084_v9 = vadd.f32 %v1078_v45, %v1029_v5 }
 0x1f8   : > { %v1133_v17 = vpop.f32.mrf.mxu2  ;;  %v1147_v48 = vpop.f32.mrf.mxu3 }
 0x1f9   : > { %v1152_v2 = vadd.f32 %v1133_v17, %v1081_v60  ;;  %v1153_v3 = vadd.f32 %v1147_v48, %v1082_v61 }
 0x1fa   : > { %v1187_v50 = vpop.f32.mrf.mxu0  ;;  %v1201_v51 = vpop.f32.mrf.mxu1 }
 0x1fb   : > { %v1206_v6 = vadd.f32 %v1187_v50, %v1152_v2  ;;  %v1207_v30 = vadd.f32 %v1201_v51, %v1153_v3 }
 0x200   : > { %v1135_v58 = vpop.f32.mrf.mxu2  ;;  %v1149_v59 = vpop.f32.mrf.mxu3 }
 0x201   : > { %v1154_v12 = vadd.f32 %v1135_v58, %v1083_v7  ;;  %v1155_v23 = vadd.f32 %v1149_v59, %v1084_v9 }
 0x202   : > { %v1189_v63 = vpop.f32.mrf.mxu0  ;;  %v1203_v0 = vpop.f32.mrf.mxu1 }
 0x203   : > { %v1208_v31 = vadd.f32 %v1189_v63, %v1154_v12  ;;  %v1209_v21 = vadd.f32 %v1203_v0, %v1155_v23 }
 0x208   : > { %v1241_v8 = vpop.f32.mrf.mxu2  ;;  %v1255_v32 = vpop.f32.mrf.mxu3 }
 0x209   : > { %v1260_v10 = vadd.f32 %v1241_v8, %v1206_v6  ;;  %v1261_v11 = vadd.f32 %v1255_v32, %v1207_v30 }
 0x20a   : > { %v1295_v15 = vpop.f32.mrf.mxu0  ;;  %v1309_v16 = vpop.f32.mrf.mxu1 }
 0x20b   : > { %v1314_v24 = vadd.f32 %v1295_v15, %v1260_v10  ;;  %v1315_v25 = vadd.f32 %v1309_v16, %v1261_v11 }
 0x20d   : > { %1318 = vst [vmem:[%s2236_s12] sm:$0xff] %v1314_v24  ;;  %v1334_v26 = vmul.f32 %v1314_v24, %v1314_v24  ;;  %v1335_v27 = vmul.f32 %v1315_v25, %v1315_v25  ;;  %v1324_v28 = vmul.f32 %v1717_v19, %v1314_v24  ;;  %v1325_v29 = vmul.f32 %v1718_v20, %v1315_v25 }
 0x20e   : > { %1319 = vst [vmem:[%s2236_s12 + $0x8] sm:$0xff] %v1315_v25 }
 0x20f   : > { %v1328_v33 = vadd.f32 %v1325_v29, %v1324_v28  ;;  %v1338_v34 = vmul.f32 %v1717_v19, %v1334_v26  ;;  %v1339_v22 = vmul.f32 %v1718_v20, %v1335_v27 }
 0x210   : > { %v1243_v35 = vpop.f32.mrf.mxu2  ;;  %v1257_v49 = vpop.f32.mrf.mxu3 }
 0x211   : > { %v1262_v36 = vadd.f32 %v1243_v35, %v1208_v31  ;;  %v1263_v37 = vadd.f32 %v1257_v49, %v1209_v21  ;;  %1329 = vadd.xlane.f32.xlu0 %v1328_v33  ;;  %v1342_v38 = vadd.f32 %v1339_v22, %v1338_v34 }
 0x212   : > { %v1297_v39 = vpop.f32.mrf.mxu0  ;;  %v1311_v40 = vpop.f32.mrf.mxu1 }
 0x213   : > { %v1316_v41 = vadd.f32 %v1297_v39, %v1262_v36  ;;  %v1317_v42 = vadd.f32 %v1311_v40, %v1263_v37  ;;  %1343 = vadd.xlane.f32.xlu2 %v1342_v38 }
 0x215   : > { %1320 = vst [vmem:[%s2236_s12 + $0x10] sm:$0xff] %v1316_v41  ;;  %v1336_v43 = vmul.f32 %v1316_v41, %v1316_v41  ;;  %v1337_v44 = vmul.f32 %v1317_v42, %v1317_v42  ;;  %v1326_v45 = vmul.f32 %v1717_v19, %v1316_v41  ;;  %v1327_v46 = vmul.f32 %v1718_v20, %v1317_v42  ;;  %v1419_v0 = vld [vmem:[%s2236_s12 + $0x8] sm:$0xff] (%p2038_p0) }
 0x216   : > { %1321 = vst [vmem:[%s2236_s12 + $0x18] sm:$0xff] %v1317_v42 }
 0x217   : > { %v1331_v47 = vadd.f32 %v1327_v46, %v1326_v45  ;;  %v1340_v17 = vmul.f32 %v1717_v19, %v1336_v43  ;;  %v1341_v48 = vmul.f32 %v1718_v20, %v1337_v44  ;;  %1420 = vst [vmem:[%s1404_s11 + $0x8] sm:$0xff] (%p2038_p0), %v1419_v0 }
 0x219   : > { %1332 = vadd.xlane.f32.xlu1 %v1331_v47  ;;  %v1345_v50 = vadd.f32 %v1341_v48, %v1340_v17 }
 0x21b   : > { %1346 = vadd.xlane.f32.xlu2 %v1345_v50 }
 0x21c   : > { %v1421_v1 = vld [vmem:[%s2236_s12 + $0x10] sm:$0xff] (%p2038_p0) }
 0x21d   : > { %v1423_v2 = vld [vmem:[%s2236_s12 + $0x18] sm:$0xff] (%p2038_p0)  ;;  %1422 = vst [vmem:[%s1404_s11 + $0x30] sm:$0xff] (%p2038_p0), %v1421_v1 }
 0x21e   : > { %1424 = vst [vmem:[%s1404_s11 + $0x38] sm:$0xff] (%p2038_p0), %v1423_v2 }
 0x284   : > { %v1330_v54 = vpop.xlane.xlu0 %1329 }
 0x285   : > { %v1353_v56 = vperm.slane %v1330_v54, %v2091_v14 }
 0x286   : > { %v1344_v51 = vpop.xlane.xlu2 %1343 }
 0x287   : > { %v1375_v59 = vperm.slane %v1344_v51, %v2091_v14  ;;  %v1417_v14 = vld [vmem:[%s2236_s12] sm:$0xff] (%p2038_p0) }
 0x288   : > { %1418 = vst [vmem:[%s1404_s11] sm:$0xff] (%p2038_p0), %v1417_v14 }
 0x28c   : > { %v1333_v55 = vpop.xlane.xlu1 %1332 }
 0x28d   : > { %v1355_v57 = vperm.slane %v1333_v55, %v1354_v53 }
 0x28e   : > { %v1347_v58 = vpop.xlane.xlu2 %1346 }
 0x28f   : > { %v1357_v60 = vsel %vm1356_vm12, %v1355_v57, %v1353_v56  ;;  %v1376_v61 = vperm.slane %v1347_v58, %v1354_v53  ;;  %1401 = sbr.rel (!%p2038_p0) target bundleno = 660 (0x294), region = 147 }
 0x290   : > { %v1371_v13 = vsel %vm1350_vm15, %v1357_v60, 0.0 }
 0x291   : > { %1372 = vst.msk [vmem:[%s494_s9] sm:$0xff] %vm843_vm6, %v1371_v13  ;;  %v1377_v62 = vsel %vm1356_vm12, %v1376_v61, %v1375_v59 }
 0x292   : > { %v1385_v63 = vsel %vm1350_vm15, %v1377_v62, 0.0 }
 0x293   : > { %1386 = vst.msk [vmem:[%s498_s20] sm:$0xff] %vm843_vm6, %v1385_v63 }
 0x294 PF: > { %s2327_s11 = sld [smem:[#allocation8_spill]]  ;;  %s2331_s27 = smov %s1872_s28 }
 0x295   : > { %s2328_s18 = sld [smem:[#allocation10_spill]]  ;;  %s2332_s28 = smov %s2045_s19 }
 0x296   : > { %s2329_s9 = sld [smem:[#allocation7_spill]]  ;;  %s2333_s29 = smov %s1880_s30 }
 0x297   : > { %s2330_s10 = sld [smem:[#allocation9_spill]] }
 0x29a   : > { %p16_p7 = scmp.ge.s32.totalorder %s2327_s11, 5  }
 0x29b   : > { %s2334_s30 = smov %s2328_s18 }
 0x29c   :  { %18 = sbr.rel (!%p16_p7) target bundleno = 6 (0x6), region = 249 }

</bundles_post_ra>
